<compile_context>
chip_gen: v5e
topology: v5e:2x2
jax: 0.10.0
libtpu: 0.0.40
codegen_flags: <defaults>
</compile_context>

<pallas_src>
import functools

import jax
import jax.numpy as jnp
from jax.experimental import pallas as pl
from jax.experimental.pallas import tpu as pltpu

HIDDEN = 128
_TB_GRAIN = 1024  # keeps tb//8 a multiple of 128 -> unmasked, lane-dense stores


def _round_up(x, m):
    return (x + m - 1) // m * m


def _reward_kernel(z_ref, a_ref, w1z_ref, w1a_ref, b1_ref, w2_ref, b2_ref, o_ref):
    # z_ref:   (tb, z_dim)      f32  VMEM (streamed)
    # a_ref:   (tb, a_dim)      f32  VMEM (streamed)
    # w1z_ref: (z_dim, 128)     f32  VMEM (resident)
    # w1a_ref: (a_dim, 128)     f32  VMEM (resident)
    # b1_ref:  (1, 128)         f32  VMEM (resident)
    # w2_ref:  (1, 128)         f32  VMEM (resident)
    # b2_ref:  (1, 1)           f32  VMEM (resident)
    # o_ref:   (8, tb // 8)     f32  VMEM (lane-dense output slab)
    lanes = o_ref.shape[1]  # tb // 8, always a multiple of 128

    # First layer on the MXU; torch.cat fused as split-K matmuls.  f32 in,
    # f32 accumulate -- the MXU has huge slack in this memory-bound kernel.
    h = (
        jnp.dot(z_ref[...], w1z_ref[...], preferred_element_type=jnp.float32)
        + jnp.dot(a_ref[...], w1a_ref[...], preferred_element_type=jnp.float32)
        + b1_ref[...]
    )
    h = jnp.maximum(h, 0.0)  # ReLU (VPU)

    # Second layer (N=1): VPU multiply + XLU lane reduction, landing directly
    # in the lane-dense output layout.  The (tb,128)->(8,tb//8,128) reshape is
    # tile-aligned (tb//8 is a multiple of 8), so it is a layout-trivial
    # reinterpretation; the axis=-1 reduce maps row n of the tile to
    # o_ref[n // lanes, n % lanes].
    hw = h * w2_ref[...]                                   # (tb, 128)
    r = jnp.sum(hw.reshape(8, lanes, HIDDEN), axis=-1)     # (8, tb//8)
    o_ref[...] = (r + b2_ref[...]).astype(o_ref.dtype)


@functools.partial(jax.jit, static_argnames=("block_b",))
def reward_predictor_forward(z, a, params, *, block_b=8192):
    """Pallas implementation of RewardPredictor.forward(z, a) -> (B, 1)."""
    B, z_dim = z.shape
    a_dim = a.shape[1]

    w1, b1, w2, b2 = params["w1"], params["b1"], params["w2"], params["b2"]

    # Split the first-layer weight so the concat happens as split-K matmuls.
    w1z = w1[:z_dim]                      # (z_dim, 128), resident
    w1a = w1[z_dim:]                      # (a_dim, 128), resident
    b1r = b1.reshape(1, HIDDEN)           # (1, 128)
    w2r = w2.reshape(1, HIDDEN)           # (1, 128) row for VPU mul + reduce
    b2r = b2.reshape(1, 1)                # (1, 1)

    # --- batch tiling -----------------------------------------------------
    # (i)   big tiles amortize the ~0.35 us per-grid-step overhead,
    # (ii)  >= 2 grid steps whenever B >= 2*_TB_GRAIN so both v7x TCs get work,
    # (iii) tb a multiple of 1024 so tb//8 (the output lane dim) is a multiple
    #       of 128 and the in-kernel reshape stays tile-aligned.
    tb = min(block_b, _round_up(pl.cdiv(B, 2), _TB_GRAIN))
    tb = _round_up(tb, _TB_GRAIN)
    num_tiles = pl.cdiv(B, tb)
    lanes = tb // 8

    zi, ai = z, a
    if B < tb:
        # Only possible for B < 2048: a tiny copy.  For large B we never pad;
        # the partial tail block reads OOB garbage, but every row is computed
        # independently and the tail of the output is sliced off below.
        zi = jnp.pad(z, ((0, tb - B), (0, 0)))
        ai = jnp.pad(a, ((0, tb - B), (0, 0)))

    # TODO(synk): if the upstream producer can emit a single lane-packed
    # (B, z_dim + a_dim) buffer (z and a are 128-lane-padded in HBM), pass it
    # as one input to roughly halve the padded read stream; and only add
    # pipeline_mode=pl.Buffered(3) on the z/a specs if xprof still shows
    # exposed input DMA after the tile-size increase.
    out = pl.pallas_call(
        _reward_kernel,
        out_shape=jax.ShapeDtypeStruct((num_tiles * 8, lanes), jnp.float32),
        grid=(num_tiles,),
        in_specs=[
            pl.BlockSpec((tb, z_dim), lambda i: (i, 0)),        # z tile (streamed)
            pl.BlockSpec((tb, a_dim), lambda i: (i, 0)),        # a tile (streamed)
            pl.BlockSpec((z_dim, HIDDEN), lambda i: (0, 0)),    # w1[:z_dim] (resident)
            pl.BlockSpec((a_dim, HIDDEN), lambda i: (0, 0)),    # w1[z_dim:] (resident)
            pl.BlockSpec((1, HIDDEN), lambda i: (0, 0)),        # b1 (resident)
            pl.BlockSpec((1, HIDDEN), lambda i: (0, 0)),        # w2 row (resident)
            pl.BlockSpec((1, 1), lambda i: (0, 0)),             # b2 (resident)
        ],
        out_specs=pl.BlockSpec((8, lanes), lambda i: (i, 0)),   # lane-dense slab
        compiler_params=pltpu.CompilerParams(
            dimension_semantics=("parallel",),      # shard batch tiles across TCs (v7x)
            vmem_limit_bytes=32 * 1024 * 1024,      # see VMEM budget in header comment
        ),
    )(zi, ai, w1z, w1a, b1r, w2r, b2r)

    # Undo the lane-dense tiling: flat index = tile*tb + s*lanes + l == batch row.
    return out.reshape(-1)[:B].reshape(B, 1)


def init_params(key, z_dim, action_shape, hidden=HIDDEN):
    """Deterministic parameter init (mimics nn.Linear default uniform ranges)."""
    in_dim = z_dim + action_shape
    k1, k2, k3, k4 = jax.random.split(key, 4)
    bound1 = 1.0 / jnp.sqrt(in_dim)
    bound2 = 1.0 / jnp.sqrt(hidden)
    return {
        # Stored as (in, out) so the kernel does x @ W (transpose of torch layout).
        "w1": jax.random.uniform(k1, (in_dim, hidden), jnp.float32, -bound1, bound1),
        "b1": jax.random.uniform(k2, (1, hidden), jnp.float32, -bound1, bound1),
        "w2": jax.random.uniform(k3, (hidden, 1), jnp.float32, -bound2, bound2),
        "b2": jax.random.uniform(k4, (1, 1), jnp.float32, -bound2, bound2),
    }


def reference_forward(z, a, params):
    x = jnp.concatenate([z, a], axis=1)
    h = jnp.maximum(
        jnp.dot(x, params["w1"], precision=jax.lax.Precision.HIGHEST) + params["b1"], 0.0
    )
    return jnp.dot(h, params["w2"], precision=jax.lax.Precision.HIGHEST) + params["b2"]


if __name__ == "__main__":
    B, Z_DIM, ACTION_SHAPE = 8, 32, 4

    key = jax.random.PRNGKey(0)
    kz, ka, kp = jax.random.split(key, 3)
    z = jax.random.normal(kz, (B, Z_DIM), jnp.float32)
    a = jax.random.normal(ka, (B, ACTION_SHAPE), jnp.float32)
    params = init_params(kp, Z_DIM, ACTION_SHAPE)

    r_hat = reward_predictor_forward(z, a, params)
    jax.block_until_ready(r_hat)

    # The kernel is f32 end-to-end, so in practice it matches the f32 reference
    # to ~1e-5; the loose bound only guards against MXU pass-precision choices.
    r_ref = reference_forward(z, a, params)
    assert r_hat.shape == (B, 1)
    assert jnp.allclose(r_hat, r_ref, atol=3e-2, rtol=3e-2), float(
        jnp.max(jnp.abs(r_hat - r_ref))
    )

    # Exercise the multi-tile grid + partial tail block path (B >= tb, B not a
    # multiple of tb): no wrapper padding, OOB rows discarded by the [:B] slice.
    B2 = 2500
    kz2, ka2 = jax.random.split(jax.random.PRNGKey(1), 2)
    z2 = jax.random.normal(kz2, (B2, Z_DIM), jnp.float32)
    a2 = jax.random.normal(ka2, (B2, ACTION_SHAPE), jnp.float32)
    r2 = reward_predictor_forward(z2, a2, params)
    jax.block_until_ready(r2)
    r2_ref = reference_forward(z2, a2, params)
    assert r2.shape == (B2, 1)
    assert jnp.allclose(r2, r2_ref, atol=3e-2, rtol=3e-2), float(
        jnp.max(jnp.abs(r2 - r2_ref))
    )

    print("KERNEL_OK")
</pallas_src>

<mosaic_0001>
module attributes {stable_mosaic.version = 11 : i64} {
  func.func @_reward_kernel(%arg0: i32, %arg1: memref<1024x32xf32, #tpu.memory_space<vmem>>, %arg2: memref<1024x4xf32, #tpu.memory_space<vmem>>, %arg3: memref<32x128xf32, #tpu.memory_space<vmem>>, %arg4: memref<4x128xf32, #tpu.memory_space<vmem>>, %arg5: memref<1x128xf32, #tpu.memory_space<vmem>>, %arg6: memref<1x128xf32, #tpu.memory_space<vmem>>, %arg7: memref<1x1xf32, #tpu.memory_space<vmem>>, %arg8: memref<8x128xf32, #tpu.memory_space<vmem>>) attributes {dimension_semantics = [#tpu.dimension_semantics<parallel>], iteration_bounds = array<i64: 1>, scalar_prefetch = 0 : i64, scratch_operands = 0 : i64, tpu.core_type = #tpu.core_type<tc>, window_params = [{transform_indices = @transform_0, window_bounds = array<i64: 1024, 32>}, {transform_indices = @transform_1, window_bounds = array<i64: 1024, 4>}, {pipeline_mode = #tpu.pipeline_mode<synchronous>, transform_indices = @transform_2, window_bounds = array<i64: 32, 128>}, {pipeline_mode = #tpu.pipeline_mode<synchronous>, transform_indices = @transform_3, window_bounds = array<i64: 4, 128>}, {pipeline_mode = #tpu.pipeline_mode<synchronous>, transform_indices = @transform_4, window_bounds = array<i64: 1, 128>}, {pipeline_mode = #tpu.pipeline_mode<synchronous>, transform_indices = @transform_5, window_bounds = array<i64: 1, 128>}, {pipeline_mode = #tpu.pipeline_mode<synchronous>, transform_indices = @transform_6, window_bounds = array<i64: 1, 1>}, {transform_indices = @transform_7, window_bounds = array<i64: 8, 128>}]} {
    %c0 = arith.constant 0 : index
    %c0_0 = arith.constant 0 : index
    %0 = vector.load %arg1[%c0, %c0_0] : memref<1024x32xf32, #tpu.memory_space<vmem>>, vector<1024x32xf32>
    %c0_1 = arith.constant 0 : index
    %c0_2 = arith.constant 0 : index
    %1 = vector.load %arg3[%c0_1, %c0_2] : memref<32x128xf32, #tpu.memory_space<vmem>>, vector<32x128xf32>
    %cst = arith.constant dense<0.000000e+00> : vector<1024x128xf32>
    %2 = tpu.matmul %0, %1, %cst {dimension_numbers = #tpu.dot_dimension_numbers<[1], [0], [0], [1], [0, 0, 1, 1], [], []>} : vector<1024x32xf32>, vector<32x128xf32>, vector<1024x128xf32> -> vector<1024x128xf32>
    %c0_3 = arith.constant 0 : index
    %c0_4 = arith.constant 0 : index
    %3 = vector.load %arg2[%c0_3, %c0_4] : memref<1024x4xf32, #tpu.memory_space<vmem>>, vector<1024x4xf32>
    %c0_5 = arith.constant 0 : index
    %c0_6 = arith.constant 0 : index
    %4 = vector.load %arg4[%c0_5, %c0_6] : memref<4x128xf32, #tpu.memory_space<vmem>>, vector<4x128xf32>
    %cst_7 = arith.constant dense<0.000000e+00> : vector<1024x128xf32>
    %5 = tpu.matmul %3, %4, %cst_7 {dimension_numbers = #tpu.dot_dimension_numbers<[1], [0], [0], [1], [0, 0, 1, 1], [], []>} : vector<1024x4xf32>, vector<4x128xf32>, vector<1024x128xf32> -> vector<1024x128xf32>
    %6 = arith.addf %2, %5 : vector<1024x128xf32>
    %c0_8 = arith.constant 0 : index
    %c0_9 = arith.constant 0 : index
    %7 = vector.load %arg5[%c0_8, %c0_9] : memref<1x128xf32, #tpu.memory_space<vmem>>, vector<1x128xf32>
    %8 = vector.broadcast %7 : vector<1x128xf32> to vector<1024x128xf32>
    %9 = arith.addf %6, %8 : vector<1024x128xf32>
    %cst_10 = arith.constant 0.000000e+00 : f32
    %10 = vector.broadcast %cst_10 : f32 to vector<1024x128xf32>
    %11 = arith.maximumf %9, %10 : vector<1024x128xf32>
    %c0_11 = arith.constant 0 : index
    %c0_12 = arith.constant 0 : index
    %12 = vector.load %arg6[%c0_11, %c0_12] : memref<1x128xf32, #tpu.memory_space<vmem>>, vector<1x128xf32>
    %13 = vector.broadcast %12 : vector<1x128xf32> to vector<1024x128xf32>
    %14 = arith.mulf %11, %13 : vector<1024x128xf32>
    %15 = vector.shape_cast %14 : vector<1024x128xf32> to vector<8x128x128xf32>
    %cst_13 = arith.constant dense<0.000000e+00> : vector<8x128xf32>
    %16 = vector.multi_reduction <add>, %15, %cst_13 [2] : vector<8x128x128xf32> to vector<8x128xf32>
    %c0_14 = arith.constant 0 : index
    %c0_15 = arith.constant 0 : index
    %17 = vector.load %arg7[%c0_14, %c0_15] : memref<1x1xf32, #tpu.memory_space<vmem>>, vector<1x1xf32>
    %18 = vector.broadcast %17 : vector<1x1xf32> to vector<8x128xf32>
    %19 = arith.addf %16, %18 : vector<8x128xf32>
    %c0_16 = arith.constant 0 : index
    %c0_17 = arith.constant 0 : index
    %20 = vector.load %arg8[%c0_16, %c0_17] : memref<8x128xf32, #tpu.memory_space<vmem>>, vector<8x128xf32>
    tpu.vector_store %arg8[%c0_16, %c0_17], %19 {strides = array<i32>} : memref<8x128xf32, #tpu.memory_space<vmem>>, vector<8x128xf32>,
    return
  }
  func.func @transform_0(%arg0: i32) -> (i32, i32) {
    %c0_i32 = arith.constant 0 : i32
    %c0_i32_0 = arith.constant 0 : i32
    return %arg0, %c0_i32 : i32, i32
  }
  func.func @transform_1(%arg0: i32) -> (i32, i32) {
    %c0_i32 = arith.constant 0 : i32
    %c0_i32_0 = arith.constant 0 : i32
    return %arg0, %c0_i32 : i32, i32
  }
  func.func @transform_2(%arg0: i32) -> (i32, i32) {
    %c0_i32 = arith.constant 0 : i32
    %c0_i32_0 = arith.constant 0 : i32
    %c0_i32_1 = arith.constant 0 : i32
    return %c0_i32, %c0_i32_0 : i32, i32
  }
  func.func @transform_3(%arg0: i32) -> (i32, i32) {
    %c0_i32 = arith.constant 0 : i32
    %c0_i32_0 = arith.constant 0 : i32
    %c0_i32_1 = arith.constant 0 : i32
    return %c0_i32, %c0_i32_0 : i32, i32
  }
  func.func @transform_4(%arg0: i32) -> (i32, i32) {
    %c0_i32 = arith.constant 0 : i32
    %c0_i32_0 = arith.constant 0 : i32
    %c0_i32_1 = arith.constant 0 : i32
    return %c0_i32, %c0_i32_0 : i32, i32
  }
  func.func @transform_5(%arg0: i32) -> (i32, i32) {
    %c0_i32 = arith.constant 0 : i32
    %c0_i32_0 = arith.constant 0 : i32
    %c0_i32_1 = arith.constant 0 : i32
    return %c0_i32, %c0_i32_0 : i32, i32
  }
  func.func @transform_6(%arg0: i32) -> (i32, i32) {
    %c0_i32 = arith.constant 0 : i32
    %c0_i32_0 = arith.constant 0 : i32
    %c0_i32_1 = arith.constant 0 : i32
    return %c0_i32, %c0_i32_0 : i32, i32
  }
  func.func @transform_7(%arg0: i32) -> (i32, i32) {
    %c0_i32 = arith.constant 0 : i32
    %c0_i32_0 = arith.constant 0 : i32
    return %arg0, %c0_i32 : i32, i32
  }
}

</mosaic_0001>

<bundles_post_ra>
// kernel: reward_predictor_forward.1
= control target key start
LH: loop header
LB: loop body
LE: loop exit
PB: predicated region body
PF: predicated region fallthrough
CT: control target
= control target key end

     0   :  { %vm674_vm0 = vcmask 1043456   ;;  %vm289_vm1 = vcmask 31744   ;;  %vm1079_vm2 = vcmask 261120   ;;  %v3349_v40 = vmov 0   ;;  %s5249_s3 = inlined_call_operand.vmem [shape: f32[4,128], index: 3, kind: input, shape index: {}]   ;;  %s5250_s2 = inlined_call_operand.vmem [shape: f32[32,128], index: 2, kind: input, shape index: {}]   ;;  %s5251_s1 = inlined_call_operand.vmem [shape: f32[1024,4], index: 1, kind: input, shape index: {}]   ;;  %s5252_s0 = inlined_call_operand.vmem [shape: f32[1024,32], index: 0, kind: input, shape index: {}]   ;;  %s5253_s4 = inlined_call_operand.vmem [shape: f32[1,128], index: 4, kind: input, shape index: {}]   ;;  %s5254_s5 = inlined_call_operand.vmem [shape: f32[1,128], index: 5, kind: input, shape index: {}]   ;;  %s5255_s6 = inlined_call_operand.<no memory space> [shape: f32[1,1], index: 6, kind: input, shape index: {}]   ;;  %s5256_s7 = inlined_call_operand.vmem [shape: f32[8,128], index: 7, kind: output, shape index: {}]  }
   0x1   :  { %v288_v0 = vld [vmem:[%s5249_s3] sm:$0xf]  ;;  %v159_v1 = vld [vmem:[%s5250_s2 + $0x18] sm:$0xff]  ;;  %v158_v3 = vld [vmem:[%s5250_s2 + $0x10] sm:$0xff]  ;;  %v12_v35 = vstv %s5255_s6  ;;  %3339 = vset.pattern.permute.xlu0 %v3349_v40  ;;  %vm2781_vm3 = vcmask 130112   ;;  %vm2785_vm4 = vcmask 195712  }
   0x2   :  { %v160_v2 = vld [vmem:[%s5251_s1] sm:$0xff]  ;;  %3076 = vmatpush.msk.msra.mxu0 %vm674_vm0, %v288_v0  ;;  %1476 = vmatpush.msra.mxu1 %v159_v1  ;;  %v157_v4 = vld [vmem:[%s5250_s2 + $0x8] sm:$0xff]  ;;  %v226_v10 = vld [vmem:[%s5251_s1 + $0x210] sm:$0xff]  ;;  %13 = vst [vmem:[#allocation2] sm:$0x1] %v12_v35  ;;  %vm2789_vm5 = vcmask 261312  }
   0x3   :  { %3334 = vmatpush.msra.mxu2 %v159_v1  ;;  %3077 = vmatmul.msk.f32.vlgmr.msra.gmra.mxu0 %vm289_vm1, %v160_v2  ;;  %v225_v5 = vld [vmem:[%s5251_s1 + $0x208] sm:$0xff]  ;;  %v156_v6 = vld [vmem:[%s5250_s2] sm:$0xff]  ;;  %v162_v13 = vld [vmem:[%s5251_s1 + $0x10] sm:$0xff]  ;;  %vm2793_vm6 = vcmask 326912   ;;  %vm2797_vm7 = vcmask 392512   ;;  %vm2801_vm8 = vcmask 458112  }
   0x4   :  { %1477 = vmatpush.msra.mxu1 %v158_v3  ;;  %3333 = vmatpush.msk.msra.mxu3 %vm674_vm0, %v288_v0  ;;  %v28_v7 = vld [vmem:[%s5252_s0] sm:$0xff]  ;;  %v161_v9 = vld [vmem:[%s5251_s1 + $0x8] sm:$0xff]  ;;  %v227_v14 = vld [vmem:[%s5251_s1 + $0x218] sm:$0xff]  ;;  %vm2805_vm9 = vcmask 523712   ;;  %vm2809_vm10 = vcmask 589312   ;;  %vm2813_vm11 = vcmask 654912  }
   0x5   :  { %3335 = vmatpush.msra.mxu2 %v158_v3  ;;  %3142 = vmatmul.msk.f32.vlgmr.msra.gmra.mxu3 %vm289_vm1, %v225_v5  ;;  %v92_v8 = vld [vmem:[%s5252_s0 + $0x200] sm:$0xff]  ;;  %v29_v11 = vld [vmem:[%s5252_s0 + $0x8] sm:$0xff]  ;;  %v30_v15 = vld [vmem:[%s5252_s0 + $0x10] sm:$0xff]  ;;  %vm2817_vm12 = vcmask 720512   ;;  %vm2821_vm13 = vcmask 786112   ;;  %vm5259_vm14 = vcmask 851712  }
   0x6   :  { %1478 = vmatpush.msra.mxu1 %v157_v4  ;;  %v93_v12 = vld [vmem:[%s5252_s0 + $0x208] sm:$0xff]  ;;  %v94_v16 = vld [vmem:[%s5252_s0 + $0x210] sm:$0xff]  ;;  %v163_v17 = vld [vmem:[%s5251_s1 + $0x18] sm:$0xff]  ;;  %vm5258_vm15 = vcmask 917312   ;;  %vm5257_vm0 = vcmask 982912  }
   0x7   :  { %3336 = vmatpush.msra.mxu2 %v157_v4  ;;  %v228_v18 = vld [vmem:[%s5251_s1 + $0x220] sm:$0xff]  ;;  %v31_v19 = vld [vmem:[%s5252_s0 + $0x18] sm:$0xff]  ;;  %v229_v22 = vld [vmem:[%s5251_s1 + $0x228] sm:$0xff] }
   0x8   :  { %1479 = vmatpush.msra.mxu1 %v156_v6  ;;  %v95_v20 = vld [vmem:[%s5252_s0 + $0x218] sm:$0xff]  ;;  %v164_v21 = vld [vmem:[%s5251_s1 + $0x20] sm:$0xff]  ;;  %v165_v25 = vld [vmem:[%s5251_s1 + $0x28] sm:$0xff] }
   0x9   :  { %3337 = vmatpush.msra.mxu2 %v156_v6  ;;  %3205 = vmatmul.msk.f32.vlgmr.msra.gmra.mxu1 %vm1079_vm2, %v28_v7  ;;  %v32_v23 = vld [vmem:[%s5252_s0 + $0x20] sm:$0xff]  ;;  %v230_v26 = vld [vmem:[%s5251_s1 + $0x230] sm:$0xff]  ;;  %v33_v27 = vld [vmem:[%s5252_s0 + $0x28] sm:$0xff] }
   0xa   :  { %3269 = vmatmul.msk.f32.vlgmr.msra.gmra.mxu2 %vm1079_vm2, %v92_v8  ;;  %v96_v24 = vld [vmem:[%s5252_s0 + $0x220] sm:$0xff]  ;;  %v97_v28 = vld [vmem:[%s5252_s0 + $0x228] sm:$0xff]  ;;  %v166_v29 = vld [vmem:[%s5251_s1 + $0x30] sm:$0xff] }
   0xb   :  { %3078 = vmatmul.msk.f32.gmra.mxu0 %vm289_vm1, %v161_v9  ;;  %v231_v30 = vld [vmem:[%s5251_s1 + $0x238] sm:$0xff]  ;;  %v34_v31 = vld [vmem:[%s5252_s0 + $0x30] sm:$0xff]  ;;  %v232_v34 = vld [vmem:[%s5251_s1 + $0x240] sm:$0xff] }
   0xc   :  { %v98_v32 = vld [vmem:[%s5252_s0 + $0x230] sm:$0xff]  ;;  %v167_v33 = vld [vmem:[%s5251_s1 + $0x38] sm:$0xff]  ;;  %v168_v38 = vld [vmem:[%s5251_s1 + $0x40] sm:$0xff] }
   0xd   :  { %3143 = vmatmul.msk.f32.gmra.mxu3 %vm289_vm1, %v226_v10  ;;  %v35_v36 = vld [vmem:[%s5252_s0 + $0x38] sm:$0xff]  ;;  %v233_v39 = vld [vmem:[%s5251_s1 + $0x248] sm:$0xff]  ;;  %v3340_v41 = vld [vmem:[#allocation2] ss:$0 sm:$0xff] }
   0xe   :  { %v99_v37 = vld [vmem:[%s5252_s0 + $0x238] sm:$0xff]  ;;  %v36_v42 = vld [vmem:[%s5252_s0 + $0x40] sm:$0xff]  ;;  %2517 = vperm.xlu0 %3339, %v3340_v41   ;;  %v169_v44 = vld [vmem:[%s5251_s1 + $0x48] sm:$0xff] }
   0xf   :  { %v100_v43 = vld [vmem:[%s5252_s0 + $0x240] sm:$0xff]  ;;  %v234_v45 = vld [vmem:[%s5251_s1 + $0x250] sm:$0xff]  ;;  %v37_v46 = vld [vmem:[%s5252_s0 + $0x48] sm:$0xff] }
  0x10   :  { %v101_v47 = vld [vmem:[%s5252_s0 + $0x248] sm:$0xff]  ;;  %v170_v48 = vld [vmem:[%s5251_s1 + $0x50] sm:$0xff]  ;;  %v235_v49 = vld [vmem:[%s5251_s1 + $0x258] sm:$0xff] }
  0x11   :  { %3206 = vmatmul.msk.f32.gmra.mxu1 %vm1079_vm2, %v29_v11  ;;  %v38_v50 = vld [vmem:[%s5252_s0 + $0x50] sm:$0xff]  ;;  %v171_v52 = vld [vmem:[%s5251_s1 + $0x58] sm:$0xff]  ;;  %v236_v53 = vld [vmem:[%s5251_s1 + $0x260] sm:$0xff] }
  0x12   :  { %3270 = vmatmul.msk.f32.gmra.mxu2 %vm1079_vm2, %v93_v12  ;;  %v102_v51 = vld [vmem:[%s5252_s0 + $0x250] sm:$0xff]  ;;  %v39_v54 = vld [vmem:[%s5252_s0 + $0x58] sm:$0xff]  ;;  %v172_v56 = vld [vmem:[%s5251_s1 + $0x60] sm:$0xff] }
  0x13   :  { %3079 = vmatmul.msk.f32.gmra.mxu0 %vm289_vm1, %v162_v13  ;;  %v103_v55 = vld [vmem:[%s5252_s0 + $0x258] sm:$0xff]  ;;  %v237_v57 = vld [vmem:[%s5251_s1 + $0x268] sm:$0xff]  ;;  %v40_v58 = vld [vmem:[%s5252_s0 + $0x60] sm:$0xff] }
  0x14   :  { %v104_v59 = vld [vmem:[%s5252_s0 + $0x260] sm:$0xff]  ;;  %v173_v60 = vld [vmem:[%s5251_s1 + $0x68] sm:$0xff]  ;;  %v238_v61 = vld [vmem:[%s5251_s1 + $0x270] sm:$0xff] }
  0x15   :  { %3144 = vmatmul.msk.f32.gmra.mxu3 %vm289_vm1, %v227_v14  ;;  %v41_v62 = vld [vmem:[%s5252_s0 + $0x68] sm:$0xff]  ;;  %v174_v0 = vld [vmem:[%s5251_s1 + $0x70] sm:$0xff]  ;;  %v239_v1 = vld [vmem:[%s5251_s1 + $0x278] sm:$0xff] }
  0x16   :  { %v105_v63 = vld [vmem:[%s5252_s0 + $0x268] sm:$0xff]  ;;  %v42_v2 = vld [vmem:[%s5252_s0 + $0x70] sm:$0xff]  ;;  %v175_v4 = vld [vmem:[%s5251_s1 + $0x78] sm:$0xff] }
  0x17   :  { %v106_v3 = vld [vmem:[%s5252_s0 + $0x270] sm:$0xff]  ;;  %v240_v5 = vld [vmem:[%s5251_s1 + $0x280] sm:$0xff]  ;;  %v43_v6 = vld [vmem:[%s5252_s0 + $0x78] sm:$0xff] }
  0x18   :  { %v107_v7 = vld [vmem:[%s5252_s0 + $0x278] sm:$0xff]  ;;  %v176_v9 = vld [vmem:[%s5251_s1 + $0x80] sm:$0xff]  ;;  %v241_v10 = vld [vmem:[%s5251_s1 + $0x288] sm:$0xff] }
  0x19   :  { %3207 = vmatmul.msk.f32.gmra.mxu1 %vm1079_vm2, %v30_v15  ;;  %v3674_v11 = vld [vmem:[%s5253_s4] ss:$0 sm:$0xff]  ;;  %v110_v41 = vld [vmem:[%s5252_s0 + $0x290] sm:$0xff] }
  0x1a   :  { %3271 = vmatmul.msk.f32.gmra.mxu2 %vm1079_vm2, %v94_v16  ;;  %v44_v13 = vld [vmem:[%s5252_s0 + $0x80] sm:$0xff] }
  0x1b   :  { %3080 = vmatmul.msk.f32.gmra.mxu0 %vm289_vm1, %v163_v17  ;;  %v108_v15 = vld [vmem:[%s5252_s0 + $0x280] sm:$0xff]  ;;  %v177_v17 = vld [vmem:[%s5251_s1 + $0x88] sm:$0xff] }
  0x1d   :  { %3145 = vmatmul.msk.f32.gmra.mxu3 %vm289_vm1, %v228_v18 }
  0x21   :  { %3208 = vmatmul.msk.f32.gmra.mxu1 %vm1079_vm2, %v31_v19 }
  0x22   :  { %3272 = vmatmul.msk.f32.gmra.mxu2 %vm1079_vm2, %v95_v20  ;;  %v3691_v20 = vld [vmem:[%s5254_s5] ss:$0 sm:$0xff] }
  0x23   :  { %3081 = vmatmul.msk.f32.gmra.mxu0 %vm289_vm1, %v164_v21  ;;  %v242_v21 = vld [vmem:[%s5251_s1 + $0x290] sm:$0xff] }
  0x25   :  { %3146 = vmatmul.msk.f32.gmra.mxu3 %vm289_vm1, %v229_v22 }
  0x29   :  { %3209 = vmatmul.msk.f32.gmra.mxu1 %vm1079_vm2, %v32_v23 }
  0x2a   :  { %3273 = vmatmul.msk.f32.gmra.mxu2 %vm1079_vm2, %v96_v24 }
  0x2b   :  { %3082 = vmatmul.msk.f32.gmra.mxu0 %vm289_vm1, %v165_v25 }
  0x2d   :  { %3147 = vmatmul.msk.f32.gmra.mxu3 %vm289_vm1, %v230_v26  ;;  %v45_v26 = vld [vmem:[%s5252_s0 + $0x88] sm:$0xff] }
  0x31   :  { %3210 = vmatmul.msk.f32.gmra.mxu1 %vm1079_vm2, %v33_v27 }
  0x32   :  { %3274 = vmatmul.msk.f32.gmra.mxu2 %vm1079_vm2, %v97_v28  ;;  %v109_v28 = vld [vmem:[%s5252_s0 + $0x288] sm:$0xff] }
  0x33   :  { %3083 = vmatmul.msk.f32.gmra.mxu0 %vm289_vm1, %v166_v29 }
  0x35   :  { %3148 = vmatmul.msk.f32.gmra.mxu3 %vm289_vm1, %v231_v30  ;;  %v178_v30 = vld [vmem:[%s5251_s1 + $0x90] sm:$0xff] }
  0x39   :  { %3211 = vmatmul.msk.f32.gmra.mxu1 %vm1079_vm2, %v34_v31 }
  0x3a   :  { %3275 = vmatmul.msk.f32.gmra.mxu2 %vm1079_vm2, %v98_v32 }
  0x3b   :  { %3084 = vmatmul.msk.f32.gmra.mxu0 %vm289_vm1, %v167_v33  ;;  %v243_v33 = vld [vmem:[%s5251_s1 + $0x298] sm:$0xff] }
  0x3d   :  { %3149 = vmatmul.msk.f32.gmra.mxu3 %vm289_vm1, %v232_v34 }
  0x41   :  { %3212 = vmatmul.msk.f32.gmra.mxu1 %vm1079_vm2, %v35_v36 }
  0x42   :  { %3276 = vmatmul.msk.f32.gmra.mxu2 %vm1079_vm2, %v99_v37 }
  0x43   :  { %3085 = vmatmul.msk.f32.gmra.mxu0 %vm289_vm1, %v168_v38 }
  0x45   :  { %3150 = vmatmul.msk.f32.gmra.mxu3 %vm289_vm1, %v233_v39  ;;  %v46_v39 = vld [vmem:[%s5252_s0 + $0x90] sm:$0xff] }
  0x49   :  { %3213 = vmatmul.msk.f32.gmra.mxu1 %vm1079_vm2, %v36_v42 }
  0x4a   :  { %3277 = vmatmul.msk.f32.gmra.mxu2 %vm1079_vm2, %v100_v43  ;;  %v179_v43 = vld [vmem:[%s5251_s1 + $0x98] sm:$0xff] }
  0x4b   :  { %3086 = vmatmul.msk.f32.gmra.mxu0 %vm289_vm1, %v169_v44 }
  0x4d   :  { %3151 = vmatmul.msk.f32.gmra.mxu3 %vm289_vm1, %v234_v45 }
  0x51   :  { %3214 = vmatmul.msk.f32.gmra.mxu1 %vm1079_vm2, %v37_v46 }
  0x52   :  { %3278 = vmatmul.msk.f32.gmra.mxu2 %vm1079_vm2, %v101_v47 }
  0x53   :  { %3087 = vmatmul.msk.f32.gmra.mxu0 %vm289_vm1, %v170_v48  ;;  %v244_v48 = vld [vmem:[%s5251_s1 + $0x2a0] sm:$0xff] }
  0x55   :  { %3152 = vmatmul.msk.f32.gmra.mxu3 %vm289_vm1, %v235_v49 }
  0x59   :  { %3215 = vmatmul.msk.f32.gmra.mxu1 %vm1079_vm2, %v38_v50 }
  0x5a   :  { %3279 = vmatmul.msk.f32.gmra.mxu2 %vm1079_vm2, %v102_v51 }
  0x5b   :  { %3088 = vmatmul.msk.f32.gmra.mxu0 %vm289_vm1, %v171_v52 }
  0x5d   :  { %3153 = vmatmul.msk.f32.gmra.mxu3 %vm289_vm1, %v236_v53 }
  0x61   :  { %3216 = vmatmul.msk.f32.gmra.mxu1 %vm1079_vm2, %v39_v54 }
  0x62   :  { %3280 = vmatmul.msk.f32.gmra.mxu2 %vm1079_vm2, %v103_v55  ;;  %v47_v55 = vld [vmem:[%s5252_s0 + $0x98] sm:$0xff] }
  0x63   :  { %3089 = vmatmul.msk.f32.gmra.mxu0 %vm289_vm1, %v172_v56 }
  0x65   :  { %3154 = vmatmul.msk.f32.gmra.mxu3 %vm289_vm1, %v237_v57  ;;  %v111_v57 = vld [vmem:[%s5252_s0 + $0x298] sm:$0xff] }
  0x69   :  { %3217 = vmatmul.msk.f32.gmra.mxu1 %vm1079_vm2, %v40_v58 }
  0x6a   :  { %3281 = vmatmul.msk.f32.gmra.mxu2 %vm1079_vm2, %v104_v59 }
  0x6b   :  { %3090 = vmatmul.msk.f32.gmra.mxu0 %vm289_vm1, %v173_v60  ;;  %v180_v60 = vld [vmem:[%s5251_s1 + $0xa0] sm:$0xff] }
  0x6d   :  { %3155 = vmatmul.msk.f32.gmra.mxu3 %vm289_vm1, %v238_v61 }
  0x71   :  { %3218 = vmatmul.msk.f32.gmra.mxu1 %vm1079_vm2, %v41_v62 }
  0x72   :  { %3282 = vmatmul.msk.f32.gmra.mxu2 %vm1079_vm2, %v105_v63  ;;  %v245_v63 = vld [vmem:[%s5251_s1 + $0x2a8] sm:$0xff] }
  0x73   :  { %3091 = vmatmul.msk.f32.gmra.mxu0 %vm289_vm1, %v174_v0 }
  0x75   :  { %3156 = vmatmul.msk.f32.gmra.mxu3 %vm289_vm1, %v239_v1 }
  0x79   :  { %3219 = vmatmul.msk.f32.gmra.mxu1 %vm1079_vm2, %v42_v2 }
  0x7a   :  { %3283 = vmatmul.msk.f32.gmra.mxu2 %vm1079_vm2, %v106_v3 }
  0x7b   :  { %3092 = vmatmul.msk.f32.gmra.mxu0 %vm289_vm1, %v175_v4 }
  0x7d   :  { %3157 = vmatmul.msk.f32.gmra.mxu3 %vm289_vm1, %v240_v5 }
  0x80   :  { %v695_v8 = vpop.f32.mrf.mxu0 }
  0x81   :  { %3220 = vmatmul.msk.f32.gmra.mxu1 %vm1079_vm2, %v43_v6 }
  0x82   :  { %3284 = vmatmul.msk.f32.gmra.mxu2 %vm1079_vm2, %v107_v7  ;;  %v48_v7 = vld [vmem:[%s5252_s0 + $0xa0] sm:$0xff] }
  0x83   :  { %3093 = vmatmul.msk.f32.gmra.mxu0 %vm289_vm1, %v176_v9  ;;  %v112_v9 = vld [vmem:[%s5252_s0 + $0x2a0] sm:$0xff] }
  0x85   :  { %3158 = vmatmul.msk.f32.gmra.mxu3 %vm289_vm1, %v241_v10 }
  0x86   :  { %v1481_v12 = vpop.f32.mrf.mxu1 }
  0x87   :  { %v1482_v14 = vadd.f32 %v1481_v12, %v695_v8 }
  0x88   :  { %v698_v16 = vpop.f32.mrf.mxu0  ;;  %v890_v18 = vpop.f32.mrf.mxu3 }
  0x89   :  { %v1869_v19 = vadd.f32 %v3674_v11, %v1482_v14  ;;  %3221 = vmatmul.msk.f32.gmra.mxu1 %vm1079_vm2, %v44_v13  ;;  %v181_v13 = vld [vmem:[%s5251_s1 + $0xa8] sm:$0xff] }
  0x8a   :  { %3285 = vmatmul.msk.f32.gmra.mxu2 %vm1079_vm2, %v108_v15 }
  0x8b   :  { %3094 = vmatmul.msk.f32.gmra.mxu0 %vm289_vm1, %v177_v17  ;;  %v1997_v22 = vmax.f32 %v1869_v19, 0.0 }
  0x8d   :  { %v3698_v23 = vpop.f32.mrf.mxu2  ;;  %v2129_v24 = vmul.f32 %v3691_v20, %v1997_v22  ;;  %3159 = vmatmul.msk.f32.gmra.mxu3 %vm289_vm1, %v242_v21 }
  0x8e   :  { %v1484_v25 = vpop.f32.mrf.mxu1 }
  0x8f   :  { %v1485_v27 = vadd.f32 %v1484_v25, %v698_v16  ;;  %2257 = vadd.xlane.f32.xlu0 %v2129_v24  ;;  %v246_v16 = vld [vmem:[%s5251_s1 + $0x2b0] sm:$0xff] }
  0x90   :  { %v701_v29 = vpop.f32.mrf.mxu0  ;;  %v893_v31 = vpop.f32.mrf.mxu3 }
  0x91   :  { %v1870_v32 = vadd.f32 %v3674_v11, %v1485_v27  ;;  %3222 = vmatmul.msk.f32.gmra.mxu1 %vm1079_vm2, %v45_v26  ;;  %v49_v26 = vld [vmem:[%s5252_s0 + $0xa8] sm:$0xff] }
  0x92   :  { %3286 = vmatmul.msk.f32.gmra.mxu2 %vm1079_vm2, %v109_v28  ;;  %v113_v27 = vld [vmem:[%s5252_s0 + $0x2a8] sm:$0xff] }
  0x93   :  { %3095 = vmatmul.msk.f32.gmra.mxu0 %vm289_vm1, %v178_v30  ;;  %v1998_v34 = vmax.f32 %v1870_v32, 0.0  ;;  %v182_v30 = vld [vmem:[%s5251_s1 + $0xb0] sm:$0xff] }
  0x95   :  { %v1676_v35 = vpop.f32.mrf.mxu2  ;;  %v2130_v36 = vmul.f32 %v3691_v20, %v1998_v34  ;;  %3160 = vmatmul.msk.f32.gmra.mxu3 %vm289_vm1, %v243_v33  ;;  %v247_v34 = vld [vmem:[%s5251_s1 + $0x2b8] sm:$0xff] }
  0x96   :  { %v1677_v37 = vadd.f32 %v1676_v35, %v890_v18  ;;  %v1487_v38 = vpop.f32.mrf.mxu1 }
  0x97   :  { %v1488_v40 = vadd.f32 %v1487_v38, %v701_v29  ;;  %2259 = vadd.xlane.f32.xlu0 %v2130_v36 }
  0x98   :  { %v704_v42 = vpop.f32.mrf.mxu0  ;;  %v896_v44 = vpop.f32.mrf.mxu3  ;;  %v1934_v45 = vadd.f32 %v3674_v11, %v1677_v37 }
  0x99   :  { %3223 = vmatmul.msk.f32.gmra.mxu1 %vm1079_vm2, %v46_v39  ;;  %v1871_v46 = vadd.f32 %v3674_v11, %v1488_v40  ;;  %v50_v40 = vld [vmem:[%s5252_s0 + $0xb0] sm:$0xff] }
  0x9a   :  { %3287 = vmatmul.msk.f32.gmra.mxu2 %vm1079_vm2, %v110_v41  ;;  %v2062_v47 = vmax.f32 %v1934_v45, 0.0  ;;  %v114_v41 = vld [vmem:[%s5252_s0 + $0x2b0] sm:$0xff]  ;;  %v183_v45 = vld [vmem:[%s5251_s1 + $0xb8] sm:$0xff] }
  0x9b   :  { %3096 = vmatmul.msk.f32.gmra.mxu0 %vm289_vm1, %v179_v43  ;;  %v1999_v49 = vmax.f32 %v1871_v46, 0.0 }
  0x9c   :  { %v2194_v50 = vmul.f32 %v3691_v20, %v2062_v47 }
  0x9d   :  { %v1679_v51 = vpop.f32.mrf.mxu2  ;;  %v2131_v52 = vmul.f32 %v3691_v20, %v1999_v49  ;;  %3161 = vmatmul.msk.f32.gmra.mxu3 %vm289_vm1, %v244_v48  ;;  %v248_v49 = vld [vmem:[%s5251_s1 + $0x2c0] sm:$0xff] }
  0x9e   :  { %v1680_v53 = vadd.f32 %v1679_v51, %v893_v31  ;;  %v1490_v54 = vpop.f32.mrf.mxu1  ;;  %2387 = vadd.xlane.f32.xlu2 %v2194_v50 }
  0x9f   :  { %v1491_v56 = vadd.f32 %v1490_v54, %v704_v42  ;;  %2261 = vadd.xlane.f32.xlu1 %v2131_v52 }
  0xa0   :  { %v1935_v58 = vadd.f32 %v3674_v11, %v1680_v53  ;;  %v707_v59 = vpop.f32.mrf.mxu0  ;;  %v899_v61 = vpop.f32.mrf.mxu3 }
  0xa1   :  { %v1872_v62 = vadd.f32 %v3674_v11, %v1491_v56  ;;  %3224 = vmatmul.msk.f32.gmra.mxu1 %vm1079_vm2, %v47_v55  ;;  %v51_v56 = vld [vmem:[%s5252_s0 + $0xb8] sm:$0xff] }
  0xa2   :  { %3288 = vmatmul.msk.f32.gmra.mxu2 %vm1079_vm2, %v111_v57  ;;  %v2063_v0 = vmax.f32 %v1935_v58, 0.0  ;;  %v115_v57 = vld [vmem:[%s5252_s0 + $0x2b8] sm:$0xff] }
  0xa3   :  { %3097 = vmatmul.msk.f32.gmra.mxu0 %vm289_vm1, %v180_v60  ;;  %v2000_v1 = vmax.f32 %v1872_v62, 0.0 }
  0xa4   :  { %v2195_v2 = vmul.f32 %v3691_v20, %v2063_v0 }
  0xa5   :  { %v1682_v3 = vpop.f32.mrf.mxu2  ;;  %v2132_v4 = vmul.f32 %v3691_v20, %v2000_v1  ;;  %3162 = vmatmul.msk.f32.gmra.mxu3 %vm289_vm1, %v245_v63  ;;  %v249_v1 = vld [vmem:[%s5251_s1 + $0x2c8] sm:$0xff] }
  0xa6   :  { %v1683_v5 = vadd.f32 %v1682_v3, %v896_v44  ;;  %v1493_v6 = vpop.f32.mrf.mxu1  ;;  %2389 = vadd.xlane.f32.xlu0 %v2195_v2 }
  0xa7   :  { %v1494_v8 = vadd.f32 %v1493_v6, %v707_v59  ;;  %2263 = vadd.xlane.f32.xlu1 %v2132_v4 }
  0xa8   :  { %v1936_v10 = vadd.f32 %v3674_v11, %v1683_v5  ;;  %v710_v12 = vpop.f32.mrf.mxu0  ;;  %v902_v14 = vpop.f32.mrf.mxu3 }
  0xa9   :  { %v1873_v15 = vadd.f32 %v3674_v11, %v1494_v8  ;;  %3225 = vmatmul.msk.f32.gmra.mxu1 %vm1079_vm2, %v48_v7  ;;  %v52_v8 = vld [vmem:[%s5252_s0 + $0xc0] sm:$0xff] }
  0xaa   :  { %3289 = vmatmul.msk.f32.gmra.mxu2 %vm1079_vm2, %v112_v9  ;;  %v2064_v17 = vmax.f32 %v1936_v10, 0.0  ;;  %v116_v9 = vld [vmem:[%s5252_s0 + $0x2c0] sm:$0xff] }
  0xab   :  { %3098 = vmatmul.msk.f32.gmra.mxu0 %vm289_vm1, %v181_v13  ;;  %v2001_v18 = vmax.f32 %v1873_v15, 0.0 }
  0xac   :  { %v2196_v19 = vmul.f32 %v3691_v20, %v2064_v17 }
  0xad   :  { %v1685_v21 = vpop.f32.mrf.mxu2  ;;  %v2133_v22 = vmul.f32 %v3691_v20, %v2001_v18  ;;  %3163 = vmatmul.msk.f32.gmra.mxu3 %vm289_vm1, %v246_v16  ;;  %v250_v18 = vld [vmem:[%s5251_s1 + $0x2d0] sm:$0xff] }
  0xae   :  { %v1686_v24 = vadd.f32 %v1685_v21, %v899_v61  ;;  %v1496_v25 = vpop.f32.mrf.mxu1  ;;  %v184_v61 = vld [vmem:[%s5251_s1 + $0xc0] sm:$0xff] }
  0xaf   :  { %2265 = vadd.xlane.f32.xlu2 %v2133_v22  ;;  %2391 = vadd.xlane.f32.xlu1 %v2196_v19  ;;  %v1497_v32 = vadd.f32 %v1496_v25, %v710_v12 }
  0xb0   :  { %v1937_v28 = vadd.f32 %v3674_v11, %v1686_v24  ;;  %v713_v29 = vpop.f32.mrf.mxu0  ;;  %v905_v31 = vpop.f32.mrf.mxu3 }
  0xb1   :  { %3226 = vmatmul.msk.f32.gmra.mxu1 %vm1079_vm2, %v49_v26  ;;  %v1874_v36 = vadd.f32 %v3674_v11, %v1497_v32  ;;  %v186_v32 = vld [vmem:[%s5251_s1 + $0xd0] sm:$0xff] }
  0xb2   :  { %3290 = vmatmul.msk.f32.gmra.mxu2 %vm1079_vm2, %v113_v27  ;;  %v2065_v33 = vmax.f32 %v1937_v28, 0.0  ;;  %v53_v27 = vld [vmem:[%s5252_s0 + $0xc8] sm:$0xff] }
  0xb3   :  { %3099 = vmatmul.msk.f32.gmra.mxu0 %vm289_vm1, %v182_v30  ;;  %v2002_v47 = vmax.f32 %v1874_v36, 0.0  ;;  %v117_v28 = vld [vmem:[%s5252_s0 + $0x2c8] sm:$0xff]  ;;  %v251_v36 = vld [vmem:[%s5251_s1 + $0x2d8] sm:$0xff] }
  0xb4   :  { %v2197_v35 = vmul.f32 %v3691_v20, %v2065_v33 }
  0xb5   :  { %v1688_v37 = vpop.f32.mrf.mxu2  ;;  %3164 = vmatmul.msk.f32.gmra.mxu3 %vm289_vm1, %v247_v34  ;;  %v2134_v53 = vmul.f32 %v3691_v20, %v2002_v47 }
  0xb6   :  { %v1689_v38 = vadd.f32 %v1688_v37, %v902_v14  ;;  %v1499_v39 = vpop.f32.mrf.mxu1  ;;  %v185_v14 = vld [vmem:[%s5251_s1 + $0xc8] sm:$0xff] }
  0xb7   :  { %2393 = vadd.xlane.f32.xlu2 %v2197_v35  ;;  %v1500_v43 = vadd.f32 %v1499_v39, %v713_v29 }
  0xb8   :  { %v1938_v42 = vadd.f32 %v3674_v11, %v1689_v38  ;;  %v716_v44 = vpop.f32.mrf.mxu0  ;;  %v908_v46 = vpop.f32.mrf.mxu3 }
  0xb9   :  { %3227 = vmatmul.msk.f32.gmra.mxu1 %vm1079_vm2, %v50_v40  ;;  %v1875_v50 = vadd.f32 %v3674_v11, %v1500_v43  ;;  %v54_v43 = vld [vmem:[%s5252_s0 + $0xd0] sm:$0xff] }
  0xba   :  { %3291 = vmatmul.msk.f32.gmra.mxu2 %vm1079_vm2, %v114_v41  ;;  %v2066_v48 = vmax.f32 %v1938_v42, 0.0 }
  0xbb   :  { %3100 = vmatmul.msk.f32.gmra.mxu0 %vm289_vm1, %v183_v45  ;;  %v2003_v62 = vmax.f32 %v1875_v50, 0.0 }
  0xbc   :  { %v2198_v51 = vmul.f32 %v3691_v20, %v2066_v48  ;;  %v187_v48 = vld [vmem:[%s5251_s1 + $0xd8] sm:$0xff] }
  0xbd   :  { %v1691_v52 = vpop.f32.mrf.mxu2  ;;  %3165 = vmatmul.msk.f32.gmra.mxu3 %vm289_vm1, %v248_v49  ;;  %v2135_v4 = vmul.f32 %v3691_v20, %v2003_v62 }
  0xbe   :  { %v1692_v54 = vadd.f32 %v1691_v52, %v905_v31  ;;  %2395 = vadd.xlane.f32.xlu0 %v2198_v51  ;;  %v1502_v55 = vpop.f32.mrf.mxu1  ;;  %v252_v52 = vld [vmem:[%s5251_s1 + $0x2e0] sm:$0xff] }
  0xbf   :  { %2267 = vadd.xlane.f32.xlu2 %v2134_v53  ;;  %v1503_v59 = vadd.f32 %v1502_v55, %v716_v44  ;;  %v118_v44 = vld [vmem:[%s5252_s0 + $0x2d0] sm:$0xff] }
  0xc0   :  { %v1939_v58 = vadd.f32 %v3674_v11, %v1692_v54  ;;  %v719_v60 = vpop.f32.mrf.mxu0  ;;  %v911_v63 = vpop.f32.mrf.mxu3 }
  0xc1   :  { %3228 = vmatmul.msk.f32.gmra.mxu1 %vm1079_vm2, %v51_v56  ;;  %v1876_v2 = vadd.f32 %v3674_v11, %v1503_v59  ;;  %v55_v59 = vld [vmem:[%s5252_s0 + $0xd8] sm:$0xff] }
  0xc2   :  { %3292 = vmatmul.msk.f32.gmra.mxu2 %vm1079_vm2, %v115_v57  ;;  %v2067_v0 = vmax.f32 %v1939_v58, 0.0 }
  0xc3   :  { %3101 = vmatmul.msk.f32.gmra.mxu0 %vm289_vm1, %v184_v61  ;;  %v2004_v15 = vmax.f32 %v1876_v2, 0.0 }
  0xc4   :  { %v2199_v3 = vmul.f32 %v3691_v20, %v2067_v0  ;;  %v188_v0 = vld [vmem:[%s5251_s1 + $0xe0] sm:$0xff] }
  0xc5   :  { %v1694_v5 = vpop.f32.mrf.mxu2  ;;  %3166 = vmatmul.msk.f32.gmra.mxu3 %vm289_vm1, %v249_v1  ;;  %v2136_v22 = vmul.f32 %v3691_v20, %v2004_v15 }
  0xc6   :  { %v1695_v6 = vadd.f32 %v1694_v5, %v908_v46  ;;  %2397 = vadd.xlane.f32.xlu1 %v2199_v3  ;;  %2269 = vadd.xlane.f32.xlu0 %v2135_v4  ;;  %v1505_v7 = vpop.f32.mrf.mxu1  ;;  %v253_v4 = vld [vmem:[%s5251_s1 + $0x2e8] sm:$0xff] }
  0xc7   :  { %v1506_v12 = vadd.f32 %v1505_v7, %v719_v60  ;;  %v119_v60 = vld [vmem:[%s5252_s0 + $0x2d8] sm:$0xff] }
  0xc8   :  { %v1940_v10 = vadd.f32 %v3674_v11, %v1695_v6  ;;  %v722_v13 = vpop.f32.mrf.mxu0  ;;  %v914_v16 = vpop.f32.mrf.mxu3 }
  0xc9   :  { %3229 = vmatmul.msk.f32.gmra.mxu1 %vm1079_vm2, %v52_v8  ;;  %v1877_v19 = vadd.f32 %v3674_v11, %v1506_v12  ;;  %v56_v12 = vld [vmem:[%s5252_s0 + $0xe0] sm:$0xff] }
  0xca   :  { %3293 = vmatmul.msk.f32.gmra.mxu2 %vm1079_vm2, %v116_v9  ;;  %v2068_v17 = vmax.f32 %v1940_v10, 0.0 }
  0xcb   :  { %3102 = vmatmul.msk.f32.gmra.mxu0 %vm289_vm1, %v185_v14  ;;  %v2005_v33 = vmax.f32 %v1877_v19, 0.0 }
  0xcc   :  { %v2200_v21 = vmul.f32 %v3691_v20, %v2068_v17  ;;  %v189_v17 = vld [vmem:[%s5251_s1 + $0xe8] sm:$0xff] }
  0xcd   :  { %v1697_v24 = vpop.f32.mrf.mxu2  ;;  %3167 = vmatmul.msk.f32.gmra.mxu3 %vm289_vm1, %v250_v18  ;;  %v2137_v38 = vmul.f32 %v3691_v20, %v2005_v33 }
  0xce   :  { %v1698_v25 = vadd.f32 %v1697_v24, %v911_v63  ;;  %2399 = vadd.xlane.f32.xlu2 %v2200_v21  ;;  %2271 = vadd.xlane.f32.xlu1 %v2136_v22  ;;  %v1508_v26 = vpop.f32.mrf.mxu1  ;;  %v254_v22 = vld [vmem:[%s5251_s1 + $0x2f0] sm:$0xff] }
  0xcf   :  { %v1509_v30 = vadd.f32 %v1508_v26, %v722_v13  ;;  %v120_v13 = vld [vmem:[%s5252_s0 + $0x2e0] sm:$0xff] }
  0xd0   :  { %v1941_v29 = vadd.f32 %v3674_v11, %v1698_v25  ;;  %v725_v31 = vpop.f32.mrf.mxu0  ;;  %v917_v34 = vpop.f32.mrf.mxu3 }
  0xd1   :  { %3230 = vmatmul.msk.f32.gmra.mxu1 %vm1079_vm2, %v53_v27  ;;  %v1878_v37 = vadd.f32 %v3674_v11, %v1509_v30  ;;  %v57_v30 = vld [vmem:[%s5252_s0 + $0xe8] sm:$0xff] }
  0xd2   :  { %3294 = vmatmul.msk.f32.gmra.mxu2 %vm1079_vm2, %v117_v28  ;;  %v2069_v35 = vmax.f32 %v1941_v29, 0.0 }
  0xd3   :  { %3103 = vmatmul.msk.f32.gmra.mxu0 %vm289_vm1, %v186_v32  ;;  %v2006_v49 = vmax.f32 %v1878_v37, 0.0 }
  0xd4   :  { %v2201_v39 = vmul.f32 %v3691_v20, %v2069_v35  ;;  %v190_v35 = vld [vmem:[%s5251_s1 + $0xf0] sm:$0xff] }
  0xd5   :  { %v1700_v40 = vpop.f32.mrf.mxu2  ;;  %3168 = vmatmul.msk.f32.gmra.mxu3 %vm289_vm1, %v251_v36  ;;  %v2138_v55 = vmul.f32 %v3691_v20, %v2006_v49 }
  0xd6   :  { %v1701_v41 = vadd.f32 %v1700_v40, %v914_v16  ;;  %2273 = vadd.xlane.f32.xlu2 %v2137_v38  ;;  %2401 = vadd.xlane.f32.xlu0 %v2201_v39  ;;  %v1511_v42 = vpop.f32.mrf.mxu1  ;;  %v255_v39 = vld [vmem:[%s5251_s1 + $0x2f8] sm:$0xff] }
  0xd7   :  { %v1512_v46 = vadd.f32 %v1511_v42, %v725_v31  ;;  %v121_v31 = vld [vmem:[%s5252_s0 + $0x2e8] sm:$0xff] }
  0xd8   :  { %v1942_v45 = vadd.f32 %v3674_v11, %v1701_v41  ;;  %v728_v47 = vpop.f32.mrf.mxu0  ;;  %v920_v50 = vpop.f32.mrf.mxu3 }
  0xd9   :  { %3231 = vmatmul.msk.f32.gmra.mxu1 %vm1079_vm2, %v54_v43  ;;  %v1879_v53 = vadd.f32 %v3674_v11, %v1512_v46  ;;  %v58_v46 = vld [vmem:[%s5252_s0 + $0xf0] sm:$0xff] }
  0xda   :  { %3295 = vmatmul.msk.f32.gmra.mxu2 %vm1079_vm2, %v118_v44  ;;  %v2070_v51 = vmax.f32 %v1942_v45, 0.0 }
  0xdb   :  { %3104 = vmatmul.msk.f32.gmra.mxu0 %vm289_vm1, %v187_v48  ;;  %v2007_v1 = vmax.f32 %v1879_v53, 0.0  ;;  %v3965_v48 = vpop.permute.xlu0 %2517 }
  0xdc   :  { %v2202_v54 = vmul.f32 %v3691_v20, %v2070_v51 }
  0xdd   :  { %v1703_v56 = vpop.f32.mrf.mxu2  ;;  %3169 = vmatmul.msk.f32.gmra.mxu3 %vm289_vm1, %v252_v52  ;;  %v2139_v7 = vmul.f32 %v3691_v20, %v2007_v1  ;;  %v191_v52 = vld [vmem:[%s5251_s1 + $0xf8] sm:$0xff] }
  0xde   :  { %v1704_v57 = vadd.f32 %v1703_v56, %v917_v34  ;;  %2403 = vadd.xlane.f32.xlu1 %v2202_v54  ;;  %2275 = vadd.xlane.f32.xlu0 %v2138_v55  ;;  %v1514_v58 = vpop.f32.mrf.mxu1  ;;  %v256_v56 = vld [vmem:[%s5251_s1 + $0x300] sm:$0xff] }
  0xdf   :  { %v1515_v62 = vadd.f32 %v1514_v58, %v728_v47  ;;  %v122_v47 = vld [vmem:[%s5252_s0 + $0x2f0] sm:$0xff] }
  0xe0   :  { %v1943_v61 = vadd.f32 %v3674_v11, %v1704_v57  ;;  %v731_v63 = vpop.f32.mrf.mxu0  ;;  %v923_v2 = vpop.f32.mrf.mxu3 }
  0xe1   :  { %3232 = vmatmul.msk.f32.gmra.mxu1 %vm1079_vm2, %v55_v59  ;;  %v1880_v5 = vadd.f32 %v3674_v11, %v1515_v62 }
  0xe2   :  { %3296 = vmatmul.msk.f32.gmra.mxu2 %vm1079_vm2, %v119_v60  ;;  %v2071_v3 = vmax.f32 %v1943_v61, 0.0 }
  0xe3   :  { %3105 = vmatmul.msk.f32.gmra.mxu0 %vm289_vm1, %v188_v0  ;;  %v2008_v18 = vmax.f32 %v1880_v5, 0.0  ;;  %v123_v0 = vld [vmem:[%s5252_s0 + $0x2f8] sm:$0xff] }
  0xe4   :  { %v2203_v6 = vmul.f32 %v3691_v20, %v2071_v3 }
  0xe5   :  { %v1706_v8 = vpop.f32.mrf.mxu2  ;;  %3170 = vmatmul.msk.f32.gmra.mxu3 %vm289_vm1, %v253_v4  ;;  %v2140_v25 = vmul.f32 %v3691_v20, %v2008_v18  ;;  %v192_v4 = vld [vmem:[%s5251_s1 + $0x100] sm:$0xff] }
  0xe6   :  { %v1707_v9 = vadd.f32 %v1706_v8, %v920_v50  ;;  %2405 = vadd.xlane.f32.xlu2 %v2203_v6  ;;  %2277 = vadd.xlane.f32.xlu1 %v2139_v7  ;;  %v1517_v10 = vpop.f32.mrf.mxu1  ;;  %v60_v18 = vld [vmem:[%s5252_s0 + $0x100] sm:$0xff] }
  0xe7   :  { %v1518_v15 = vadd.f32 %v1517_v10, %v731_v63  ;;  %v59_v63 = vld [vmem:[%s5252_s0 + $0xf8] sm:$0xff]  ;;  %v2776_v10 = vlaneseq }
  0xe8   :  { %v1944_v14 = vadd.f32 %v3674_v11, %v1707_v9  ;;  %v734_v16 = vpop.f32.mrf.mxu0  ;;  %v926_v19 = vpop.f32.mrf.mxu3  ;;  %v257_v9 = vld [vmem:[%s5251_s1 + $0x308] sm:$0xff] }
  0xe9   :  { %3233 = vmatmul.msk.f32.gmra.mxu1 %vm1079_vm2, %v56_v12  ;;  %v1881_v24 = vadd.f32 %v3674_v11, %v1518_v15 }
  0xea   :  { %3297 = vmatmul.msk.f32.gmra.mxu2 %vm1079_vm2, %v120_v13  ;;  %v2072_v21 = vmax.f32 %v1944_v14, 0.0 }
  0xeb   :  { %3106 = vmatmul.msk.f32.gmra.mxu0 %vm289_vm1, %v189_v17  ;;  %v2009_v36 = vmax.f32 %v1881_v24, 0.0 }
  0xec   :  { %v2204_v26 = vmul.f32 %v3691_v20, %v2072_v21  ;;  %v124_v21 = vld [vmem:[%s5252_s0 + $0x300] sm:$0xff] }
  0xed   :  { %v1709_v27 = vpop.f32.mrf.mxu2  ;;  %3171 = vmatmul.msk.f32.gmra.mxu3 %vm289_vm1, %v254_v22  ;;  %v2141_v42 = vmul.f32 %v3691_v20, %v2009_v36 }
  0xee   :  { %v1710_v28 = vadd.f32 %v1709_v27, %v923_v2  ;;  %2279 = vadd.xlane.f32.xlu2 %v2140_v25  ;;  %2407 = vadd.xlane.f32.xlu0 %v2204_v26  ;;  %v1520_v29 = vpop.f32.mrf.mxu1  ;;  %v193_v26 = vld [vmem:[%s5251_s1 + $0x108] sm:$0xff] }
  0xef   :  { %v1521_v33 = vadd.f32 %v1520_v29, %v734_v16 }
  0xf0   :  { %v1945_v32 = vadd.f32 %v3674_v11, %v1710_v28  ;;  %v737_v34 = vpop.f32.mrf.mxu0  ;;  %v929_v37 = vpop.f32.mrf.mxu3 }
  0xf1   :  { %3234 = vmatmul.msk.f32.gmra.mxu1 %vm1079_vm2, %v57_v30  ;;  %v1882_v40 = vadd.f32 %v3674_v11, %v1521_v33  ;;  %v258_v33 = vld [vmem:[%s5251_s1 + $0x310] sm:$0xff] }
  0xf2   :  { %3298 = vmatmul.msk.f32.gmra.mxu2 %vm1079_vm2, %v121_v31  ;;  %v2073_v38 = vmax.f32 %v1945_v32, 0.0 }
  0xf3   :  { %3107 = vmatmul.msk.f32.gmra.mxu0 %vm289_vm1, %v190_v35  ;;  %v2010_v53 = vmax.f32 %v1882_v40, 0.0 }
  0xf4   :  { %v2205_v41 = vmul.f32 %v3691_v20, %v2073_v38 }
  0xf5   :  { %v1712_v43 = vpop.f32.mrf.mxu2  ;;  %3172 = vmatmul.msk.f32.gmra.mxu3 %vm289_vm1, %v255_v39  ;;  %v2142_v59 = vmul.f32 %v3691_v20, %v2010_v53 }
  0xf6   :  { %v1713_v44 = vadd.f32 %v1712_v43, %v926_v19  ;;  %2409 = vadd.xlane.f32.xlu1 %v2205_v41  ;;  %2281 = vadd.xlane.f32.xlu0 %v2141_v42  ;;  %v1523_v45 = vpop.f32.mrf.mxu1  ;;  %v4004_v19 = vand.u32 127, %v2776_v10  ;;  %v61_v43 = vld [vmem:[%s5252_s0 + $0x108] sm:$0xff] }
  0xf7   :  { %v1524_v50 = vadd.f32 %v1523_v45, %v737_v34  ;;  %v125_v45 = vld [vmem:[%s5252_s0 + $0x308] sm:$0xff] }
  0xf8   :  { %v1946_v49 = vadd.f32 %v3674_v11, %v1713_v44  ;;  %v740_v51 = vpop.f32.mrf.mxu0  ;;  %v932_v54 = vpop.f32.mrf.mxu3  ;;  %v4016_v30 = vadd.s32 4294967288, %v4004_v19  ;;  %v4043_v53 = vadd.s32 4294967280, %v4004_v19 }
  0xf9   :  { %3235 = vmatmul.msk.f32.gmra.mxu1 %vm1079_vm2, %v58_v46  ;;  %v1883_v57 = vadd.f32 %v3674_v11, %v1524_v50  ;;  %v194_v50 = vld [vmem:[%s5251_s1 + $0x110] sm:$0xff] }
  0xfa   :  { %3299 = vmatmul.msk.f32.gmra.mxu2 %vm1079_vm2, %v122_v47  ;;  %v2074_v55 = vmax.f32 %v1946_v49, 0.0 }
  0xfb   :  { %3108 = vmatmul.msk.f32.gmra.mxu0 %vm289_vm1, %v191_v52  ;;  %v2011_v5 = vmax.f32 %v1883_v57, 0.0 }
  0xfc   :  { %v2206_v58 = vmul.f32 %v3691_v20, %v2074_v55 }
  0xfd   :  { %v1715_v60 = vpop.f32.mrf.mxu2  ;;  %3173 = vmatmul.msk.f32.gmra.mxu3 %vm289_vm1, %v256_v56  ;;  %v2143_v13 = vmul.f32 %v3691_v20, %v2011_v5  ;;  %v259_v56 = vld [vmem:[%s5251_s1 + $0x318] sm:$0xff] }
  0xfe   :  { %v1716_v61 = vadd.f32 %v1715_v60, %v929_v37  ;;  %2411 = vadd.xlane.f32.xlu2 %v2206_v58  ;;  %2283 = vadd.xlane.f32.xlu1 %v2142_v59  ;;  %v1526_v62 = vpop.f32.mrf.mxu1 }
  0xff   :  { %v1527_v2 = vadd.f32 %v1526_v62, %v740_v51 }
 0x100   :  { %v1947_v1 = vadd.f32 %v3674_v11, %v1716_v61  ;;  %v743_v3 = vpop.f32.mrf.mxu0  ;;  %v935_v6 = vpop.f32.mrf.mxu3 }
 0x101   :  { %3236 = vmatmul.msk.f32.gmra.mxu1 %vm1079_vm2, %v59_v63  ;;  %v1884_v12 = vadd.f32 %v3674_v11, %v1527_v2 }
 0x102   :  { %3300 = vmatmul.msk.f32.gmra.mxu2 %vm1079_vm2, %v123_v0  ;;  %v2258_v7 = vpop.xlane.xlu0 %2257  ;;  %v2075_v8 = vmax.f32 %v1947_v1, 0.0  ;;  %v62_v1 = vld [vmem:[%s5252_s0 + $0x110] sm:$0xff] }
 0x103   :  { %3109 = vmatmul.msk.f32.gmra.mxu0 %vm289_vm1, %v192_v4  ;;  %v2012_v27 = vmax.f32 %v1884_v12, 0.0  ;;  %v2520_v29 = vadd.f32 %v3965_v48, %v2258_v7  ;;  %v4071_v12 = vadd.s32 4294967272, %v4004_v19 }
 0x104   :  { %v2207_v14 = vmul.f32 %v3691_v20, %v2075_v8  ;;  %v195_v8 = vld [vmem:[%s5251_s1 + $0x118] sm:$0xff] }
 0x105   :  { %v1718_v15 = vpop.f32.mrf.mxu2  ;;  %3174 = vmatmul.msk.f32.gmra.mxu3 %vm289_vm1, %v257_v9  ;;  %v2144_v37 = vmul.f32 %v3691_v20, %v2012_v27  ;;  %v2778_v38 = vperm.slane %v2520_v29, %v4004_v19  ;;  %v63_v27 = vld [vmem:[%s5252_s0 + $0x118] sm:$0xff] }
 0x106   :  { %v1719_v16 = vadd.f32 %v1718_v15, %v932_v54  ;;  %2285 = vadd.xlane.f32.xlu2 %v2143_v13  ;;  %2413 = vadd.xlane.f32.xlu0 %v2207_v14  ;;  %v1529_v17 = vpop.f32.mrf.mxu1  ;;  %v260_v15 = vld [vmem:[%s5251_s1 + $0x320] sm:$0xff]  ;;  %v127_v29 = vld [vmem:[%s5252_s0 + $0x318] sm:$0xff] }
 0x107   :  { %v1530_v24 = vadd.f32 %v1529_v17, %v743_v3  ;;  %v126_v3 = vld [vmem:[%s5252_s0 + $0x310] sm:$0xff] }
 0x108   :  { %v1948_v22 = vadd.f32 %v3674_v11, %v1719_v16  ;;  %v746_v25 = vpop.f32.mrf.mxu0  ;;  %v938_v28 = vpop.f32.mrf.mxu3 }
 0x109   :  { %3237 = vmatmul.msk.f32.gmra.mxu1 %vm1079_vm2, %v60_v18  ;;  %v1885_v35 = vadd.f32 %v3674_v11, %v1530_v24 }
 0x10a   :  { %3301 = vmatmul.msk.f32.gmra.mxu2 %vm1079_vm2, %v124_v21  ;;  %v2260_v31 = vpop.xlane.xlu0 %2259  ;;  %v2076_v32 = vmax.f32 %v1948_v22, 0.0 }
 0x10b   :  { %v2521_v34 = vadd.f32 %v3965_v48, %v2260_v31  ;;  %3110 = vmatmul.msk.f32.gmra.mxu0 %vm289_vm1, %v193_v26  ;;  %v2013_v51 = vmax.f32 %v1885_v35, 0.0 }
 0x10c   :  { %v2208_v36 = vmul.f32 %v3691_v20, %v2076_v32 }
 0x10d   :  { %v2780_v39 = vperm.slane %v2521_v34, %v4016_v30  ;;  %v1721_v40 = vpop.f32.mrf.mxu2  ;;  %3175 = vmatmul.msk.f32.gmra.mxu3 %vm289_vm1, %v258_v33  ;;  %v2145_v60 = vmul.f32 %v3691_v20, %v2013_v51  ;;  %v196_v34 = vld [vmem:[%s5251_s1 + $0x120] sm:$0xff] }
 0x10e   :  { %v1722_v41 = vadd.f32 %v1721_v40, %v935_v6  ;;  %2415 = vadd.xlane.f32.xlu1 %v2208_v36  ;;  %2287 = vadd.xlane.f32.xlu0 %v2144_v37  ;;  %v1532_v42 = vpop.f32.mrf.mxu1  ;;  %v4097_v37 = vadd.s32 4294967264, %v4004_v19  ;;  %v261_v40 = vld [vmem:[%s5251_s1 + $0x328] sm:$0xff] }
 0x10f   :  { %v2782_v44 = vsel %vm2781_vm3, %v2780_v39, %v2778_v38  ;;  %v1533_v47 = vadd.f32 %v1532_v42, %v746_v25 }
 0x110   :  { %v1949_v46 = vadd.f32 %v3674_v11, %v1722_v41  ;;  %v749_v49 = vpop.f32.mrf.mxu0  ;;  %v941_v52 = vpop.f32.mrf.mxu3 }
 0x111   :  { %3238 = vmatmul.msk.f32.gmra.mxu1 %vm1079_vm2, %v61_v43  ;;  %v1886_v58 = vadd.f32 %v3674_v11, %v1533_v47  ;;  %v4063_v4 = vpop.xlane.xlu2 %2387 }
 0x112   :  { %3302 = vmatmul.msk.f32.gmra.mxu2 %vm1079_vm2, %v125_v45  ;;  %v2262_v54 = vpop.xlane.xlu1 %2261  ;;  %v2077_v55 = vmax.f32 %v1949_v46, 0.0 }
 0x113   :  { %v2522_v57 = vadd.f32 %v3965_v48, %v2262_v54  ;;  %3111 = vmatmul.msk.f32.gmra.mxu0 %vm289_vm1, %v194_v50  ;;  %v2014_v9 = vmax.f32 %v1886_v58, 0.0  ;;  %v64_v50 = vld [vmem:[%s5252_s0 + $0x120] sm:$0xff] }
 0x114   :  { %v2209_v59 = vmul.f32 %v3691_v20, %v2077_v55 }
 0x115   :  { %v2784_v61 = vperm.slane %v2522_v57, %v4043_v53  ;;  %v1724_v62 = vpop.f32.mrf.mxu2  ;;  %3176 = vmatmul.msk.f32.gmra.mxu3 %vm289_vm1, %v259_v56  ;;  %v2146_v18 = vmul.f32 %v3691_v20, %v2014_v9  ;;  %v197_v57 = vld [vmem:[%s5251_s1 + $0x128] sm:$0xff] }
 0x116   :  { %v1725_v63 = vadd.f32 %v1724_v62, %v938_v28  ;;  %2417 = vadd.xlane.f32.xlu2 %v2209_v59  ;;  %2289 = vadd.xlane.f32.xlu1 %v2145_v60  ;;  %v1535_v0 = vpop.f32.mrf.mxu1 }
 0x117   :  { %v2786_v2 = vsel %vm2785_vm4, %v2784_v61, %v2782_v44  ;;  %v1536_v6 = vadd.f32 %v1535_v0, %v749_v49 }
 0x118   :  { %v1950_v5 = vadd.f32 %v3674_v11, %v1725_v63  ;;  %v752_v7 = vpop.f32.mrf.mxu0  ;;  %v944_v10 = vpop.f32.mrf.mxu3  ;;  %v262_v63 = vld [vmem:[%s5251_s1 + $0x330] sm:$0xff] }
 0x119   :  { %3239 = vmatmul.msk.f32.gmra.mxu1 %vm1079_vm2, %v62_v1  ;;  %v1887_v17 = vadd.f32 %v3674_v11, %v1536_v6  ;;  %v4121_v60 = vpop.xlane.xlu0 %2389 }
 0x11a   :  { %3303 = vmatmul.msk.f32.gmra.mxu2 %vm1079_vm2, %v126_v3  ;;  %v2264_v13 = vpop.xlane.xlu1 %2263  ;;  %v2078_v14 = vmax.f32 %v1950_v5, 0.0 }
 0x11b   :  { %v2523_v16 = vadd.f32 %v3965_v48, %v2264_v13  ;;  %3112 = vmatmul.msk.f32.gmra.mxu0 %vm289_vm1, %v195_v8  ;;  %v2015_v35 = vmax.f32 %v1887_v17, 0.0  ;;  %v129_v8 = vld [vmem:[%s5252_s0 + $0x328] sm:$0xff] }
 0x11c   :  { %v2210_v21 = vmul.f32 %v3691_v20, %v2078_v14  ;;  %v198_v14 = vld [vmem:[%s5251_s1 + $0x130] sm:$0xff] }
 0x11d   :  { %v2788_v22 = vperm.slane %v2523_v16, %v4071_v12  ;;  %v1727_v24 = vpop.f32.mrf.mxu2  ;;  %3177 = vmatmul.msk.f32.gmra.mxu3 %vm289_vm1, %v260_v15  ;;  %v2147_v44 = vmul.f32 %v3691_v20, %v2015_v35  ;;  %v66_v35 = vld [vmem:[%s5252_s0 + $0x130] sm:$0xff] }
 0x11e   :  { %v1728_v25 = vadd.f32 %v1727_v24, %v941_v52  ;;  %2291 = vadd.xlane.f32.xlu2 %v2146_v18  ;;  %2419 = vadd.xlane.f32.xlu0 %v2210_v21  ;;  %v1538_v26 = vpop.f32.mrf.mxu1  ;;  %v128_v52 = vld [vmem:[%s5252_s0 + $0x320] sm:$0xff]  ;;  %v4148_v18 = vadd.s32 4294967256, %v4004_v19 }
 0x11f   :  { %v2790_v28 = vsel %vm2789_vm5, %v2788_v22, %v2786_v2  ;;  %v1539_v32 = vadd.f32 %v1538_v26, %v752_v7  ;;  %v65_v7 = vld [vmem:[%s5252_s0 + $0x128] sm:$0xff] }
 0x120   :  { %v1951_v31 = vadd.f32 %v3674_v11, %v1728_v25  ;;  %v755_v33 = vpop.f32.mrf.mxu0  ;;  %v947_v36 = vpop.f32.mrf.mxu3  ;;  %v263_v25 = vld [vmem:[%s5251_s1 + $0x338] sm:$0xff] }
 0x121   :  { %3240 = vmatmul.msk.f32.gmra.mxu1 %vm1079_vm2, %v63_v27  ;;  %v1888_v42 = vadd.f32 %v3674_v11, %v1539_v32 }
 0x122   :  { %3304 = vmatmul.msk.f32.gmra.mxu2 %vm1079_vm2, %v127_v29  ;;  %v2266_v38 = vpop.xlane.xlu2 %2265  ;;  %v2079_v39 = vmax.f32 %v1951_v31, 0.0  ;;  %v4145_v17 = vpop.xlane.xlu1 %2391 }
 0x123   :  { %v2524_v41 = vadd.f32 %v3965_v48, %v2266_v38  ;;  %3113 = vmatmul.msk.f32.gmra.mxu0 %vm289_vm1, %v196_v34  ;;  %v2016_v58 = vmax.f32 %v1888_v42, 0.0  ;;  %v199_v42 = vld [vmem:[%s5251_s1 + $0x138] sm:$0xff] }
 0x124   :  { %v2211_v43 = vmul.f32 %v3691_v20, %v2079_v39 }
 0x125   :  { %v2792_v45 = vperm.slane %v2524_v41, %v4097_v37  ;;  %v1730_v46 = vpop.f32.mrf.mxu2  ;;  %3178 = vmatmul.msk.f32.gmra.mxu3 %vm289_vm1, %v261_v40  ;;  %v2148_v2 = vmul.f32 %v3691_v20, %v2016_v58  ;;  %v4178_v41 = vadd.s32 4294967248, %v4004_v19 }
 0x126   :  { %v1731_v47 = vadd.f32 %v1730_v46, %v944_v10  ;;  %2421 = vadd.xlane.f32.xlu1 %v2211_v43  ;;  %2293 = vadd.xlane.f32.xlu0 %v2147_v44  ;;  %v1541_v49 = vpop.f32.mrf.mxu1 }
 0x127   :  { %v2794_v51 = vsel %vm2793_vm6, %v2792_v45, %v2790_v28  ;;  %v1542_v55 = vadd.f32 %v1541_v49, %v755_v33 }
 0x128   :  { %v1952_v54 = vadd.f32 %v3674_v11, %v1731_v47  ;;  %v758_v56 = vpop.f32.mrf.mxu0  ;;  %v950_v59 = vpop.f32.mrf.mxu3 }
 0x129   :  { %3241 = vmatmul.msk.f32.gmra.mxu1 %vm1079_vm2, %v64_v50  ;;  %v1889_v0 = vadd.f32 %v3674_v11, %v1542_v55  ;;  %v264_v50 = vld [vmem:[%s5251_s1 + $0x340] sm:$0xff] }
 0x12a   :  { %3305 = vmatmul.msk.f32.gmra.mxu2 %vm1079_vm2, %v128_v52  ;;  %v4125_v61 = vpop.xlane.xlu2 %2393  ;;  %v2080_v62 = vmax.f32 %v1952_v54, 0.0  ;;  %v4197_v54 = vld [vmem:[%s5254_s5] ss:$0 sm:$0xff] }
 0x12b   :  { %3114 = vmatmul.msk.f32.gmra.mxu0 %vm289_vm1, %v197_v57  ;;  %v2017_v15 = vmax.f32 %v1889_v0, 0.0  ;;  %v131_v0 = vld [vmem:[%s5252_s0 + $0x338] sm:$0xff] }
 0x12c   :  { %v2212_v1 = vmul.f32 %v3691_v20, %v2080_v62 }
 0x12d   :  { %v1733_v3 = vpop.f32.mrf.mxu2  ;;  %3179 = vmatmul.msk.f32.gmra.mxu3 %vm289_vm1, %v262_v63  ;;  %v2149_v28 = vmul.f32 %v3691_v20, %v2017_v15  ;;  %v67_v63 = vld [vmem:[%s5252_s0 + $0x138] sm:$0xff]  ;;  %v265_v15 = vld [vmem:[%s5251_s1 + $0x348] sm:$0xff] }
 0x12e   :  { %v1734_v5 = vadd.f32 %v1733_v3, %v947_v36  ;;  %2423 = vadd.xlane.f32.xlu2 %v2212_v1  ;;  %2295 = vadd.xlane.f32.xlu1 %v2148_v2  ;;  %v1544_v6 = vpop.f32.mrf.mxu1  ;;  %v130_v36 = vld [vmem:[%s5252_s0 + $0x330] sm:$0xff] }
 0x12f   :  { %v1545_v10 = vadd.f32 %v1544_v6, %v758_v56  ;;  %v200_v6 = vld [vmem:[%s5251_s1 + $0x140] sm:$0xff] }
 0x130   :  { %v1953_v9 = vadd.f32 %v3674_v11, %v1734_v5  ;;  %v761_v13 = vpop.f32.mrf.mxu0  ;;  %v953_v16 = vpop.f32.mrf.mxu3  ;;  %v4211_v5 = vadd.s32 4294967240, %v4004_v19 }
 0x131   :  { %v4150_v21 = vpop.xlane.xlu0 %2395  ;;  %3242 = vmatmul.msk.f32.gmra.mxu1 %vm1079_vm2, %v65_v7  ;;  %v1890_v27 = vadd.f32 %v3674_v11, %v1545_v10 }
 0x132   :  { %3306 = vmatmul.msk.f32.gmra.mxu2 %vm1079_vm2, %v129_v8  ;;  %v2268_v22 = vpop.xlane.xlu2 %2267  ;;  %v2081_v24 = vmax.f32 %v1953_v9, 0.0 }
 0x133   :  { %v2525_v26 = vadd.f32 %v3965_v48, %v2268_v22  ;;  %3115 = vmatmul.msk.f32.gmra.mxu0 %vm289_vm1, %v198_v14  ;;  %v2018_v43 = vmax.f32 %v1890_v27, 0.0 }
 0x134   :  { %v2213_v29 = vmul.f32 %v3691_v20, %v2081_v24  ;;  %v4174_v20 = vld [vmem:[%s5253_s4] ss:$0 sm:$0xff] }
 0x135   :  { %v2796_v31 = vperm.slane %v2525_v26, %v4148_v18  ;;  %v1736_v32 = vpop.f32.mrf.mxu2  ;;  %3180 = vmatmul.msk.f32.gmra.mxu3 %vm289_vm1, %v263_v25  ;;  %v2150_v56 = vmul.f32 %v4197_v54, %v2018_v43 }
 0x136   :  { %v1737_v33 = vadd.f32 %v1736_v32, %v950_v59  ;;  %2297 = vadd.xlane.f32.xlu2 %v2149_v28  ;;  %2425 = vadd.xlane.f32.xlu0 %v2213_v29  ;;  %v1547_v34 = vpop.f32.mrf.mxu1  ;;  %v132_v32 = vld [vmem:[%s5252_s0 + $0x340] sm:$0xff] }
 0x137   :  { %v2798_v11 = vsel %vm2797_vm7, %v2796_v31, %v2794_v51  ;;  %v1548_v39 = vadd.f32 %v1547_v34, %v761_v13  ;;  %v68_v31 = vld [vmem:[%s5252_s0 + $0x140] sm:$0xff] }
 0x138   :  { %v1954_v38 = vadd.f32 %v4174_v20, %v1737_v33  ;;  %v764_v40 = vpop.f32.mrf.mxu0  ;;  %v956_v44 = vpop.f32.mrf.mxu3 }
 0x139   :  { %v4183_v45 = vpop.xlane.xlu1 %2397  ;;  %v2270_v46 = vpop.xlane.xlu0 %2269  ;;  %3243 = vmatmul.msk.f32.gmra.mxu1 %vm1079_vm2, %v66_v35  ;;  %v1891_v51 = vadd.f32 %v4174_v20, %v1548_v39 }
 0x13a   :  { %v2526_v47 = vadd.f32 %v3965_v48, %v2270_v46  ;;  %3307 = vmatmul.msk.f32.gmra.mxu2 %vm1079_vm2, %v130_v36  ;;  %v2082_v49 = vmax.f32 %v1954_v38, 0.0  ;;  %v201_v36 = vld [vmem:[%s5251_s1 + $0x148] sm:$0xff]  ;;  %v266_v46 = vld [vmem:[%s5251_s1 + $0x350] sm:$0xff] }
 0x13b   :  { %3116 = vmatmul.msk.f32.gmra.mxu0 %vm289_vm1, %v199_v42  ;;  %v2019_v7 = vmax.f32 %v1891_v51, 0.0 }
 0x13c   :  { %v2800_v52 = vperm.slane %v2526_v47, %v4178_v41  ;;  %v2214_v55 = vmul.f32 %v4197_v54, %v2082_v49 }
 0x13d   :  { %v1739_v57 = vpop.f32.mrf.mxu2  ;;  %3181 = vmatmul.msk.f32.gmra.mxu3 %vm289_vm1, %v264_v50  ;;  %v2151_v25 = vmul.f32 %v4197_v54, %v2019_v7 }
 0x13e   :  { %v2802_v58 = vsel %vm2801_vm8, %v2800_v52, %v2798_v11  ;;  %v1740_v59 = vadd.f32 %v1739_v57, %v953_v16  ;;  %2427 = vadd.xlane.f32.xlu1 %v2214_v55  ;;  %2299 = vadd.xlane.f32.xlu0 %v2150_v56  ;;  %v1550_v62 = vpop.f32.mrf.mxu1  ;;  %v4239_v11 = vadd.s32 4294967232, %v4004_v19 }
 0x13f   :  { %v1551_v2 = vadd.f32 %v1550_v62, %v764_v40 }
 0x140   :  { %v1955_v1 = vadd.f32 %v4174_v20, %v1740_v59  ;;  %v767_v3 = vpop.f32.mrf.mxu0  ;;  %v959_v8 = vpop.f32.mrf.mxu3  ;;  %v133_v59 = vld [vmem:[%s5252_s0 + $0x348] sm:$0xff] }
 0x141   :  { %v4216_v9 = vpop.xlane.xlu2 %2399  ;;  %v2272_v10 = vpop.xlane.xlu1 %2271  ;;  %3244 = vmatmul.msk.f32.gmra.mxu1 %vm1079_vm2, %v67_v63  ;;  %v1892_v16 = vadd.f32 %v4174_v20, %v1551_v2  ;;  %v202_v2 = vld [vmem:[%s5251_s1 + $0x150] sm:$0xff] }
 0x142   :  { %v2527_v13 = vadd.f32 %v3965_v48, %v2272_v10  ;;  %3308 = vmatmul.msk.f32.gmra.mxu2 %vm1079_vm2, %v131_v0  ;;  %v2083_v14 = vmax.f32 %v1955_v1, 0.0  ;;  %v4267_v1 = vadd.s32 4294967224, %v4004_v19 }
 0x143   :  { %3117 = vmatmul.msk.f32.gmra.mxu0 %vm289_vm1, %v200_v6  ;;  %v2020_v38 = vmax.f32 %v1892_v16, 0.0 }
 0x144   :  { %v2804_v22 = vperm.slane %v2527_v13, %v4211_v5  ;;  %v2215_v24 = vmul.f32 %v4197_v54, %v2083_v14  ;;  %v267_v14 = vld [vmem:[%s5251_s1 + $0x358] sm:$0xff] }
 0x145   :  { %v1742_v26 = vpop.f32.mrf.mxu2  ;;  %3182 = vmatmul.msk.f32.gmra.mxu3 %vm289_vm1, %v265_v15  ;;  %v2152_v50 = vmul.f32 %v4197_v54, %v2020_v38 }
 0x146   :  { %v2806_v27 = vsel %vm2805_vm9, %v2804_v22, %v2802_v58  ;;  %v1743_v28 = vadd.f32 %v1742_v26, %v956_v44  ;;  %2429 = vadd.xlane.f32.xlu2 %v2215_v24  ;;  %2301 = vadd.xlane.f32.xlu1 %v2151_v25  ;;  %v1553_v29 = vpop.f32.mrf.mxu1  ;;  %v69_v58 = vld [vmem:[%s5252_s0 + $0x148] sm:$0xff] }
 0x147   :  { %v1554_v34 = vadd.f32 %v1553_v29, %v767_v3  ;;  %v70_v29 = vld [vmem:[%s5252_s0 + $0x150] sm:$0xff] }
 0x148   :  { %v1956_v33 = vadd.f32 %v4174_v20, %v1743_v28  ;;  %v770_v35 = vpop.f32.mrf.mxu0  ;;  %v962_v39 = vpop.f32.mrf.mxu3 }
 0x149   :  { %v2274_v40 = vpop.xlane.xlu2 %2273  ;;  %v4244_v42 = vpop.xlane.xlu0 %2401  ;;  %3245 = vmatmul.msk.f32.gmra.mxu1 %vm1079_vm2, %v68_v31  ;;  %v1893_v47 = vadd.f32 %v4174_v20, %v1554_v34  ;;  %v134_v31 = vld [vmem:[%s5252_s0 + $0x350] sm:$0xff] }
 0x14a   :  { %v2528_v43 = vadd.f32 %v3965_v48, %v2274_v40  ;;  %3309 = vmatmul.msk.f32.gmra.mxu2 %vm1079_vm2, %v132_v32  ;;  %v2084_v44 = vmax.f32 %v1956_v33, 0.0 }
 0x14b   :  { %3118 = vmatmul.msk.f32.gmra.mxu0 %vm289_vm1, %v201_v36  ;;  %v2021_v3 = vmax.f32 %v1893_v47, 0.0  ;;  %v203_v36 = vld [vmem:[%s5251_s1 + $0x158] sm:$0xff]  ;;  %v268_v47 = vld [vmem:[%s5251_s1 + $0x360] sm:$0xff] }
 0x14c   :  { %v2808_v49 = vperm.slane %v2528_v43, %v4239_v11  ;;  %v2216_v51 = vmul.f32 %v4197_v54, %v2084_v44 }
 0x14d   :  { %v1745_v52 = vpop.f32.mrf.mxu2  ;;  %3183 = vmatmul.msk.f32.gmra.mxu3 %vm289_vm1, %v266_v46  ;;  %v2153_v24 = vmul.f32 %v4197_v54, %v2021_v3  ;;  %v4323_v3 = vadd.s32 4294967208, %v4004_v19 }
 0x14e   :  { %v2810_v55 = vsel %vm2809_vm10, %v2808_v49, %v2806_v27  ;;  %v1746_v56 = vadd.f32 %v1745_v52, %v959_v8  ;;  %2303 = vadd.xlane.f32.xlu2 %v2152_v50  ;;  %2431 = vadd.xlane.f32.xlu0 %v2216_v51  ;;  %v1556_v57 = vpop.f32.mrf.mxu1 }
 0x14f   :  { %v1557_v63 = vadd.f32 %v1556_v57, %v770_v35  ;;  %v4295_v35 = vadd.s32 4294967216, %v4004_v19 }
 0x150   :  { %v1957_v62 = vadd.f32 %v4174_v20, %v1746_v56  ;;  %v773_v0 = vpop.f32.mrf.mxu0  ;;  %v965_v6 = vpop.f32.mrf.mxu3 }
 0x151   :  { %v4272_v7 = vpop.xlane.xlu1 %2403  ;;  %v2276_v8 = vpop.xlane.xlu0 %2275  ;;  %3246 = vmatmul.msk.f32.gmra.mxu1 %vm1079_vm2, %v69_v58  ;;  %v1894_v15 = vadd.f32 %v4174_v20, %v1557_v63 }
 0x152   :  { %v2529_v10 = vadd.f32 %v3965_v48, %v2276_v8  ;;  %3310 = vmatmul.msk.f32.gmra.mxu2 %vm1079_vm2, %v133_v59  ;;  %v2085_v13 = vmax.f32 %v1957_v62, 0.0  ;;  %v71_v59 = vld [vmem:[%s5252_s0 + $0x158] sm:$0xff] }
 0x153   :  { %3119 = vmatmul.msk.f32.gmra.mxu0 %vm289_vm1, %v202_v2  ;;  %v2022_v38 = vmax.f32 %v1894_v15, 0.0  ;;  %v135_v62 = vld [vmem:[%s5252_s0 + $0x358] sm:$0xff] }
 0x154   :  { %v2812_v16 = vperm.slane %v2529_v10, %v4267_v1  ;;  %v2217_v22 = vmul.f32 %v4197_v54, %v2085_v13 }
 0x155   :  { %v1748_v25 = vpop.f32.mrf.mxu2  ;;  %3184 = vmatmul.msk.f32.gmra.mxu3 %vm289_vm1, %v267_v14  ;;  %v2154_v52 = vmul.f32 %v4197_v54, %v2022_v38 }
 0x156   :  { %v2814_v26 = vsel %vm2813_vm11, %v2812_v16, %v2810_v55  ;;  %v1749_v27 = vadd.f32 %v1748_v25, %v962_v39  ;;  %2433 = vadd.xlane.f32.xlu1 %v2217_v22  ;;  %2305 = vadd.xlane.f32.xlu0 %v2153_v24  ;;  %v1559_v28 = vpop.f32.mrf.mxu1  ;;  %v269_v22 = vld [vmem:[%s5251_s1 + $0x368] sm:$0xff] }
 0x157   :  { %v1560_v33 = vadd.f32 %v1559_v28, %v773_v0 }
 0x158   :  { %v1958_v32 = vadd.f32 %v4174_v20, %v1749_v27  ;;  %v776_v34 = vpop.f32.mrf.mxu0  ;;  %v968_v39 = vpop.f32.mrf.mxu3 }
 0x159   :  { %v4300_v40 = vpop.xlane.xlu2 %2405  ;;  %v2278_v43 = vpop.xlane.xlu1 %2277  ;;  %3247 = vmatmul.msk.f32.gmra.mxu1 %vm1079_vm2, %v70_v29  ;;  %v1895_v49 = vadd.f32 %v4174_v20, %v1560_v33  ;;  %v72_v33 = vld [vmem:[%s5252_s0 + $0x160] sm:$0xff] }
 0x15a   :  { %v2530_v44 = vadd.f32 %v3965_v48, %v2278_v43  ;;  %3311 = vmatmul.msk.f32.gmra.mxu2 %vm1079_vm2, %v134_v31  ;;  %v2086_v46 = vmax.f32 %v1958_v32, 0.0 }
 0x15b   :  { %3120 = vmatmul.msk.f32.gmra.mxu0 %vm289_vm1, %v203_v36  ;;  %v2023_v8 = vmax.f32 %v1895_v49, 0.0 }
 0x15c   :  { %v2816_v50 = vperm.slane %v2530_v44, %v4295_v35  ;;  %v2218_v51 = vmul.f32 %v4197_v54, %v2086_v46  ;;  %v4351_v44 = vadd.s32 4294967200, %v4004_v19 }
 0x15d   :  { %v1751_v55 = vpop.f32.mrf.mxu2  ;;  %3185 = vmatmul.msk.f32.gmra.mxu3 %vm289_vm1, %v268_v47 }
 0x15e   :  { %v2818_v56 = vsel %vm2817_vm12, %v2816_v50, %v2814_v26  ;;  %v1752_v57 = vadd.f32 %v1751_v55, %v965_v6  ;;  %2435 = vadd.xlane.f32.xlu2 %v2218_v51  ;;  %2307 = vadd.xlane.f32.xlu1 %v2154_v52  ;;  %v1562_v58 = vpop.f32.mrf.mxu1  ;;  %v204_v6 = vld [vmem:[%s5251_s1 + $0x160] sm:$0xff]  ;;  %v2155_v26 = vmul.f32 %v4197_v54, %v2023_v8  ;;  %v270_v55 = vld [vmem:[%s5251_s1 + $0x370] sm:$0xff]  ;;  %v137_v8 = vld [vmem:[%s5252_s0 + $0x368] sm:$0xff] }
 0x15f   :  { %v1563_v0 = vadd.f32 %v1562_v58, %v776_v34  ;;  %v136_v34 = vld [vmem:[%s5252_s0 + $0x360] sm:$0xff] }
 0x160   :  { %v1959_v63 = vadd.f32 %v4174_v20, %v1752_v57  ;;  %v779_v2 = vpop.f32.mrf.mxu0  ;;  %v971_v10 = vpop.f32.mrf.mxu3 }
 0x161   :  { %v2280_v13 = vpop.xlane.xlu2 %2279  ;;  %v4328_v14 = vpop.xlane.xlu0 %2407  ;;  %3248 = vmatmul.msk.f32.gmra.mxu1 %vm1079_vm2, %v71_v59  ;;  %v1896_v24 = vadd.f32 %v4174_v20, %v1563_v0 }
 0x162   :  { %v2531_v15 = vadd.f32 %v3965_v48, %v2280_v13  ;;  %3312 = vmatmul.msk.f32.gmra.mxu2 %vm1079_vm2, %v135_v62  ;;  %v2087_v16 = vmax.f32 %v1959_v63, 0.0 }
 0x163   :  { %3121 = vmatmul.msk.f32.gmra.mxu0 %vm289_vm1, %v204_v6  ;;  %v2024_v46 = vmax.f32 %v1896_v24, 0.0  ;;  %v73_v6 = vld [vmem:[%s5252_s0 + $0x168] sm:$0xff] }
 0x164   :  { %v2820_v25 = vperm.slane %v2531_v15, %v4323_v3  ;;  %v2219_v27 = vmul.f32 %v4197_v54, %v2087_v16 }
 0x165   :  { %v1754_v28 = vpop.f32.mrf.mxu2  ;;  %3186 = vmatmul.msk.f32.gmra.mxu3 %vm289_vm1, %v269_v22  ;;  %v2156_v59 = vmul.f32 %v4197_v54, %v2024_v46  ;;  %v4379_v22 = vadd.s32 4294967192, %v4004_v19 }
 0x166   :  { %v2822_v29 = vsel %vm2821_vm13, %v2820_v25, %v2818_v56  ;;  %v1755_v31 = vadd.f32 %v1754_v28, %v968_v39  ;;  %2309 = vadd.xlane.f32.xlu2 %v2155_v26  ;;  %2437 = vadd.xlane.f32.xlu0 %v2219_v27  ;;  %v1565_v32 = vpop.f32.mrf.mxu1  ;;  %v205_v39 = vld [vmem:[%s5251_s1 + $0x168] sm:$0xff] }
 0x167   :  { %v1566_v38 = vadd.f32 %v1565_v32, %v779_v2 }
 0x168   :  { %v1960_v36 = vadd.f32 %v4174_v20, %v1755_v31  ;;  %v782_v43 = vpop.f32.mrf.mxu0  ;;  %v974_v47 = vpop.f32.mrf.mxu3  ;;  %v271_v31 = vld [vmem:[%s5251_s1 + $0x378] sm:$0xff] }
 0x169   :  { %v4356_v49 = vpop.xlane.xlu1 %2409  ;;  %v2282_v50 = vpop.xlane.xlu0 %2281  ;;  %3249 = vmatmul.msk.f32.gmra.mxu1 %vm1079_vm2, %v72_v33  ;;  %v1897_v56 = vadd.f32 %v4174_v20, %v1566_v38 }
 0x16a   :  { %v2532_v51 = vadd.f32 %v3965_v48, %v2282_v50  ;;  %3313 = vmatmul.msk.f32.gmra.mxu2 %vm1079_vm2, %v136_v34  ;;  %v2088_v52 = vmax.f32 %v1960_v36, 0.0  ;;  %v74_v50 = vld [vmem:[%s5252_s0 + $0x170] sm:$0xff] }
 0x16b   :  { %3122 = vmatmul.msk.f32.gmra.mxu0 %vm289_vm1, %v205_v39  ;;  %v2025_v24 = vmax.f32 %v1897_v56, 0.0 }
 0x16c   :  { %v2824_v57 = vperm.slane %v2532_v51, %v4351_v44  ;;  %v2220_v58 = vmul.f32 %v4197_v54, %v2088_v52  ;;  %v138_v51 = vld [vmem:[%s5252_s0 + $0x370] sm:$0xff] }
 0x16d   :  { %v1757_v62 = vpop.f32.mrf.mxu2  ;;  %3187 = vmatmul.msk.f32.gmra.mxu3 %vm289_vm1, %v270_v55  ;;  %v2157_v36 = vmul.f32 %v4197_v54, %v2025_v24 }
 0x16e   :  { %v2826_v63 = vsel %vm5259_vm14, %v2824_v57, %v2822_v29  ;;  %v1758_v0 = vadd.f32 %v1757_v62, %v971_v10  ;;  %2439 = vadd.xlane.f32.xlu1 %v2220_v58  ;;  %2311 = vadd.xlane.f32.xlu0 %v2156_v59  ;;  %v1568_v2 = vpop.f32.mrf.mxu1  ;;  %v206_v10 = vld [vmem:[%s5251_s1 + $0x170] sm:$0xff]  ;;  %v4407_v57 = vadd.s32 4294967184, %v4004_v19 }
 0x16f   :  { %v1569_v15 = vadd.f32 %v1568_v2, %v782_v43 }
 0x170   :  { %v1961_v13 = vadd.f32 %v4174_v20, %v1758_v0  ;;  %v785_v16 = vpop.f32.mrf.mxu0  ;;  %v977_v25 = vpop.f32.mrf.mxu3 }
 0x171   :  { %v4384_v26 = vpop.xlane.xlu2 %2411  ;;  %v2284_v27 = vpop.xlane.xlu1 %2283  ;;  %3250 = vmatmul.msk.f32.gmra.mxu1 %vm1079_vm2, %v73_v6  ;;  %v1898_v32 = vadd.f32 %v4174_v20, %v1569_v15  ;;  %v272_v6 = vld [vmem:[%s5251_s1 + $0x380] sm:$0xff] }
 0x172   :  { %v2533_v28 = vadd.f32 %v3965_v48, %v2284_v27  ;;  %3314 = vmatmul.msk.f32.gmra.mxu2 %vm1079_vm2, %v137_v8  ;;  %v2089_v29 = vmax.f32 %v1961_v13, 0.0 }
 0x173   :  { %3123 = vmatmul.msk.f32.gmra.mxu0 %vm289_vm1, %v206_v10  ;;  %v2026_v58 = vmax.f32 %v1898_v32, 0.0 }
 0x174   :  { %v2828_v33 = vperm.slane %v2533_v28, %v4379_v22  ;;  %v2221_v34 = vmul.f32 %v4197_v54, %v2089_v29  ;;  %v75_v29 = vld [vmem:[%s5252_s0 + $0x178] sm:$0xff] }
 0x175   :  { %v1760_v38 = vpop.f32.mrf.mxu2  ;;  %3188 = vmatmul.msk.f32.gmra.mxu3 %vm289_vm1, %v271_v31  ;;  %v2158_v15 = vmul.f32 %v4197_v54, %v2026_v58  ;;  %v139_v31 = vld [vmem:[%s5252_s0 + $0x378] sm:$0xff] }
 0x176   :  { %v2830_v43 = vsel %vm5258_vm15, %v2828_v33, %v2826_v63  ;;  %v1761_v39 = vadd.f32 %v1760_v38, %v974_v47  ;;  %2441 = vadd.xlane.f32.xlu2 %v2221_v34  ;;  %2313 = vadd.xlane.f32.xlu1 %v2157_v36  ;;  %v1571_v46 = vpop.f32.mrf.mxu1  ;;  %v207_v47 = vld [vmem:[%s5251_s1 + $0x178] sm:$0xff]  ;;  %v4435_v36 = vadd.s32 4294967176, %v4004_v19 }
 0x177   :  { %v1572_v55 = vadd.f32 %v1571_v46, %v785_v16 }
 0x178   :  { %v1962_v52 = vadd.f32 %v4174_v20, %v1761_v39  ;;  %v788_v56 = vpop.f32.mrf.mxu0  ;;  %v980_v59 = vpop.f32.mrf.mxu3 }
 0x179   :  { %v2286_v62 = vpop.xlane.xlu2 %2285  ;;  %v4412_v63 = vpop.xlane.xlu0 %2413  ;;  %3251 = vmatmul.msk.f32.gmra.mxu1 %vm1079_vm2, %v74_v50  ;;  %v1899_v8 = vadd.f32 %v4174_v20, %v1572_v55 }
 0x17a   :  { %v2534_v0 = vadd.f32 %v3965_v48, %v2286_v62  ;;  %3315 = vmatmul.msk.f32.gmra.mxu2 %vm1079_vm2, %v138_v51  ;;  %v2090_v2 = vmax.f32 %v1962_v52, 0.0  ;;  %v273_v52 = vld [vmem:[%s5251_s1 + $0x388] sm:$0xff] }
 0x17b   :  { %3124 = vmatmul.msk.f32.gmra.mxu0 %vm289_vm1, %v207_v47  ;;  %v2027_v38 = vmax.f32 %v1899_v8, 0.0  ;;  %v76_v8 = vld [vmem:[%s5252_s0 + $0x180] sm:$0xff] }
 0x17c   :  { %v2832_v13 = vperm.slane %v2534_v0, %v4407_v57  ;;  %v2222_v16 = vmul.f32 %v4197_v54, %v2090_v2 }
 0x17d   :  { %v1763_v10 = vpop.f32.mrf.mxu2  ;;  %3189 = vmatmul.msk.f32.gmra.mxu3 %vm289_vm1, %v272_v6  ;;  %v2159_v58 = vmul.f32 %v4197_v54, %v2027_v38 }
 0x17e   :  { %v2834_v24 = vsel %vm5257_vm0, %v2832_v13, %v2830_v43  ;;  %v1764_v27 = vadd.f32 %v1763_v10, %v977_v25  ;;  %2315 = vadd.xlane.f32.xlu2 %v2158_v15  ;;  %2443 = vadd.xlane.f32.xlu0 %v2222_v16  ;;  %v1574_v28 = vpop.f32.mrf.mxu1  ;;  %v208_v25 = vld [vmem:[%s5251_s1 + $0x180] sm:$0xff]  ;;  %vm2837_vm0 = vcmask 1048512  }
 0x17f   :  { %v1575_v33 = vadd.f32 %v1574_v28, %v788_v56  ;;  %v140_v15 = vld [vmem:[%s5252_s0 + $0x380] sm:$0xff] }
 0x180   :  { %v1963_v32 = vadd.f32 %v4174_v20, %v1764_v27  ;;  %v791_v34 = vpop.f32.mrf.mxu0  ;;  %v983_v43 = vpop.f32.mrf.mxu3 }
 0x181   :  { %v2288_v39 = vpop.xlane.xlu0 %2287  ;;  %3252 = vmatmul.msk.f32.gmra.mxu1 %vm1079_vm2, %v75_v29  ;;  %v4441_v46 = vpop.xlane.xlu1 %2415  ;;  %v1900_v55 = vadd.f32 %v4174_v20, %v1575_v33 }
 0x182   :  { %v2535_v50 = vadd.f32 %v3965_v48, %v2288_v39  ;;  %3316 = vmatmul.msk.f32.gmra.mxu2 %vm1079_vm2, %v139_v31  ;;  %v2091_v51 = vmax.f32 %v1963_v32, 0.0  ;;  %v274_v31 = vld [vmem:[%s5251_s1 + $0x390] sm:$0xff] }
 0x183   :  { %3125 = vmatmul.msk.f32.gmra.mxu0 %vm289_vm1, %v208_v25 }
 0x184   :  { %v2836_v56 = vperm.slane %v2535_v50, %v4435_v36  ;;  %v2223_v47 = vmul.f32 %v4197_v54, %v2091_v51 }
 0x185   :  { %v1766_v62 = vpop.f32.mrf.mxu2  ;;  %3190 = vmatmul.msk.f32.gmra.mxu3 %vm289_vm1, %v273_v52  ;;  %v77_v52 = vld [vmem:[%s5252_s0 + $0x188] sm:$0xff] }
 0x186   :  { %v4455_v0 = vsel %vm2837_vm0, %v2836_v56, %v2834_v24  ;;  %v1767_v2 = vadd.f32 %v1766_v62, %v980_v59  ;;  %2445 = vadd.xlane.f32.xlu1 %v2223_v47  ;;  %2317 = vadd.xlane.f32.xlu0 %v2159_v58  ;;  %v1577_v6 = vpop.f32.mrf.mxu1  ;;  %v209_v24 = vld [vmem:[%s5251_s1 + $0x188] sm:$0xff]  ;;  %v2028_v59 = vmax.f32 %v1900_v55, 0.0 }
 0x187   :  { %v1578_v13 = vadd.f32 %v1577_v6, %v791_v34  ;;  %v141_v56 = vld [vmem:[%s5252_s0 + $0x388] sm:$0xff] }
 0x188   :  { %v1964_v16 = vadd.f32 %v4174_v20, %v1767_v2  ;;  %v794_v10 = vpop.f32.mrf.mxu0  ;;  %v986_v27 = vpop.f32.mrf.mxu3  ;;  %v2160_v25 = vmul.f32 %v4197_v54, %v2028_v59 }
 0x189   :  { %v2418_v28 = vpop.xlane.xlu2 %2417  ;;  %3253 = vmatmul.msk.f32.gmra.mxu1 %vm1079_vm2, %v76_v8  ;;  %v1901_v32 = vadd.f32 %v4174_v20, %v1578_v13  ;;  %v2290_v33 = vpop.xlane.xlu1 %2289 }
 0x18a   :  { %3317 = vmatmul.msk.f32.gmra.mxu2 %vm1079_vm2, %v140_v15  ;;  %v2092_v29 = vmax.f32 %v1964_v16, 0.0  ;;  %v2600_v39 = vadd.f32 %v3965_v48, %v2418_v28  ;;  %v2536_v55 = vadd.f32 %v3965_v48, %v2290_v33 }
 0x18b   :  { %3126 = vmatmul.msk.f32.gmra.mxu0 %vm289_vm1, %v209_v24  ;;  %v2029_v47 = vmax.f32 %v1901_v32, 0.0 }
 0x18c   :  { %v2224_v34 = vmul.f32 %v4197_v54, %v2092_v29  ;;  %v2963_v15 = vperm.slane %v2600_v39, %v4004_v19  ;;  %v2839_v28 = vperm.slane %v2536_v55, %v4004_v19 }
 0x18d   :  { %v1769_v38 = vpop.f32.mrf.mxu2  ;;  %3191 = vmatmul.msk.f32.gmra.mxu3 %vm289_vm1, %v274_v31  ;;  %v2161_v29 = vmul.f32 %v4197_v54, %v2029_v47 }
 0x18e   :  { %v1770_v50 = vadd.f32 %v1769_v38, %v983_v43  ;;  %2447 = vadd.xlane.f32.xlu2 %v2224_v34  ;;  %2319 = vadd.xlane.f32.xlu1 %v2160_v25  ;;  %v1580_v51 = vpop.f32.mrf.mxu1  ;;  %v210_v43 = vld [vmem:[%s5251_s1 + $0x190] sm:$0xff] }
 0x18f   :  { %v1581_v62 = vadd.f32 %v1580_v51, %v794_v10  ;;  %v275_v10 = vld [vmem:[%s5251_s1 + $0x398] sm:$0xff] }
 0x190   :  { %v1965_v58 = vadd.f32 %v4174_v20, %v1770_v50  ;;  %v797_v2 = vpop.f32.mrf.mxu0  ;;  %v989_v6 = vpop.f32.mrf.mxu3 }
 0x191   :  { %v2292_v8 = vpop.xlane.xlu2 %2291  ;;  %v2420_v13 = vpop.xlane.xlu0 %2419  ;;  %3254 = vmatmul.msk.f32.gmra.mxu1 %vm1079_vm2, %v77_v52  ;;  %v1902_v31 = vadd.f32 %v4174_v20, %v1581_v62  ;;  %v78_v52 = vld [vmem:[%s5252_s0 + $0x190] sm:$0xff]  ;;  %v211_v62 = vld [vmem:[%s5251_s1 + $0x198] sm:$0xff] }
 0x192   :  { %v2537_v16 = vadd.f32 %v3965_v48, %v2292_v8  ;;  %v2601_v24 = vadd.f32 %v3965_v48, %v2420_v13  ;;  %3318 = vmatmul.msk.f32.gmra.mxu2 %vm1079_vm2, %v141_v56  ;;  %v2093_v59 = vmax.f32 %v1965_v58, 0.0  ;;  %v142_v56 = vld [vmem:[%s5252_s0 + $0x390] sm:$0xff] }
 0x193   :  { %3127 = vmatmul.msk.f32.gmra.mxu0 %vm289_vm1, %v210_v43 }
 0x194   :  { %v2840_v32 = vperm.slane %v2537_v16, %v4016_v30  ;;  %v2964_v33 = vperm.slane %v2601_v24, %v4016_v30  ;;  %v2225_v34 = vmul.f32 %v4197_v54, %v2093_v59  ;;  %v276_v24 = vld [vmem:[%s5251_s1 + $0x3a0] sm:$0xff] }
 0x195   :  { %v1772_v25 = vpop.f32.mrf.mxu2  ;;  %3192 = vmatmul.msk.f32.gmra.mxu3 %vm289_vm1, %v275_v10 }
 0x196   :  { %v2841_v38 = vsel %vm2781_vm3, %v2840_v32, %v2839_v28  ;;  %v2965_v39 = vsel %vm2781_vm3, %v2964_v33, %v2963_v15  ;;  %v1773_v50 = vadd.f32 %v1772_v25, %v986_v27  ;;  %2321 = vadd.xlane.f32.xlu2 %v2161_v29  ;;  %2449 = vadd.xlane.f32.xlu0 %v2225_v34  ;;  %v1583_v51 = vpop.f32.mrf.mxu1  ;;  %v2030_v27 = vmax.f32 %v1902_v31, 0.0 }
 0x197   :  { %v1584_v55 = vadd.f32 %v1583_v51, %v797_v2  ;;  %v79_v51 = vld [vmem:[%s5252_s0 + $0x198] sm:$0xff] }
 0x198   :  { %v1966_v47 = vadd.f32 %v4174_v20, %v1773_v50  ;;  %v800_v58 = vpop.f32.mrf.mxu0  ;;  %v992_v43 = vpop.f32.mrf.mxu3  ;;  %v2162_v31 = vmul.f32 %v4197_v54, %v2030_v27 }
 0x199   :  { %v2422_v8 = vpop.xlane.xlu1 %2421  ;;  %v2294_v13 = vpop.xlane.xlu0 %2293  ;;  %3255 = vmatmul.msk.f32.gmra.mxu1 %vm1079_vm2, %v78_v52  ;;  %v1903_v59 = vadd.f32 %v4174_v20, %v1584_v55  ;;  %v143_v52 = vld [vmem:[%s5252_s0 + $0x398] sm:$0xff] }
 0x19a   :  { %v2602_v15 = vadd.f32 %v3965_v48, %v2422_v8  ;;  %v2538_v2 = vadd.f32 %v3965_v48, %v2294_v13  ;;  %3319 = vmatmul.msk.f32.gmra.mxu2 %vm1079_vm2, %v142_v56  ;;  %v2094_v16 = vmax.f32 %v1966_v47, 0.0 }
 0x19b   :  { %3128 = vmatmul.msk.f32.gmra.mxu0 %vm289_vm1, %v211_v62  ;;  %v2031_v55 = vmax.f32 %v1903_v59, 0.0 }
 0x19c   :  { %v2966_v10 = vperm.slane %v2602_v15, %v4043_v53  ;;  %v2842_v28 = vperm.slane %v2538_v2, %v4043_v53  ;;  %v2226_v29 = vmul.f32 %v4197_v54, %v2094_v16 }
 0x19d   :  { %v1775_v32 = vpop.f32.mrf.mxu2  ;;  %3193 = vmatmul.msk.f32.gmra.mxu3 %vm289_vm1, %v276_v24  ;;  %v2163_v2 = vmul.f32 %v4197_v54, %v2031_v55 }
 0x19e   :  { %v2967_v33 = vsel %vm2785_vm4, %v2966_v10, %v2965_v39  ;;  %v2843_v34 = vsel %vm2785_vm4, %v2842_v28, %v2841_v38  ;;  %v1776_v25 = vadd.f32 %v1775_v32, %v989_v6  ;;  %2451 = vadd.xlane.f32.xlu1 %v2226_v29  ;;  %2323 = vadd.xlane.f32.xlu0 %v2162_v31  ;;  %v1586_v50 = vpop.f32.mrf.mxu1  ;;  %v212_v6 = vld [vmem:[%s5251_s1 + $0x1a0] sm:$0xff] }
 0x19f   :  { %v1587_v47 = vadd.f32 %v1586_v50, %v800_v58  ;;  %v277_v58 = vld [vmem:[%s5251_s1 + $0x3a8] sm:$0xff]  ;;  %v80_v50 = vld [vmem:[%s5252_s0 + $0x1a0] sm:$0xff] }
 0x1a0   :  { %v1967_v56 = vadd.f32 %v4174_v20, %v1776_v25  ;;  %v803_v62 = vpop.f32.mrf.mxu0  ;;  %v995_v38 = vpop.f32.mrf.mxu3 }
 0x1a1   :  { %v2424_v39 = vpop.xlane.xlu2 %2423  ;;  %v2296_v27 = vpop.xlane.xlu1 %2295  ;;  %3256 = vmatmul.msk.f32.gmra.mxu1 %vm1079_vm2, %v79_v51  ;;  %v1904_v16 = vadd.f32 %v4174_v20, %v1587_v47 }
 0x1a2   :  { %v2603_v8 = vadd.f32 %v3965_v48, %v2424_v39  ;;  %v2539_v13 = vadd.f32 %v3965_v48, %v2296_v27  ;;  %3320 = vmatmul.msk.f32.gmra.mxu2 %vm1079_vm2, %v143_v52  ;;  %v2095_v15 = vmax.f32 %v1967_v56, 0.0  ;;  %v144_v52 = vld [vmem:[%s5252_s0 + $0x3a0] sm:$0xff] }
 0x1a3   :  { %3129 = vmatmul.msk.f32.gmra.mxu0 %vm289_vm1, %v212_v6 }
 0x1a4   :  { %v2968_v24 = vperm.slane %v2603_v8, %v4071_v12  ;;  %v2844_v59 = vperm.slane %v2539_v13, %v4071_v12  ;;  %v2227_v10 = vmul.f32 %v4197_v54, %v2095_v15  ;;  %v278_v8 = vld [vmem:[%s5251_s1 + $0x3b0] sm:$0xff] }
 0x1a5   :  { %v1778_v28 = vpop.f32.mrf.mxu2  ;;  %3194 = vmatmul.msk.f32.gmra.mxu3 %vm289_vm1, %v277_v58 }
 0x1a6   :  { %v2969_v29 = vsel %vm2789_vm5, %v2968_v24, %v2967_v33  ;;  %v2845_v31 = vsel %vm2789_vm5, %v2844_v59, %v2843_v34  ;;  %v1779_v32 = vadd.f32 %v1778_v28, %v992_v43  ;;  %2453 = vadd.xlane.f32.xlu2 %v2227_v10  ;;  %2325 = vadd.xlane.f32.xlu1 %v2163_v2  ;;  %v1589_v25 = vpop.f32.mrf.mxu1  ;;  %v213_v33 = vld [vmem:[%s5251_s1 + $0x1a8] sm:$0xff]  ;;  %v2032_v43 = vmax.f32 %v1904_v16, 0.0 }
 0x1a7   :  { %v1590_v51 = vadd.f32 %v1589_v25, %v803_v62  ;;  %v81_v25 = vld [vmem:[%s5252_s0 + $0x1a8] sm:$0xff] }
 0x1a8   :  { %v1968_v55 = vadd.f32 %v4174_v20, %v1779_v32  ;;  %v806_v56 = vpop.f32.mrf.mxu0  ;;  %v998_v34 = vpop.f32.mrf.mxu3  ;;  %v2164_v2 = vmul.f32 %v4197_v54, %v2032_v43 }
 0x1a9   :  { %v2298_v47 = vpop.xlane.xlu2 %2297  ;;  %v2426_v6 = vpop.xlane.xlu0 %2425  ;;  %3257 = vmatmul.msk.f32.gmra.mxu1 %vm1079_vm2, %v80_v50  ;;  %v1905_v13 = vadd.f32 %v4174_v20, %v1590_v51  ;;  %v145_v50 = vld [vmem:[%s5252_s0 + $0x3a8] sm:$0xff] }
 0x1aa   :  { %v2540_v39 = vadd.f32 %v3965_v48, %v2298_v47  ;;  %v2604_v62 = vadd.f32 %v3965_v48, %v2426_v6  ;;  %3321 = vmatmul.msk.f32.gmra.mxu2 %vm1079_vm2, %v144_v52  ;;  %v2096_v27 = vmax.f32 %v1968_v55, 0.0 }
 0x1ab   :  { %3130 = vmatmul.msk.f32.gmra.mxu0 %vm289_vm1, %v213_v33  ;;  %v2033_v51 = vmax.f32 %v1905_v13, 0.0 }
 0x1ac   :  { %v2846_v15 = vperm.slane %v2540_v39, %v4097_v37  ;;  %v2970_v58 = vperm.slane %v2604_v62, %v4097_v37  ;;  %v2228_v16 = vmul.f32 %v4197_v54, %v2096_v27 }
 0x1ad   :  { %v1781_v24 = vpop.f32.mrf.mxu2  ;;  %3195 = vmatmul.msk.f32.gmra.mxu3 %vm289_vm1, %v278_v8  ;;  %v2165_v62 = vmul.f32 %v4197_v54, %v2033_v51 }
 0x1ae   :  { %v2847_v59 = vsel %vm2793_vm6, %v2846_v15, %v2845_v31  ;;  %v2971_v10 = vsel %vm2793_vm6, %v2970_v58, %v2969_v29  ;;  %v1782_v28 = vadd.f32 %v1781_v24, %v995_v38  ;;  %2327 = vadd.xlane.f32.xlu2 %v2164_v2  ;;  %2455 = vadd.xlane.f32.xlu0 %v2228_v16  ;;  %v1592_v32 = vpop.f32.mrf.mxu1  ;;  %v214_v38 = vld [vmem:[%s5251_s1 + $0x1b0] sm:$0xff] }
 0x1af   :  { %v1593_v55 = vadd.f32 %v1592_v32, %v806_v56  ;;  %v279_v56 = vld [vmem:[%s5251_s1 + $0x3b8] sm:$0xff]  ;;  %v82_v32 = vld [vmem:[%s5252_s0 + $0x1b0] sm:$0xff] }
 0x1b0   :  { %v1969_v52 = vadd.f32 %v4174_v20, %v1782_v28  ;;  %v809_v33 = vpop.f32.mrf.mxu0  ;;  %v1001_v29 = vpop.f32.mrf.mxu3 }
 0x1b1   :  { %v2428_v31 = vpop.xlane.xlu1 %2427  ;;  %v2300_v43 = vpop.xlane.xlu0 %2299  ;;  %3258 = vmatmul.msk.f32.gmra.mxu1 %vm1079_vm2, %v81_v25  ;;  %v1906_v27 = vadd.f32 %v4174_v20, %v1593_v55 }
 0x1b2   :  { %v2605_v47 = vadd.f32 %v3965_v48, %v2428_v31  ;;  %v2541_v6 = vadd.f32 %v3965_v48, %v2300_v43  ;;  %3322 = vmatmul.msk.f32.gmra.mxu2 %vm1079_vm2, %v145_v50  ;;  %v2097_v39 = vmax.f32 %v1969_v52, 0.0  ;;  %v146_v50 = vld [vmem:[%s5252_s0 + $0x3b0] sm:$0xff] }
 0x1b3   :  { %3131 = vmatmul.msk.f32.gmra.mxu0 %vm289_vm1, %v214_v38 }
 0x1b4   :  { %v2972_v8 = vperm.slane %v2605_v47, %v4148_v18  ;;  %v2848_v13 = vperm.slane %v2541_v6, %v4148_v18  ;;  %v2229_v15 = vmul.f32 %v4197_v54, %v2097_v39  ;;  %v280_v47 = vld [vmem:[%s5251_s1 + $0x3c0] sm:$0xff] }
 0x1b5   :  { %v1784_v58 = vpop.f32.mrf.mxu2  ;;  %3196 = vmatmul.msk.f32.gmra.mxu3 %vm289_vm1, %v279_v56 }
 0x1b6   :  { %v2973_v2 = vsel %vm2797_vm7, %v2972_v8, %v2971_v10  ;;  %v2849_v16 = vsel %vm2797_vm7, %v2848_v13, %v2847_v59  ;;  %v1785_v24 = vadd.f32 %v1784_v58, %v998_v34  ;;  %2457 = vadd.xlane.f32.xlu1 %v2229_v15  ;;  %2329 = vadd.xlane.f32.xlu0 %v2165_v62  ;;  %v1595_v28 = vpop.f32.mrf.mxu1  ;;  %v215_v59 = vld [vmem:[%s5251_s1 + $0x1b8] sm:$0xff]  ;;  %v2034_v34 = vmax.f32 %v1906_v27, 0.0 }
 0x1b7   :  { %v1596_v25 = vadd.f32 %v1595_v28, %v809_v33  ;;  %v83_v28 = vld [vmem:[%s5252_s0 + $0x1b8] sm:$0xff] }
 0x1b8   :  { %v1970_v51 = vadd.f32 %v4174_v20, %v1785_v24  ;;  %v812_v52 = vpop.f32.mrf.mxu0  ;;  %v1004_v10 = vpop.f32.mrf.mxu3  ;;  %v2166_v27 = vmul.f32 %v4197_v54, %v2034_v34 }
 0x1b9   :  { %v2430_v55 = vpop.xlane.xlu2 %2429  ;;  %v2302_v38 = vpop.xlane.xlu1 %2301  ;;  %3259 = vmatmul.msk.f32.gmra.mxu1 %vm1079_vm2, %v82_v32  ;;  %v1907_v6 = vadd.f32 %v4174_v20, %v1596_v25  ;;  %v147_v32 = vld [vmem:[%s5252_s0 + $0x3b8] sm:$0xff] }
 0x1ba   :  { %v2606_v31 = vadd.f32 %v3965_v48, %v2430_v55  ;;  %v2542_v33 = vadd.f32 %v3965_v48, %v2302_v38  ;;  %3323 = vmatmul.msk.f32.gmra.mxu2 %vm1079_vm2, %v146_v50  ;;  %v2098_v43 = vmax.f32 %v1970_v51, 0.0 }
 0x1bb   :  { %3132 = vmatmul.msk.f32.gmra.mxu0 %vm289_vm1, %v215_v59  ;;  %v2035_v25 = vmax.f32 %v1907_v6, 0.0 }
 0x1bc   :  { %v2974_v39 = vperm.slane %v2606_v31, %v4178_v41  ;;  %v2850_v56 = vperm.slane %v2542_v33, %v4178_v41  ;;  %v2230_v62 = vmul.f32 %v4197_v54, %v2098_v43  ;;  %v4659_v33 = vld [vmem:[%s5253_s4] ss:$0 sm:$0xff] }
 0x1bd   :  { %v1787_v8 = vpop.f32.mrf.mxu2  ;;  %3197 = vmatmul.msk.f32.gmra.mxu3 %vm289_vm1, %v280_v47 }
 0x1be   :  { %v2975_v13 = vsel %vm2801_vm8, %v2974_v39, %v2973_v2  ;;  %v2851_v15 = vsel %vm2801_vm8, %v2850_v56, %v2849_v16  ;;  %v1788_v58 = vadd.f32 %v1787_v8, %v1001_v29  ;;  %2459 = vadd.xlane.f32.xlu2 %v2230_v62  ;;  %2331 = vadd.xlane.f32.xlu1 %v2166_v27  ;;  %v1598_v24 = vpop.f32.mrf.mxu1  ;;  %v216_v29 = vld [vmem:[%s5251_s1 + $0x1c0] sm:$0xff] }
 0x1bf   :  { %v1599_v51 = vadd.f32 %v1598_v24, %v812_v52  ;;  %v2167_v52 = vmul.f32 %v4197_v54, %v2035_v25  ;;  %v84_v24 = vld [vmem:[%s5252_s0 + $0x1c0] sm:$0xff] }
 0x1c0   :  { %v1971_v50 = vadd.f32 %v4174_v20, %v1788_v58  ;;  %v815_v59 = vpop.f32.mrf.mxu0  ;;  %v1007_v2 = vpop.f32.mrf.mxu3  ;;  %v281_v20 = vld [vmem:[%s5251_s1 + $0x3c8] sm:$0xff] }
 0x1c1   :  { %v2304_v16 = vpop.xlane.xlu2 %2303  ;;  %v2432_v34 = vpop.xlane.xlu0 %2431  ;;  %3260 = vmatmul.msk.f32.gmra.mxu1 %vm1079_vm2, %v83_v28  ;;  %v1908_v43 = vadd.f32 %v4659_v33, %v1599_v51 }
 0x1c2   :  { %v2543_v55 = vadd.f32 %v3965_v48, %v2304_v16  ;;  %v2607_v38 = vadd.f32 %v3965_v48, %v2432_v34  ;;  %3324 = vmatmul.msk.f32.gmra.mxu2 %vm1079_vm2, %v147_v32  ;;  %v2099_v31 = vmax.f32 %v1971_v50, 0.0  ;;  %v282_v34 = vld [vmem:[%s5251_s1 + $0x3d0] sm:$0xff] }
 0x1c3   :  { %3133 = vmatmul.msk.f32.gmra.mxu0 %vm289_vm1, %v216_v29 }
 0x1c4   :  { %v2852_v47 = vperm.slane %v2543_v55, %v4211_v5  ;;  %v2976_v6 = vperm.slane %v2607_v38, %v4211_v5  ;;  %v2231_v39 = vmul.f32 %v4197_v54, %v2099_v31  ;;  %v148_v54 = vld [vmem:[%s5252_s0 + $0x3c0] sm:$0xff] }
 0x1c5   :  { %v1790_v56 = vpop.f32.mrf.mxu2  ;;  %3198 = vmatmul.msk.f32.gmra.mxu3 %vm289_vm1, %v281_v20  ;;  %v4692_v20 = vld [vmem:[%s5254_s5] ss:$0 sm:$0xff] }
 0x1c6   :  { %v2853_v62 = vsel %vm2805_vm9, %v2852_v47, %v2851_v15  ;;  %v2977_v27 = vsel %vm2805_vm9, %v2976_v6, %v2975_v13  ;;  %v1791_v8 = vadd.f32 %v1790_v56, %v1004_v10  ;;  %2333 = vadd.xlane.f32.xlu2 %v2167_v52  ;;  %2461 = vadd.xlane.f32.xlu0 %v2231_v39  ;;  %v1601_v58 = vpop.f32.mrf.mxu1  ;;  %v217_v13 = vld [vmem:[%s5251_s1 + $0x1c8] sm:$0xff]  ;;  %v2036_v10 = vmax.f32 %v1908_v43, 0.0 }
 0x1c7   :  { %v1602_v28 = vadd.f32 %v1601_v58, %v815_v59  ;;  %v85_v58 = vld [vmem:[%s5252_s0 + $0x1c8] sm:$0xff] }
 0x1c8   :  { %v1972_v32 = vadd.f32 %v4659_v33, %v1791_v8  ;;  %v818_v25 = vpop.f32.mrf.mxu0  ;;  %v1010_v15 = vpop.f32.mrf.mxu3  ;;  %v2168_v43 = vmul.f32 %v4692_v20, %v2036_v10 }
 0x1c9   :  { %v2434_v50 = vpop.xlane.xlu1 %2433  ;;  %v2306_v51 = vpop.xlane.xlu0 %2305  ;;  %3261 = vmatmul.msk.f32.gmra.mxu1 %vm1079_vm2, %v84_v24  ;;  %v1909_v55 = vadd.f32 %v4659_v33, %v1602_v28  ;;  %v149_v28 = vld [vmem:[%s5252_s0 + $0x3c8] sm:$0xff] }
 0x1ca   :  { %v2608_v29 = vadd.f32 %v3965_v48, %v2434_v50  ;;  %v2544_v59 = vadd.f32 %v3965_v48, %v2306_v51  ;;  %3325 = vmatmul.msk.f32.gmra.mxu2 %vm1079_vm2, %v148_v54  ;;  %v2100_v16 = vmax.f32 %v1972_v32, 0.0 }
 0x1cb   :  { %3134 = vmatmul.msk.f32.gmra.mxu0 %vm289_vm1, %v217_v13  ;;  %v2037_v24 = vmax.f32 %v1909_v55, 0.0 }
 0x1cc   :  { %v2978_v38 = vperm.slane %v2608_v29, %v4239_v11  ;;  %v2854_v31 = vperm.slane %v2544_v59, %v4239_v11  ;;  %v2232_v52 = vmul.f32 %v4692_v20, %v2100_v16 }
 0x1cd   :  { %v1793_v47 = vpop.f32.mrf.mxu2  ;;  %3199 = vmatmul.msk.f32.gmra.mxu3 %vm289_vm1, %v282_v34  ;;  %v2169_v59 = vmul.f32 %v4692_v20, %v2037_v24  ;;  %v150_v24 = vld [vmem:[%s5252_s0 + $0x3d0] sm:$0xff] }
 0x1ce   :  { %v2979_v6 = vsel %vm2809_vm10, %v2978_v38, %v2977_v27  ;;  %v2855_v39 = vsel %vm2809_vm10, %v2854_v31, %v2853_v62  ;;  %v1794_v56 = vadd.f32 %v1793_v47, %v1007_v2  ;;  %2463 = vadd.xlane.f32.xlu1 %v2232_v52  ;;  %2335 = vadd.xlane.f32.xlu0 %v2168_v43  ;;  %v1604_v8 = vpop.f32.mrf.mxu1  ;;  %v218_v2 = vld [vmem:[%s5251_s1 + $0x1d0] sm:$0xff] }
 0x1cf   :  { %v1605_v32 = vadd.f32 %v1604_v8, %v818_v25  ;;  %v283_v25 = vld [vmem:[%s5251_s1 + $0x3d8] sm:$0xff]  ;;  %v86_v8 = vld [vmem:[%s5252_s0 + $0x1d0] sm:$0xff] }
 0x1d0   :  { %v1973_v54 = vadd.f32 %v4659_v33, %v1794_v56  ;;  %v821_v13 = vpop.f32.mrf.mxu0  ;;  %v1013_v62 = vpop.f32.mrf.mxu3 }
 0x1d1   :  { %v2436_v27 = vpop.xlane.xlu2 %2435  ;;  %v2308_v10 = vpop.xlane.xlu1 %2307  ;;  %3262 = vmatmul.msk.f32.gmra.mxu1 %vm1079_vm2, %v85_v58  ;;  %v1910_v16 = vadd.f32 %v4659_v33, %v1605_v32 }
 0x1d2   :  { %v2101_v50 = vmax.f32 %v1973_v54, 0.0  ;;  %v2609_v51 = vadd.f32 %v3965_v48, %v2436_v27  ;;  %v2545_v29 = vadd.f32 %v3965_v48, %v2308_v10  ;;  %3326 = vmatmul.msk.f32.gmra.mxu2 %vm1079_vm2, %v149_v28 }
 0x1d3   :  { %3135 = vmatmul.msk.f32.gmra.mxu0 %vm289_vm1, %v218_v2  ;;  %v2038_v28 = vmax.f32 %v1910_v16, 0.0 }
 0x1d4   :  { %v2980_v34 = vperm.slane %v2609_v51, %v4267_v1  ;;  %v2856_v55 = vperm.slane %v2545_v29, %v4267_v1  ;;  %v2233_v38 = vmul.f32 %v4692_v20, %v2101_v50  ;;  %v284_v50 = vld [vmem:[%s5251_s1 + $0x3e0] sm:$0xff] }
 0x1d5   :  { %v1796_v31 = vpop.f32.mrf.mxu2  ;;  %3200 = vmatmul.msk.f32.gmra.mxu3 %vm289_vm1, %v283_v25 }
 0x1d6   :  { %v2981_v52 = vsel %vm2813_vm11, %v2980_v34, %v2979_v6  ;;  %v2857_v43 = vsel %vm2813_vm11, %v2856_v55, %v2855_v39  ;;  %v1797_v47 = vadd.f32 %v1796_v31, %v1010_v15  ;;  %2465 = vadd.xlane.f32.xlu2 %v2233_v38  ;;  %2337 = vadd.xlane.f32.xlu1 %v2169_v59  ;;  %v1607_v56 = vpop.f32.mrf.mxu1  ;;  %v219_v15 = vld [vmem:[%s5251_s1 + $0x1d8] sm:$0xff] }
 0x1d7   :  { %v1608_v58 = vadd.f32 %v1607_v56, %v821_v13  ;;  %v2170_v59 = vmul.f32 %v4692_v20, %v2038_v28  ;;  %v87_v56 = vld [vmem:[%s5252_s0 + $0x1d8] sm:$0xff] }
 0x1d8   :  { %v1974_v54 = vadd.f32 %v4659_v33, %v1797_v47  ;;  %v824_v32 = vpop.f32.mrf.mxu0  ;;  %v1016_v6 = vpop.f32.mrf.mxu3 }
 0x1d9   :  { %v2310_v39 = vpop.xlane.xlu2 %2309  ;;  %v2438_v2 = vpop.xlane.xlu0 %2437  ;;  %3263 = vmatmul.msk.f32.gmra.mxu1 %vm1079_vm2, %v86_v8  ;;  %v1911_v51 = vadd.f32 %v4659_v33, %v1608_v58  ;;  %v151_v58 = vld [vmem:[%s5252_s0 + $0x3d8] sm:$0xff] }
 0x1da   :  { %v2102_v27 = vmax.f32 %v1974_v54, 0.0  ;;  %v2546_v13 = vadd.f32 %v3965_v48, %v2310_v39  ;;  %v2610_v10 = vadd.f32 %v3965_v48, %v2438_v2  ;;  %3327 = vmatmul.msk.f32.gmra.mxu2 %vm1079_vm2, %v150_v24 }
 0x1db   :  { %3136 = vmatmul.msk.f32.gmra.mxu0 %vm289_vm1, %v219_v15  ;;  %v2039_v8 = vmax.f32 %v1911_v51, 0.0 }
 0x1dc   :  { %v2858_v29 = vperm.slane %v2546_v13, %v4295_v35  ;;  %v2982_v25 = vperm.slane %v2610_v10, %v4295_v35  ;;  %v2234_v16 = vmul.f32 %v4692_v20, %v2102_v27 }
 0x1dd   :  { %v1799_v34 = vpop.f32.mrf.mxu2  ;;  %3201 = vmatmul.msk.f32.gmra.mxu3 %vm289_vm1, %v284_v50  ;;  %v2171_v13 = vmul.f32 %v4692_v20, %v2039_v8  ;;  %v152_v8 = vld [vmem:[%s5252_s0 + $0x3e0] sm:$0xff] }
 0x1de   :  { %v2859_v55 = vsel %vm2817_vm12, %v2858_v29, %v2857_v43  ;;  %v2983_v38 = vsel %vm2817_vm12, %v2982_v25, %v2981_v52  ;;  %v1800_v31 = vadd.f32 %v1799_v34, %v1013_v62  ;;  %2339 = vadd.xlane.f32.xlu2 %v2170_v59  ;;  %2467 = vadd.xlane.f32.xlu0 %v2234_v16  ;;  %v1610_v47 = vpop.f32.mrf.mxu1  ;;  %v220_v62 = vld [vmem:[%s5251_s1 + $0x1e0] sm:$0xff] }
 0x1df   :  { %v1611_v28 = vadd.f32 %v1610_v47, %v824_v32  ;;  %v285_v32 = vld [vmem:[%s5251_s1 + $0x3e8] sm:$0xff]  ;;  %v88_v47 = vld [vmem:[%s5252_s0 + $0x1e0] sm:$0xff] }
 0x1e0   :  { %v1975_v24 = vadd.f32 %v4659_v33, %v1800_v31  ;;  %v827_v54 = vpop.f32.mrf.mxu0  ;;  %v1019_v52 = vpop.f32.mrf.mxu3 }
 0x1e1   :  { %v2440_v43 = vpop.xlane.xlu1 %2439  ;;  %v2312_v15 = vpop.xlane.xlu0 %2311  ;;  %3264 = vmatmul.msk.f32.gmra.mxu1 %vm1079_vm2, %v87_v56  ;;  %v1912_v10 = vadd.f32 %v4659_v33, %v1611_v28 }
 0x1e2   :  { %v2103_v39 = vmax.f32 %v1975_v24, 0.0  ;;  %v2611_v2 = vadd.f32 %v3965_v48, %v2440_v43  ;;  %v2547_v27 = vadd.f32 %v3965_v48, %v2312_v15  ;;  %3328 = vmatmul.msk.f32.gmra.mxu2 %vm1079_vm2, %v151_v58 }
 0x1e3   :  { %3137 = vmatmul.msk.f32.gmra.mxu0 %vm289_vm1, %v220_v62  ;;  %v2040_v58 = vmax.f32 %v1912_v10, 0.0 }
 0x1e4   :  { %v2984_v50 = vperm.slane %v2611_v2, %v4323_v3  ;;  %v2860_v51 = vperm.slane %v2547_v27, %v4323_v3  ;;  %v2235_v29 = vmul.f32 %v4692_v20, %v2103_v39  ;;  %v286_v39 = vld [vmem:[%s5251_s1 + $0x3f0] sm:$0xff] }
 0x1e5   :  { %v1802_v25 = vpop.f32.mrf.mxu2  ;;  %3202 = vmatmul.msk.f32.gmra.mxu3 %vm289_vm1, %v285_v32  ;;  %v2172_v10 = vmul.f32 %v4692_v20, %v2040_v58 }
 0x1e6   :  { %v2985_v59 = vsel %vm2821_vm13, %v2984_v50, %v2983_v38  ;;  %v2861_v16 = vsel %vm2821_vm13, %v2860_v51, %v2859_v55  ;;  %v1803_v34 = vadd.f32 %v1802_v25, %v1016_v6  ;;  %2469 = vadd.xlane.f32.xlu1 %v2235_v29  ;;  %2341 = vadd.xlane.f32.xlu0 %v2171_v13  ;;  %v1613_v31 = vpop.f32.mrf.mxu1  ;;  %v221_v6 = vld [vmem:[%s5251_s1 + $0x1e8] sm:$0xff] }
 0x1e7   :  { %v1614_v56 = vadd.f32 %v1613_v31, %v827_v54  ;;  %v89_v31 = vld [vmem:[%s5252_s0 + $0x1e8] sm:$0xff] }
 0x1e8   :  { %v1976_v24 = vadd.f32 %v4659_v33, %v1803_v34  ;;  %v830_v28 = vpop.f32.mrf.mxu0  ;;  %v1022_v55 = vpop.f32.mrf.mxu3 }
 0x1e9   :  { %v2442_v38 = vpop.xlane.xlu2 %2441  ;;  %v2314_v62 = vpop.xlane.xlu1 %2313  ;;  %3265 = vmatmul.msk.f32.gmra.mxu1 %vm1079_vm2, %v88_v47  ;;  %v1913_v2 = vadd.f32 %v4659_v33, %v1614_v56  ;;  %v153_v56 = vld [vmem:[%s5252_s0 + $0x3e8] sm:$0xff] }
 0x1ea   :  { %v2104_v43 = vmax.f32 %v1976_v24, 0.0  ;;  %v2612_v54 = vadd.f32 %v3965_v48, %v2442_v38  ;;  %v2548_v15 = vadd.f32 %v3965_v48, %v2314_v62  ;;  %3329 = vmatmul.msk.f32.gmra.mxu2 %vm1079_vm2, %v152_v8 }
 0x1eb   :  { %3138 = vmatmul.msk.f32.gmra.mxu0 %vm289_vm1, %v221_v6  ;;  %v2041_v47 = vmax.f32 %v1913_v2, 0.0 }
 0x1ec   :  { %v2986_v27 = vperm.slane %v2612_v54, %v4351_v44  ;;  %v2862_v32 = vperm.slane %v2548_v15, %v4351_v44  ;;  %v2236_v13 = vmul.f32 %v4692_v20, %v2104_v43 }
 0x1ed   :  { %v1805_v50 = vpop.f32.mrf.mxu2  ;;  %3203 = vmatmul.msk.f32.gmra.mxu3 %vm289_vm1, %v286_v39  ;;  %v2173_v54 = vmul.f32 %v4692_v20, %v2041_v47  ;;  %v154_v47 = vld [vmem:[%s5252_s0 + $0x3f0] sm:$0xff] }
 0x1ee   :  { %v2987_v51 = vsel %vm5259_vm14, %v2986_v27, %v2985_v59  ;;  %v2863_v29 = vsel %vm5259_vm14, %v2862_v32, %v2861_v16  ;;  %v1806_v25 = vadd.f32 %v1805_v50, %v1019_v52  ;;  %2471 = vadd.xlane.f32.xlu2 %v2236_v13  ;;  %2343 = vadd.xlane.f32.xlu1 %v2172_v10  ;;  %v1616_v34 = vpop.f32.mrf.mxu1  ;;  %v222_v52 = vld [vmem:[%s5251_s1 + $0x1f0] sm:$0xff] }
 0x1ef   :  { %v1617_v58 = vadd.f32 %v1616_v34, %v830_v28  ;;  %v287_v28 = vld [vmem:[%s5251_s1 + $0x3f8] sm:$0xff]  ;;  %v90_v34 = vld [vmem:[%s5252_s0 + $0x1f0] sm:$0xff] }
 0x1f0   :  { %v1977_v8 = vadd.f32 %v4659_v33, %v1806_v25  ;;  %v833_v24 = vpop.f32.mrf.mxu0  ;;  %v1025_v59 = vpop.f32.mrf.mxu3 }
 0x1f1   :  { %v2316_v16 = vpop.xlane.xlu2 %2315  ;;  %v2444_v6 = vpop.xlane.xlu0 %2443  ;;  %3266 = vmatmul.msk.f32.gmra.mxu1 %vm1079_vm2, %v89_v31  ;;  %v1914_v15 = vadd.f32 %v4659_v33, %v1617_v58 }
 0x1f2   :  { %v2105_v38 = vmax.f32 %v1977_v8, 0.0  ;;  %v2549_v62 = vadd.f32 %v3965_v48, %v2316_v16  ;;  %v2613_v43 = vadd.f32 %v3965_v48, %v2444_v6  ;;  %3330 = vmatmul.msk.f32.gmra.mxu2 %vm1079_vm2, %v153_v56 }
 0x1f3   :  { %3139 = vmatmul.msk.f32.gmra.mxu0 %vm289_vm1, %v222_v52  ;;  %v2042_v56 = vmax.f32 %v1914_v15, 0.0 }
 0x1f4   :  { %v2864_v39 = vperm.slane %v2549_v62, %v4379_v22  ;;  %v2988_v2 = vperm.slane %v2613_v43, %v4379_v22  ;;  %v2237_v27 = vmul.f32 %v4692_v20, %v2105_v38 }
 0x1f5   :  { %v1808_v32 = vpop.f32.mrf.mxu2  ;;  %3204 = vmatmul.msk.f32.gmra.mxu3 %vm289_vm1, %v287_v28 }
 0x1f6   :  { %v2865_v13 = vsel %vm5258_vm15, %v2864_v39, %v2863_v29  ;;  %v2989_v10 = vsel %vm5258_vm15, %v2988_v2, %v2987_v51  ;;  %v1809_v50 = vadd.f32 %v1808_v32, %v1022_v55  ;;  %2345 = vadd.xlane.f32.xlu2 %v2173_v54  ;;  %2473 = vadd.xlane.f32.xlu0 %v2237_v27  ;;  %v1619_v25 = vpop.f32.mrf.mxu1  ;;  %v223_v55 = vld [vmem:[%s5251_s1 + $0x1f8] sm:$0xff]  ;;  %vm5260_vm15 = vcmask 982912  }
 0x1f7   :  { %v1620_v31 = vadd.f32 %v1619_v25, %v833_v24  ;;  %v2174_v54 = vmul.f32 %v4692_v20, %v2042_v56  ;;  %vm5261_vm14 = vmmov %vm5260_vm15 }
 0x1f8   :  { %v1978_v8 = vadd.f32 %v4659_v33, %v1809_v50  ;;  %v836_v58 = vpop.f32.mrf.mxu0  ;;  %v1028_v51 = vpop.f32.mrf.mxu3  ;;  %v91_v50 = vld [vmem:[%s5252_s0 + $0x1f8] sm:$0xff] }
 0x1f9   :  { %v2446_v29 = vpop.xlane.xlu1 %2445  ;;  %v2318_v52 = vpop.xlane.xlu0 %2317  ;;  %3267 = vmatmul.msk.f32.gmra.mxu1 %vm1079_vm2, %v90_v34  ;;  %v1915_v38 = vadd.f32 %v4659_v33, %v1620_v31  ;;  %v155_v34 = vld [vmem:[%s5252_s0 + $0x3f8] sm:$0xff] }
 0x1fa   :  { %v2106_v16 = vmax.f32 %v1978_v8, 0.0  ;;  %v2614_v24 = vadd.f32 %v3965_v48, %v2446_v29  ;;  %v2550_v6 = vadd.f32 %v3965_v48, %v2318_v52  ;;  %3331 = vmatmul.msk.f32.gmra.mxu2 %vm1079_vm2, %v154_v47 }
 0x1fb   :  { %3140 = vmatmul.msk.f32.gmra.mxu0 %vm289_vm1, %v223_v55  ;;  %v2043_v25 = vmax.f32 %v1915_v38, 0.0 }
 0x1fc   :  { %v2990_v62 = vperm.slane %v2614_v24, %v4407_v57  ;;  %v2866_v43 = vperm.slane %v2550_v6, %v4407_v57  ;;  %v2238_v28 = vmul.f32 %v4692_v20, %v2106_v16 }
 0x1fd   :  { %v1811_v15 = vpop.f32.mrf.mxu2 }
 0x1fe   :  { %v2991_v39 = vsel %vm5260_vm15, %v2990_v62, %v2989_v10  ;;  %v2867_v2 = vsel %vm5261_vm14, %v2866_v43, %v2865_v13  ;;  %v1812_v27 = vadd.f32 %v1811_v15, %v1025_v59  ;;  %2475 = vadd.xlane.f32.xlu1 %v2238_v28  ;;  %2347 = vadd.xlane.f32.xlu0 %v2174_v54  ;;  %v1622_v32 = vpop.f32.mrf.mxu1  ;;  %v224_v59 = vld [vmem:[%s5251_s1 + $0x200] sm:$0xff]  ;;  %vm3056_vm14 = vcmask 1041409  }
 0x1ff   :  { %v1623_v47 = vadd.f32 %v1622_v32, %v836_v58  ;;  %v2175_v58 = vmul.f32 %v4692_v20, %v2043_v25  ;;  %vm5264_vm15 = vcmask 917312  }
 0x200   :  { %v1979_v31 = vadd.f32 %v4659_v33, %v1812_v27  ;;  %v839_v56 = vpop.f32.mrf.mxu0  ;;  %v1031_v13 = vpop.f32.mrf.mxu3 }
 0x201   :  { %v2448_v10 = vpop.xlane.xlu2 %2447  ;;  %v2320_v8 = vpop.xlane.xlu1 %2319  ;;  %3268 = vmatmul.msk.f32.gmra.mxu1 %vm1079_vm2, %v91_v50  ;;  %v1916_v16 = vadd.f32 %v4659_v33, %v1623_v47 }
 0x202   :  { %v2107_v55 = vmax.f32 %v1979_v31, 0.0  ;;  %v2615_v29 = vadd.f32 %v3965_v48, %v2448_v10  ;;  %v2551_v52 = vadd.f32 %v3965_v48, %v2320_v8  ;;  %3332 = vmatmul.msk.f32.gmra.mxu2 %vm1079_vm2, %v155_v34 }
 0x203   :  { %3141 = vmatmul.msk.f32.gmra.mxu0 %vm289_vm1, %v224_v59  ;;  %v2044_v50 = vmax.f32 %v1916_v16, 0.0  ;;  %vm5262_vm1 = vcmask 851712  }
 0x204   :  { %v2992_v24 = vperm.slane %v2615_v29, %v4435_v36  ;;  %v2868_v6 = vperm.slane %v2551_v52, %v4435_v36  ;;  %v2239_v38 = vmul.f32 %v4692_v20, %v2107_v55  ;;  %vm5263_vm2 = vmmov %vm5262_vm1 }
 0x205   :  { %v1814_v62 = vpop.f32.mrf.mxu2  ;;  %v2176_v10 = vmul.f32 %v4692_v20, %v2044_v50 }
 0x206   :  { %v4872_v43 = vsel %vm2837_vm0, %v2992_v24, %v2991_v39  ;;  %v2869_v28 = vsel %vm2837_vm0, %v2868_v6, %v2867_v2  ;;  %v4875_v54 = vadd.f32 %v1814_v62, %v1028_v51  ;;  %2477 = vadd.xlane.f32.xlu2 %v2239_v38  ;;  %2349 = vadd.xlane.f32.xlu1 %v2175_v58  ;;  %v1625_v15 = vpop.f32.mrf.mxu1 }
 0x207   :  { %v4878_v27 = vsel %vm3056_vm14, %v2869_v28, %v4455_v0  ;;  %v1626_v32 = vadd.f32 %v1625_v15, %v839_v56  ;;  %vm5265_vm14 = vmmov %vm5264_vm15 }
 0x208   :  { %v842_v25 = vpop.f32.mrf.mxu0  ;;  %v1034_v34 = vpop.f32.mrf.mxu3 }
 0x209   :  { %v1917_v31 = vadd.f32 %v4659_v33, %v1626_v32  ;;  %v2450_v47 = vpop.xlane.xlu0 %2449  ;;  %v2322_v39 = vpop.xlane.xlu2 %2321 }
 0x20a   :  { %v2552_v0 = vadd.f32 %v3965_v48, %v2322_v39  ;;  %v2616_v56 = vadd.f32 %v3965_v48, %v2450_v47 }
 0x20b   :  { %v2045_v59 = vmax.f32 %v1917_v31, 0.0 }
 0x20c   :  { %v2994_v32 = vperm.slane %v2616_v56, %v4004_v19 }
 0x20d   :  { %v1817_v2 = vpop.f32.mrf.mxu2  ;;  %v2177_v51 = vmul.f32 %v4692_v20, %v2045_v59 }
 0x20e   :  { %v1818_v8 = vadd.f32 %v1817_v2, %v1031_v13  ;;  %2351 = vadd.xlane.f32.xlu2 %v2176_v10  ;;  %v1628_v55 = vpop.f32.mrf.mxu1  ;;  %v2870_v13 = vperm.slane %v2552_v0, %v4004_v19 }
 0x20f   :  { %v1629_v29 = vadd.f32 %v1628_v55, %v842_v25  ;;  %2353 = vadd.xlane.f32.xlu0 %v2177_v51 }
 0x210   :  { %v1981_v52 = vadd.f32 %v4659_v33, %v1818_v8  ;;  %v845_v58 = vpop.f32.mrf.mxu0  ;;  %v1037_v16 = vpop.f32.mrf.mxu3 }
 0x211   :  { %v2452_v24 = vpop.xlane.xlu1 %2451  ;;  %v2324_v6 = vpop.xlane.xlu0 %2323  ;;  %v1918_v15 = vadd.f32 %v4659_v33, %v1629_v29 }
 0x212   :  { %v2109_v38 = vmax.f32 %v1981_v52, 0.0  ;;  %v2617_v62 = vadd.f32 %v3965_v48, %v2452_v24  ;;  %v2553_v28 = vadd.f32 %v3965_v48, %v2324_v6 }
 0x213   :  { %v2046_v51 = vmax.f32 %v1918_v15, 0.0 }
 0x214   :  { %v2995_v50 = vperm.slane %v2617_v62, %v4016_v30  ;;  %v2871_v25 = vperm.slane %v2553_v28, %v4016_v30  ;;  %v2241_v31 = vmul.f32 %v4692_v20, %v2109_v38 }
 0x215   :  { %v1820_v47 = vpop.f32.mrf.mxu2  ;;  %v2178_v62 = vmul.f32 %v4692_v20, %v2046_v51 }
 0x216   :  { %v2996_v59 = vsel %vm2781_vm3, %v2995_v50, %v2994_v32  ;;  %v2872_v39 = vsel %vm2781_vm3, %v2871_v25, %v2870_v13  ;;  %v1821_v10 = vadd.f32 %v1820_v47, %v1034_v34  ;;  %2481 = vadd.xlane.f32.xlu1 %v2241_v31  ;;  %v1631_v2 = vpop.f32.mrf.mxu1 }
 0x217   :  { %v1632_v55 = vadd.f32 %v1631_v2, %v845_v58 }
 0x218   :  { %v1982_v8 = vadd.f32 %v4659_v33, %v1821_v10  ;;  %v848_v0 = vpop.f32.mrf.mxu0  ;;  %v1040_v29 = vpop.f32.mrf.mxu3 }
 0x219   :  { %v2454_v56 = vpop.xlane.xlu2 %2453  ;;  %v2326_v52 = vpop.xlane.xlu1 %2325  ;;  %v1919_v28 = vadd.f32 %v4659_v33, %v1632_v55 }
 0x21a   :  { %v2110_v24 = vmax.f32 %v1982_v8, 0.0  ;;  %v2618_v6 = vadd.f32 %v3965_v48, %v2454_v56  ;;  %v2554_v38 = vadd.f32 %v3965_v48, %v2326_v52 }
 0x21b   :  { %v2047_v10 = vmax.f32 %v1919_v28, 0.0 }
 0x21c   :  { %v2997_v34 = vperm.slane %v2618_v6, %v4043_v53  ;;  %v2873_v13 = vperm.slane %v2554_v38, %v4043_v53  ;;  %v2242_v15 = vmul.f32 %v4692_v20, %v2110_v24 }
 0x21d   :  { %v1823_v58 = vpop.f32.mrf.mxu2 }
 0x21e   :  { %v2998_v32 = vsel %vm2785_vm4, %v2997_v34, %v2996_v59  ;;  %v2874_v50 = vsel %vm2785_vm4, %v2873_v13, %v2872_v39  ;;  %v1824_v25 = vadd.f32 %v1823_v58, %v1037_v16  ;;  %2483 = vadd.xlane.f32.xlu2 %v2242_v15  ;;  %2355 = vadd.xlane.f32.xlu1 %v2178_v62  ;;  %v1634_v31 = vpop.f32.mrf.mxu1 }
 0x21f   :  { %v1635_v47 = vadd.f32 %v1634_v31, %v848_v0  ;;  %v2179_v0 = vmul.f32 %v4692_v20, %v2047_v10 }
 0x220   :  { %v1983_v2 = vadd.f32 %v4659_v33, %v1824_v25  ;;  %v851_v51 = vpop.f32.mrf.mxu0  ;;  %v1043_v8 = vpop.f32.mrf.mxu3 }
 0x221   :  { %v1920_v55 = vadd.f32 %v4659_v33, %v1635_v47  ;;  %v2328_v56 = vpop.xlane.xlu2 %2327  ;;  %v2456_v52 = vpop.xlane.xlu0 %2455 }
 0x222   :  { %v2111_v24 = vmax.f32 %v1983_v2, 0.0  ;;  %v2555_v6 = vadd.f32 %v3965_v48, %v2328_v56  ;;  %v2619_v59 = vadd.f32 %v3965_v48, %v2456_v52 }
 0x223   :  { %v2048_v39 = vmax.f32 %v1920_v55, 0.0 }
 0x224   :  { %v2875_v16 = vperm.slane %v2555_v6, %v4071_v12  ;;  %v2999_v38 = vperm.slane %v2619_v59, %v4071_v12  ;;  %v2243_v62 = vmul.f32 %v4692_v20, %v2111_v24 }
 0x225   :  { %v1826_v28 = vpop.f32.mrf.mxu2  ;;  %v2180_v34 = vmul.f32 %v4692_v20, %v2048_v39 }
 0x226   :  { %v2876_v13 = vsel %vm2789_vm5, %v2875_v16, %v2874_v50  ;;  %v3000_v15 = vsel %vm2789_vm5, %v2999_v38, %v2998_v32  ;;  %v1827_v58 = vadd.f32 %v1826_v28, %v1040_v29  ;;  %2357 = vadd.xlane.f32.xlu2 %v2179_v0  ;;  %2485 = vadd.xlane.f32.xlu1 %v2243_v62  ;;  %v1637_v25 = vpop.f32.mrf.mxu1 }
 0x227   :  { %v1638_v31 = vadd.f32 %v1637_v25, %v851_v51  ;;  %2359 = vadd.xlane.f32.xlu0 %v2180_v34 }
 0x228   :  { %v1984_v47 = vadd.f32 %v4659_v33, %v1827_v58  ;;  %v854_v2 = vpop.f32.mrf.mxu0  ;;  %v1046_v55 = vpop.f32.mrf.mxu3 }
 0x229   :  { %v1921_v10 = vadd.f32 %v4659_v33, %v1638_v31  ;;  %v2458_v56 = vpop.xlane.xlu1 %2457  ;;  %v2330_v52 = vpop.xlane.xlu0 %2329 }
 0x22a   :  { %v2112_v24 = vmax.f32 %v1984_v47, 0.0  ;;  %v2620_v6 = vadd.f32 %v3965_v48, %v2458_v56  ;;  %v2556_v50 = vadd.f32 %v3965_v48, %v2330_v52 }
 0x22b   :  { %v2049_v32 = vmax.f32 %v1921_v10, 0.0 }
 0x22c   :  { %v3001_v29 = vperm.slane %v2620_v6, %v4097_v37  ;;  %v2877_v59 = vperm.slane %v2556_v50, %v4097_v37  ;;  %v2244_v51 = vmul.f32 %v4692_v20, %v2112_v24 }
 0x22d   :  { %v1829_v39 = vpop.f32.mrf.mxu2  ;;  %v2181_v16 = vmul.f32 %v4692_v20, %v2049_v32 }
 0x22e   :  { %v3002_v38 = vsel %vm2793_vm6, %v3001_v29, %v3000_v15  ;;  %v2878_v0 = vsel %vm2793_vm6, %v2877_v59, %v2876_v13  ;;  %v1830_v62 = vadd.f32 %v1829_v39, %v1043_v8  ;;  %2487 = vadd.xlane.f32.xlu2 %v2244_v51  ;;  %v1640_v28 = vpop.f32.mrf.mxu1 }
 0x22f   :  { %v1641_v34 = vadd.f32 %v1640_v28, %v854_v2  ;;  %2361 = vadd.xlane.f32.xlu1 %v2181_v16 }
 0x230   :  { %v1985_v58 = vadd.f32 %v4659_v33, %v1830_v62  ;;  %v857_v25 = vpop.f32.mrf.mxu0  ;;  %v1049_v31 = vpop.f32.mrf.mxu3 }
 0x231   :  { %v1922_v47 = vadd.f32 %v4659_v33, %v1641_v34  ;;  %v2460_v10 = vpop.xlane.xlu2 %2459  ;;  %v2332_v56 = vpop.xlane.xlu1 %2331 }
 0x232   :  { %v2113_v52 = vmax.f32 %v1985_v58, 0.0  ;;  %v2621_v24 = vadd.f32 %v3965_v48, %v2460_v10  ;;  %v2557_v15 = vadd.f32 %v3965_v48, %v2332_v56 }
 0x233   :  { %v2050_v6 = vmax.f32 %v1922_v47, 0.0 }
 0x234   :  { %v3003_v8 = vperm.slane %v2621_v24, %v4148_v18  ;;  %v2879_v13 = vperm.slane %v2557_v15, %v4148_v18  ;;  %v2245_v2 = vmul.f32 %v4692_v20, %v2113_v52 }
 0x235   :  { %v1832_v50 = vpop.f32.mrf.mxu2  ;;  %v2182_v32 = vmul.f32 %v4692_v20, %v2050_v6 }
 0x236   :  { %v3004_v29 = vsel %vm2797_vm7, %v3003_v8, %v3002_v38  ;;  %v2880_v59 = vsel %vm2797_vm7, %v2879_v13, %v2878_v0  ;;  %v1833_v51 = vadd.f32 %v1832_v50, %v1046_v55  ;;  %v1643_v39 = vpop.f32.mrf.mxu1 }
 0x237   :  { %v1644_v16 = vadd.f32 %v1643_v39, %v857_v25  ;;  %2363 = vadd.xlane.f32.xlu2 %v2182_v32  ;;  %2489 = vadd.xlane.f32.xlu1 %v2245_v2 }
 0x238   :  { %v1986_v62 = vadd.f32 %v4659_v33, %v1833_v51  ;;  %v860_v28 = vpop.f32.mrf.mxu0  ;;  %v1052_v34 = vpop.f32.mrf.mxu3 }
 0x239   :  { %v1923_v58 = vadd.f32 %v4659_v33, %v1644_v16  ;;  %v2334_v47 = vpop.xlane.xlu2 %2333  ;;  %v2462_v10 = vpop.xlane.xlu0 %2461 }
 0x23a   :  { %v2114_v56 = vmax.f32 %v1986_v62, 0.0  ;;  %v2558_v52 = vadd.f32 %v3965_v48, %v2334_v47  ;;  %v2622_v38 = vadd.f32 %v3965_v48, %v2462_v10 }
 0x23b   :  { %v2051_v24 = vmax.f32 %v1923_v58, 0.0 }
 0x23c   :  { %v2881_v55 = vperm.slane %v2558_v52, %v4178_v41  ;;  %v3005_v0 = vperm.slane %v2622_v38, %v4178_v41  ;;  %v2246_v25 = vmul.f32 %v4692_v20, %v2114_v56 }
 0x23d   :  { %v1835_v15 = vpop.f32.mrf.mxu2  ;;  %v2183_v6 = vmul.f32 %v4692_v20, %v2051_v24 }
 0x23e   :  { %v2882_v8 = vsel %vm2801_vm8, %v2881_v55, %v2880_v59  ;;  %v3006_v13 = vsel %vm2801_vm8, %v3005_v0, %v3004_v29  ;;  %v1836_v2 = vadd.f32 %v1835_v15, %v1049_v31  ;;  %v1646_v50 = vpop.f32.mrf.mxu1 }
 0x23f   :  { %v1647_v32 = vadd.f32 %v1646_v50, %v860_v28  ;;  %2491 = vadd.xlane.f32.xlu2 %v2246_v25  ;;  %2365 = vadd.xlane.f32.xlu0 %v2183_v6 }
 0x240   :  { %v1987_v51 = vadd.f32 %v4659_v33, %v1836_v2  ;;  %v863_v39 = vpop.f32.mrf.mxu0  ;;  %v1055_v16 = vpop.f32.mrf.mxu3 }
 0x241   :  { %v2464_v62 = vpop.xlane.xlu1 %2463  ;;  %v2336_v58 = vpop.xlane.xlu0 %2335  ;;  %v1924_v59 = vadd.f32 %v4659_v33, %v1647_v32 }
 0x242   :  { %v2115_v47 = vmax.f32 %v1987_v51, 0.0  ;;  %v2623_v10 = vadd.f32 %v3965_v48, %v2464_v62  ;;  %v2559_v56 = vadd.f32 %v3965_v48, %v2336_v58 }
 0x243   :  { %v2052_v25 = vmax.f32 %v1924_v59, 0.0 }
 0x244   :  { %v3007_v29 = vperm.slane %v2623_v10, %v4211_v5  ;;  %v2883_v31 = vperm.slane %v2559_v56, %v4211_v5  ;;  %v2247_v28 = vmul.f32 %v4692_v20, %v2115_v47 }
 0x245   :  { %v1838_v52 = vpop.f32.mrf.mxu2 }
 0x246   :  { %v3008_v38 = vsel %vm2805_vm9, %v3007_v29, %v3006_v13  ;;  %v2884_v24 = vsel %vm2805_vm9, %v2883_v31, %v2882_v8  ;;  %v1839_v55 = vadd.f32 %v1838_v52, %v1052_v34  ;;  %2493 = vadd.xlane.f32.xlu1 %v2247_v28  ;;  %v1649_v0 = vpop.f32.mrf.mxu1  ;;  %v2184_v13 = vmul.f32 %v4692_v20, %v2052_v25 }
 0x247   :  { %v1650_v6 = vadd.f32 %v1649_v0, %v863_v39 }
 0x248   :  { %v1988_v15 = vadd.f32 %v4659_v33, %v1839_v55  ;;  %v866_v2 = vpop.f32.mrf.mxu0  ;;  %v1058_v47 = vpop.f32.mrf.mxu3 }
 0x249   :  { %v2466_v50 = vpop.xlane.xlu2 %2465  ;;  %v2338_v32 = vpop.xlane.xlu1 %2337  ;;  %v1925_v8 = vadd.f32 %v4659_v33, %v1650_v6 }
 0x24a   :  { %v2116_v51 = vmax.f32 %v1988_v15, 0.0  ;;  %v2624_v62 = vadd.f32 %v3965_v48, %v2466_v50  ;;  %v2560_v58 = vadd.f32 %v3965_v48, %v2338_v32 }
 0x24b   :  { %v2053_v55 = vmax.f32 %v1925_v8, 0.0 }
 0x24c   :  { %v3009_v34 = vperm.slane %v2624_v62, %v4239_v11  ;;  %v2885_v10 = vperm.slane %v2560_v58, %v4239_v11  ;;  %v2248_v56 = vmul.f32 %v4692_v20, %v2116_v51 }
 0x24d   :  { %v1841_v39 = vpop.f32.mrf.mxu2  ;;  %v2185_v58 = vmul.f32 %v4692_v20, %v2053_v55 }
 0x24e   :  { %v3010_v59 = vsel %vm2809_vm10, %v3009_v34, %v3008_v38  ;;  %v2886_v29 = vsel %vm2809_vm10, %v2885_v10, %v2884_v24  ;;  %v1842_v31 = vadd.f32 %v1841_v39, %v1055_v16  ;;  %2495 = vadd.xlane.f32.xlu2 %v2248_v56  ;;  %2367 = vadd.xlane.f32.xlu1 %v2184_v13  ;;  %v1652_v28 = vpop.f32.mrf.mxu1 }
 0x24f   :  { %v1653_v52 = vadd.f32 %v1652_v28, %v866_v2 }
 0x250   :  { %v1989_v0 = vadd.f32 %v4659_v33, %v1842_v31  ;;  %v869_v25 = vpop.f32.mrf.mxu0  ;;  %v4970_v62 = vpop.f32.mrf.mxu3 }
 0x251   :  { %v1926_v15 = vadd.f32 %v4659_v33, %v1653_v52  ;;  %v2340_v6 = vpop.xlane.xlu2 %2339  ;;  %v2468_v50 = vpop.xlane.xlu0 %2467 }
 0x252   :  { %v2117_v32 = vmax.f32 %v1989_v0, 0.0  ;;  %v2561_v51 = vadd.f32 %v3965_v48, %v2340_v6  ;;  %v2625_v38 = vadd.f32 %v3965_v48, %v2468_v50 }
 0x253   :  { %v2054_v16 = vmax.f32 %v1926_v15, 0.0 }
 0x254   :  { %v2887_v24 = vperm.slane %v2561_v51, %v4267_v1  ;;  %v3011_v2 = vperm.slane %v2625_v38, %v4267_v1  ;;  %v2249_v13 = vmul.f32 %v4692_v20, %v2117_v32 }
 0x255   :  { %v1844_v8 = vpop.f32.mrf.mxu2  ;;  %v2186_v34 = vmul.f32 %v4692_v20, %v2054_v16 }
 0x256   :  { %v2888_v10 = vsel %vm2813_vm11, %v2887_v24, %v2886_v29  ;;  %v3012_v56 = vsel %vm2813_vm11, %v3011_v2, %v3010_v59  ;;  %v1845_v39 = vadd.f32 %v1844_v8, %v1058_v47  ;;  %2369 = vadd.xlane.f32.xlu2 %v2185_v58  ;;  %2497 = vadd.xlane.f32.xlu1 %v2249_v13  ;;  %v1655_v31 = vpop.f32.mrf.mxu1 }
 0x257   :  { %v1656_v28 = vadd.f32 %v1655_v31, %v869_v25  ;;  %2371 = vadd.xlane.f32.xlu0 %v2186_v34 }
 0x258   :  { %v1990_v52 = vadd.f32 %v4659_v33, %v1845_v39  ;;  %v872_v0 = vpop.f32.mrf.mxu0  ;;  %v1064_v38 = vpop.f32.mrf.mxu3 }
 0x259   :  { %v1927_v55 = vadd.f32 %v4659_v33, %v1656_v28  ;;  %v2470_v15 = vpop.xlane.xlu1 %2469  ;;  %v2342_v6 = vpop.xlane.xlu0 %2341 }
 0x25a   :  { %v2118_v50 = vmax.f32 %v1990_v52, 0.0  ;;  %v2626_v32 = vadd.f32 %v3965_v48, %v2470_v15  ;;  %v2562_v29 = vadd.f32 %v3965_v48, %v2342_v6 }
 0x25b   :  { %v2055_v51 = vmax.f32 %v1927_v55, 0.0 }
 0x25c   :  { %v3013_v47 = vperm.slane %v2626_v32, %v4295_v35  ;;  %v2889_v59 = vperm.slane %v2562_v29, %v4295_v35  ;;  %v2250_v25 = vmul.f32 %v4692_v20, %v2118_v50 }
 0x25d   :  { %v2187_v16 = vmul.f32 %v4692_v20, %v2055_v51  ;;  %v4987_v24 = vpop.f32.mrf.mxu2 }
 0x25e   :  { %v3014_v2 = vsel %vm2817_vm12, %v3013_v47, %v3012_v56  ;;  %v2890_v58 = vsel %vm2817_vm12, %v2889_v59, %v2888_v10  ;;  %2499 = vadd.xlane.f32.xlu2 %v2250_v25  ;;  %v1658_v13 = vpop.f32.mrf.mxu1 }
 0x25f   :  { %v1659_v8 = vadd.f32 %v1658_v13, %v872_v0  ;;  %2373 = vadd.xlane.f32.xlu1 %v2187_v16 }
 0x260   :  { %v875_v34 = vpop.f32.mrf.mxu0  ;;  %v1067_v51 = vpop.f32.mrf.mxu3 }
 0x261   :  { %v1928_v39 = vadd.f32 %v4659_v33, %v1659_v8  ;;  %v2472_v31 = vpop.xlane.xlu2 %2471  ;;  %v2344_v28 = vpop.xlane.xlu1 %2343 }
 0x262   :  { %v2627_v52 = vadd.f32 %v3965_v48, %v2472_v31  ;;  %v2563_v55 = vadd.f32 %v3965_v48, %v2344_v28 }
 0x263   :  { %v2056_v15 = vmax.f32 %v1928_v39, 0.0 }
 0x264   :  { %v3015_v6 = vperm.slane %v2627_v52, %v4323_v3  ;;  %v2891_v56 = vperm.slane %v2563_v55, %v4323_v3 }
 0x265   :  { %v2188_v10 = vmul.f32 %v4692_v20, %v2056_v15  ;;  %v1850_v50 = vpop.f32.mrf.mxu2 }
 0x266   :  { %v3016_v0 = vsel %vm2821_vm13, %v3015_v6, %v3014_v2  ;;  %v2892_v32 = vsel %vm2821_vm13, %v2891_v56, %v2890_v58  ;;  %v1661_v29 = vpop.f32.mrf.mxu1 }
 0x267   :  { %v1662_v47 = vadd.f32 %v1661_v29, %v875_v34  ;;  %2375 = vadd.xlane.f32.xlu2 %v2188_v10  ;;  %v5010_v10 = vld [vmem:[%s5253_s4] ss:$0 sm:$0xff] }
 0x268   :  { %v878_v59 = vpop.f32.mrf.mxu0  ;;  %v1070_v56 = vpop.f32.mrf.mxu3 }
 0x269   :  { %v1929_v25 = vadd.f32 %v4659_v33, %v1662_v47  ;;  %v2346_v16 = vpop.xlane.xlu2 %2345  ;;  %v2474_v13 = vpop.xlane.xlu0 %2473  ;;  %v1851_v47 = vadd.f32 %v1850_v50, %v1064_v38 }
 0x26a   :  { %v2564_v8 = vadd.f32 %v3965_v48, %v2346_v16  ;;  %v2628_v39 = vadd.f32 %v3965_v48, %v2474_v13 }
 0x26b   :  { %v2057_v31 = vmax.f32 %v1929_v25, 0.0 }
 0x26c   :  { %v2893_v28 = vperm.slane %v2564_v8, %v4351_v44  ;;  %v3017_v2 = vperm.slane %v2628_v39, %v4351_v44 }
 0x26d   :  { %v2189_v58 = vmul.f32 %v4692_v20, %v2057_v31  ;;  %v1853_v52 = vpop.f32.mrf.mxu2 }
 0x26e   :  { %v2894_v34 = vsel %vm5262_vm1, %v2893_v28, %v2892_v32  ;;  %v3018_v55 = vsel %vm5263_vm2, %v3017_v2, %v3016_v0  ;;  %v1664_v15 = vpop.f32.mrf.mxu1  ;;  %vm5266_vm1 = vcmask 982912  }
 0x26f   :  { %v1665_v33 = vadd.f32 %v1664_v15, %v878_v59  ;;  %2377 = vadd.xlane.f32.xlu0 %v2189_v58  ;;  %v1992_v59 = vadd.f32 %v5010_v10, %v1851_v47  ;;  %vm5267_vm2 = vmmov %vm5266_vm1 }
 0x270   :  { %v881_v6 = vpop.f32.mrf.mxu0 }
 0x271   :  { %v1930_v29 = vadd.f32 %v5010_v10, %v1665_v33  ;;  %v2476_v25 = vpop.xlane.xlu1 %2475  ;;  %v2348_v13 = vpop.xlane.xlu0 %2347  ;;  %v2120_v50 = vmax.f32 %v1992_v59, 0.0 }
 0x272   :  { %v2629_v16 = vadd.f32 %v3965_v48, %v2476_v25  ;;  %v2565_v8 = vadd.f32 %v3965_v48, %v2348_v13 }
 0x273   :  { %v2058_v32 = vmax.f32 %v1930_v29, 0.0  ;;  %v1854_v29 = vadd.f32 %v1853_v52, %v1067_v51  ;;  %v5030_v51 = vld [vmem:[%s5254_s5] ss:$0 sm:$0xff] }
 0x274   :  { %v3019_v0 = vperm.slane %v2629_v16, %v4379_v22  ;;  %v2895_v15 = vperm.slane %v2565_v8, %v4379_v22  ;;  %v2252_v8 = vmul.f32 %v5030_v51, %v2120_v50 }
 0x275   :  { %v2190_v39 = vmul.f32 %v4692_v20, %v2058_v32  ;;  %v1856_v31 = vpop.f32.mrf.mxu2  ;;  %v1073_v20 = vpop.f32.mrf.mxu3  ;;  %v1993_v59 = vadd.f32 %v5010_v10, %v1854_v29 }
 0x276   :  { %v3020_v28 = vsel %vm5264_vm15, %v3019_v0, %v3018_v55  ;;  %v1667_v2 = vpop.f32.mrf.mxu1  ;;  %v2896_v0 = vsel %vm5265_vm14, %v2895_v15, %v2894_v34  ;;  %v1848_v15 = vadd.f32 %v4987_v24, %v4970_v62  ;;  %vm3058_vm15 = vcmask 1042434  }
 0x277   :  { %v1668_v58 = vadd.f32 %v1667_v2, %v881_v6  ;;  %2379 = vadd.xlane.f32.xlu1 %v2190_v39  ;;  %v2121_v29 = vmax.f32 %v1993_v59, 0.0  ;;  %vm5268_vm14 = vcmask 851712  }
 0x278   :  { %v884_v38 = vpop.f32.mrf.mxu0  ;;  %v1991_v62 = vadd.f32 %v5010_v10, %v1848_v15 }
 0x279   :  { %v1931_v33 = vadd.f32 %v5010_v10, %v1668_v58  ;;  %v2478_v25 = vpop.xlane.xlu2 %2477  ;;  %v2350_v16 = vpop.xlane.xlu1 %2349  ;;  %v2253_v59 = vmul.f32 %v5030_v51, %v2121_v29 }
 0x27a   :  { %v2630_v47 = vadd.f32 %v3965_v48, %v2478_v25  ;;  %v2566_v13 = vadd.f32 %v3965_v48, %v2350_v16 }
 0x27b   :  { %v2059_v32 = vmax.f32 %v1931_v33, 0.0 }
 0x27c   :  { %v3021_v55 = vperm.slane %v2630_v47, %v4407_v57  ;;  %v2897_v6 = vperm.slane %v2566_v13, %v4407_v57  ;;  %v1857_v13 = vadd.f32 %v1856_v31, %v1070_v56 }
 0x27d   :  { %v2191_v52 = vmul.f32 %v5030_v51, %v2059_v32  ;;  %v1859_v39 = vpop.f32.mrf.mxu2 }
 0x27e   :  { %v5035_v2 = vsel %vm5266_vm1, %v3021_v55, %v3020_v28  ;;  %v2898_v58 = vsel %vm5267_vm2, %v2897_v6, %v2896_v0  ;;  %v1670_v33 = vpop.f32.mrf.mxu1  ;;  %v1076_v0 = vpop.f32.mrf.mxu3  ;;  %v1994_v31 = vadd.f32 %v5010_v10, %v1857_v13  ;;  %vm5269_vm1 = vcmask 917312  }
 0x27f   :  { %v1671_v25 = vadd.f32 %v1670_v33, %v884_v38  ;;  %2381 = vadd.xlane.f32.xlu2 %v2191_v52  ;;  %2503 = vadd.xlane.f32.xlu1 %v2252_v8  ;;  %v1980_v38 = vadd.f32 %v5010_v10, %v4875_v54  ;;  %vm3060_vm2 = vcmask 1043459  }
 0x280   :  { %v887_v34 = vpop.f32.mrf.mxu0  ;;  %v2122_v29 = vmax.f32 %v1994_v31, 0.0 }
 0x281   :  { %v1932_v16 = vadd.f32 %v5010_v10, %v1671_v25  ;;  %v1674_v47 = vadd.f32 %v3698_v23, %v887_v34  ;;  %v2352_v50 = vpop.xlane.xlu2 %2351  ;;  %v2108_v25 = vmax.f32 %v1980_v38, 0.0  ;;  %v2119_v34 = vmax.f32 %v1991_v62, 0.0 }
 0x282   :  { %v2567_v28 = vadd.f32 %v3965_v48, %v2352_v50 }
 0x283   :  { %v2060_v32 = vmax.f32 %v1932_v16, 0.0  ;;  %v1933_v55 = vadd.f32 %v5010_v10, %v1674_v47  ;;  %v1860_v16 = vadd.f32 %v1859_v39, %v1073_v20  ;;  %v2240_v50 = vmul.f32 %v5030_v51, %v2108_v25  ;;  %v2354_v39 = vpop.xlane.xlu0 %2353 }
 0x284   :  { %v2899_v6 = vperm.slane %v2567_v28, %v4435_v36  ;;  %v2254_v28 = vmul.f32 %v5030_v51, %v2122_v29 }
 0x285   :  { %v2061_v24 = vmax.f32 %v1933_v55, 0.0  ;;  %v2192_v23 = vmul.f32 %v5030_v51, %v2060_v32  ;;  %v1862_v56 = vpop.f32.mrf.mxu2 }
 0x286   :  { %v2900_v52 = vsel %vm2837_vm0, %v2899_v6, %v2898_v58  ;;  %v1863_v33 = vadd.f32 %v1862_v56, %v1076_v0  ;;  %v2251_v58 = vmul.f32 %v5030_v51, %v2119_v34 }
 0x287   :  { %v5053_v8 = vsel %vm3058_vm15, %v2900_v52, %v4878_v27  ;;  %2505 = vadd.xlane.f32.xlu2 %v2253_v59  ;;  %2383 = vadd.xlane.f32.xlu0 %v2192_v23  ;;  %v2193_v54 = vmul.f32 %v5030_v51, %v2061_v24  ;;  %v1995_v27 = vadd.f32 %v5010_v10, %v1860_v16  ;;  %vm5270_vm15 = vcmask 982912  }
 0x288   :  { %v1996_v47 = vadd.f32 %v5010_v10, %v1863_v33  ;;  %v2568_v23 = vadd.f32 %v3965_v48, %v2354_v39 }
 0x289   :  { %v2482_v15 = vpop.xlane.xlu1 %2481  ;;  %2385 = vadd.xlane.f32.xlu1 %v2193_v54  ;;  %v2123_v6 = vmax.f32 %v1995_v27, 0.0 }
 0x28a   :  { %v2124_v13 = vmax.f32 %v1996_v47, 0.0  ;;  %v2632_v32 = vadd.f32 %v3965_v48, %v2482_v15  ;;  %v2901_v34 = vperm.slane %v2568_v23, %v4004_v19 }
 0x28b   :  { %v2255_v56 = vmul.f32 %v5030_v51, %v2123_v6 }
 0x28c   :  { %v2256_v0 = vmul.f32 %v5030_v51, %v2124_v13  ;;  %v3025_v62 = vperm.slane %v2632_v32, %v4004_v19 }
 0x28f   :  { %2479 = vadd.xlane.f32.xlu2 %v2240_v50  ;;  %2501 = vadd.xlane.f32.xlu0 %v2251_v58 }
 0x291   :  { %v2484_v55 = vpop.xlane.xlu2 %2483  ;;  %v2356_v38 = vpop.xlane.xlu1 %2355  ;;  %2507 = vadd.xlane.f32.xlu1 %v2254_v28 }
 0x292   :  { %v2633_v20 = vadd.f32 %v3965_v48, %v2484_v55  ;;  %v2569_v24 = vadd.f32 %v3965_v48, %v2356_v38 }
 0x294   :  { %v3026_v10 = vperm.slane %v2633_v20, %v4016_v30  ;;  %v2902_v31 = vperm.slane %v2569_v24, %v4016_v30 }
 0x296   :  { %v3027_v59 = vsel %vm2781_vm3, %v3026_v10, %v3025_v62  ;;  %v2903_v47 = vsel %vm2781_vm3, %v2902_v31, %v2901_v34 }
 0x297   :  { %2511 = vadd.xlane.f32.xlu2 %v2256_v0 }
 0x299   :  { %v2358_v52 = vpop.xlane.xlu2 %2357  ;;  %v2486_v54 = vpop.xlane.xlu1 %2485  ;;  %2509 = vadd.xlane.f32.xlu1 %v2255_v56 }
 0x29a   :  { %v2570_v33 = vadd.f32 %v3965_v48, %v2358_v52  ;;  %v2634_v25 = vadd.f32 %v3965_v48, %v2486_v54  ;;  %v2360_v15 = vpop.xlane.xlu0 %2359 }
 0x29b   :  { %v2571_v58 = vadd.f32 %v3965_v48, %v2360_v15 }
 0x29c   :  { %v2904_v29 = vperm.slane %v2570_v33, %v4043_v53  ;;  %v3028_v16 = vperm.slane %v2634_v25, %v4043_v53 }
 0x29d   :  { %v2906_v13 = vperm.slane %v2571_v58, %v4071_v12 }
 0x29e   :  { %v2905_v51 = vsel %vm2785_vm4, %v2904_v29, %v2903_v47  ;;  %v3029_v50 = vsel %vm2785_vm4, %v3028_v16, %v3027_v59 }
 0x29f   :  { %v2907_v39 = vsel %vm2789_vm5, %v2906_v13, %v2905_v51 }
 0x2a1   :  { %v2488_v27 = vpop.xlane.xlu2 %2487 }
 0x2a2   :  { %v2635_v28 = vadd.f32 %v3965_v48, %v2488_v27  ;;  %v2362_v32 = vpop.xlane.xlu1 %2361 }
 0x2a3   :  { %v2572_v55 = vadd.f32 %v3965_v48, %v2362_v32 }
 0x2a4   :  { %v3030_v38 = vperm.slane %v2635_v28, %v4071_v12 }
 0x2a5   :  { %v2908_v20 = vperm.slane %v2572_v55, %v4097_v37 }
 0x2a6   :  { %v5087_v6 = vsel %vm2789_vm5, %v3030_v38, %v3029_v50 }
 0x2a7   :  { %v2909_v0 = vsel %vm2793_vm6, %v2908_v20, %v2907_v39  ;;  %v2585_v39 = vadd.f32 %v3965_v48, %v4063_v4 }
 0x2aa   :  { %v2364_v62 = vpop.xlane.xlu2 %2363  ;;  %v2490_v10 = vpop.xlane.xlu1 %2489 }
 0x2ab   :  { %v2573_v16 = vadd.f32 %v3965_v48, %v2364_v62  ;;  %v5106_v62 = vadd.f32 %v3965_v48, %v4121_v60 }
 0x2ad   :  { %v2910_v58 = vperm.slane %v2573_v16, %v4148_v18 }
 0x2b2   :  { %v2492_v24 = vpop.xlane.xlu2 %2491  ;;  %v2366_v54 = vpop.xlane.xlu0 %2365 }
 0x2b3   :  { %v2574_v47 = vadd.f32 %v3965_v48, %v2366_v54  ;;  %v5112_v54 = vadd.f32 %v3965_v48, %v4125_v61 }
 0x2b5   :  { %v2912_v27 = vperm.slane %v2574_v47, %v4178_v41 }
 0x2b9   :  { %v2494_v59 = vpop.xlane.xlu1 %2493 }
 0x2c1   :  { %v2496_v23 = vpop.xlane.xlu2 %2495  ;;  %v2368_v56 = vpop.xlane.xlu1 %2367 }
 0x2c2   :  { %v2575_v51 = vadd.f32 %v3965_v48, %v2368_v56  ;;  %v2911_v56 = vsel %vm2797_vm7, %v2910_v58, %v2909_v0 }
 0x2c4   :  { %v2914_v13 = vperm.slane %v2575_v51, %v4211_v5 }
 0x2c9   :  { %v2370_v31 = vpop.xlane.xlu2 %2369  ;;  %v2498_v52 = vpop.xlane.xlu1 %2497 }
 0x2ca   :  { %v2372_v34 = vpop.xlane.xlu0 %2371  ;;  %v2576_v50 = vadd.f32 %v3965_v48, %v2370_v31 }
 0x2cb   :  { %v2577_v28 = vadd.f32 %v3965_v48, %v2372_v34  ;;  %v5116_v34 = vadd.f32 %v3965_v48, %v4145_v17  ;;  %v2933_v17 = vperm.slane %v2585_v39, %v4016_v30  ;;  %v2590_v30 = vadd.f32 %v3965_v48, %v4183_v45 }
 0x2cc   :  { %v2916_v55 = vperm.slane %v2576_v50, %v4239_v11  ;;  %v2935_v50 = vperm.slane %v5106_v62, %v4043_v53  ;;  %v2638_v45 = vadd.f32 %v3965_v48, %v2494_v59 }
 0x2cd   :  { %v2918_v0 = vperm.slane %v2577_v28, %v4267_v1 }
 0x2d1   :  { %v5090_v33 = vpop.xlane.xlu2 %2499 }
 0x2d2   :  { %v2374_v25 = vpop.xlane.xlu1 %2373 }
 0x2d3   :  { %v2578_v38 = vadd.f32 %v3965_v48, %v2374_v25  ;;  %v2913_v25 = vsel %vm2801_vm8, %v2912_v27, %v2911_v56  ;;  %v2939_v27 = vperm.slane %v5112_v54, %v4097_v37 }
 0x2d4   :  { %v2915_v60 = vsel %vm2805_vm9, %v2914_v13, %v2913_v25  ;;  %v2937_v13 = vperm.slane %v5116_v34, %v4071_v12 }
 0x2d5   :  { %v2917_v47 = vsel %vm2809_vm10, %v2916_v55, %v2915_v60  ;;  %v2920_v61 = vperm.slane %v2578_v38, %v4295_v35  ;;  %v2591_v38 = vadd.f32 %v3965_v48, %v4216_v9  ;;  %v2639_v9 = vadd.f32 %v3965_v48, %v2496_v23 }
 0x2d6   :  { %v2919_v53 = vsel %vm2813_vm11, %v2918_v0, %v2917_v47  ;;  %v2593_v60 = vadd.f32 %v3965_v48, %v4272_v7 }
 0x2d7   :  { %v2921_v12 = vsel %vm2817_vm12, %v2920_v61, %v2919_v53  ;;  %v3038_v7 = vperm.slane %v2639_v9, %v4211_v5 }
 0x2da   :  { %v2376_v15 = vpop.xlane.xlu2 %2375 }
 0x2db   :  { %v2579_v31 = vadd.f32 %v3965_v48, %v2376_v15 }
 0x2dd   :  { %v2922_v58 = vperm.slane %v2579_v31, %v4323_v3 }
 0x2df   :  { %v2923_v56 = vsel %vm2821_vm13, %v2922_v58, %v2921_v12  ;;  %v2945_v58 = vperm.slane %v2591_v38, %v4211_v5 }
 0x2e2   :  { %v2378_v32 = vpop.xlane.xlu0 %2377 }
 0x2e3   :  { %v2580_v4 = vadd.f32 %v3965_v48, %v2378_v32  ;;  %v2589_v32 = vadd.f32 %v3965_v48, %v4150_v21  ;;  %v2592_v21 = vadd.f32 %v3965_v48, %v4244_v42 }
 0x2e5   :  { %v2924_v28 = vperm.slane %v2580_v4, %v4351_v44 }
 0x2e7   :  { %v2925_v34 = vsel %vm5268_vm14, %v2924_v28, %v2923_v56 }
 0x2ea   :  { %v2380_v29 = vpop.xlane.xlu1 %2379 }
 0x2eb   :  { %v2581_v15 = vadd.f32 %v3965_v48, %v2380_v29  ;;  %v2636_v29 = vadd.f32 %v3965_v48, %v2490_v10 }
 0x2ed   :  { %v2926_v55 = vperm.slane %v2581_v15, %v4379_v22  ;;  %v3032_v54 = vperm.slane %v2636_v29, %v4097_v37  ;;  %v2641_v37 = vadd.f32 %v3965_v48, %v5090_v33  ;;  %v3036_v15 = vperm.slane %v2638_v45, %v4178_v41 }
 0x2ee   :  { %v2947_v33 = vperm.slane %v2592_v21, %v4239_v11  ;;  %v2598_v21 = vadd.f32 %v3965_v48, %v4412_v63  ;;  %v2599_v45 = vadd.f32 %v3965_v48, %v4441_v46 }
 0x2ef   :  { %v2927_v4 = vsel %vm5269_vm1, %v2926_v55, %v2925_v34  ;;  %v2594_v55 = vadd.f32 %v3965_v48, %v4300_v40  ;;  %v2596_v40 = vadd.f32 %v3965_v48, %v4356_v49 }
 0x2f2   :  { %v2382_v20 = vpop.xlane.xlu2 %2381  ;;  %v5120_v16 = vpop.xlane.xlu1 %2503 }
 0x2f3   :  { %v2582_v51 = vadd.f32 %v3965_v48, %v2382_v20  ;;  %v2637_v20 = vadd.f32 %v3965_v48, %v2492_v24  ;;  %v2640_v24 = vadd.f32 %v3965_v48, %v2498_v52  ;;  %v2941_v52 = vperm.slane %v2589_v32, %v4148_v18 }
 0x2f5   :  { %v2928_v10 = vperm.slane %v2582_v51, %v4407_v57  ;;  %v3034_v0 = vperm.slane %v2637_v20, %v4148_v18  ;;  %v2943_v51 = vperm.slane %v2590_v30, %v4178_v41  ;;  %v3033_v18 = vsel %vm2793_vm6, %v3032_v54, %v5087_v6 }
 0x2f6   :  { %v3040_v28 = vperm.slane %v2640_v24, %v4239_v11  ;;  %v3042_v30 = vperm.slane %v2641_v37, %v4267_v1  ;;  %v2951_v54 = vperm.slane %v2594_v55, %v4295_v35 }
 0x2f7   :  { %v2929_v23 = vsel %vm5270_vm15, %v2928_v10, %v2927_v4  ;;  %v3035_v41 = vsel %vm2797_vm7, %v3034_v0, %v3033_v18 }
 0x2f8   :  { %v3037_v38 = vsel %vm2801_vm8, %v3036_v15, %v3035_v41 }
 0x2f9   :  { %v3039_v20 = vsel %vm2805_vm9, %v3038_v7, %v3037_v38 }
 0x2fa   :  { %v2506_v39 = vpop.xlane.xlu2 %2505  ;;  %v2384_v62 = vpop.xlane.xlu0 %2383  ;;  %v3041_v10 = vsel %vm2809_vm10, %v3040_v28, %v3039_v20 }
 0x2fb   :  { %v2583_v31 = vadd.f32 %v3965_v48, %v2384_v62  ;;  %v2644_v49 = vadd.f32 %v3965_v48, %v2506_v39  ;;  %v2955_v39 = vperm.slane %v2596_v40, %v4351_v44 }
 0x2fc   :  { %v2386_v25 = vpop.xlane.xlu1 %2385 }
 0x2fd   :  { %v2930_v42 = vperm.slane %v2583_v31, %v4435_v36  ;;  %v2584_v59 = vadd.f32 %v3965_v48, %v2386_v25  ;;  %v3048_v0 = vperm.slane %v2644_v49, %v4351_v44 }
 0x2ff   :  { %v2931_v47 = vsel %vm2837_vm0, %v2930_v42, %v2929_v23  ;;  %v2932_v61 = vperm.slane %v2584_v59, %v4004_v19  ;;  %v2949_v19 = vperm.slane %v2593_v60, %v4267_v1  ;;  %v2643_v1 = vadd.f32 %v3965_v48, %v5120_v16 }
 0x300   :  { %v5175_v29 = vsel %vm3060_vm2, %v2931_v47, %v5053_v8  ;;  %v3043_v16 = vsel %vm2813_vm11, %v3042_v30, %v3041_v10  ;;  %v2959_v59 = vperm.slane %v2598_v21, %v4407_v57  ;;  %v2961_v60 = vperm.slane %v2599_v45, %v4435_v36 }
 0x301   :  { %v2934_v32 = vsel %vm2781_vm3, %v2933_v17, %v2932_v61  ;;  %v2595_v17 = vadd.f32 %v3965_v48, %v4328_v14  ;;  %v2597_v14 = vadd.f32 %v3965_v48, %v4384_v26  ;;  %v3046_v26 = vperm.slane %v2643_v1, %v4323_v3 }
 0x302   :  { %v2936_v5 = vsel %vm2785_vm4, %v2935_v50, %v2934_v32  ;;  %v2480_v53 = vpop.xlane.xlu2 %2479  ;;  %v2502_v8 = vpop.xlane.xlu0 %2501  ;;  %vm3062_vm3 = vcmask 1044484   ;;  %vm5271_vm4 = vmmov %vm5268_vm14 }
 0x303   :  { %v2938_v6 = vsel %vm2789_vm5, %v2937_v13, %v2936_v5  ;;  %v2642_v11 = vadd.f32 %v3965_v48, %v2502_v8  ;;  %v2953_v24 = vperm.slane %v2595_v17, %v4323_v3  ;;  %v2631_v46 = vadd.f32 %v3965_v48, %v2480_v53  ;;  %vm5272_vm5 = vmmov %vm5269_vm1 }
 0x304   :  { %v2940_v50 = vsel %vm2793_vm6, %v2939_v27, %v2938_v6  ;;  %v2508_v12 = vpop.xlane.xlu1 %2507  ;;  %v2957_v25 = vperm.slane %v2597_v14, %v4379_v22  ;;  %vm5273_vm6 = vmmov %vm5271_vm4 }
 0x305   :  { %v2942_v13 = vsel %vm2797_vm7, %v2941_v52, %v2940_v50  ;;  %v3044_v62 = vperm.slane %v2642_v11, %v4295_v35  ;;  %v2645_v63 = vadd.f32 %v3965_v48, %v2508_v12  ;;  %v3023_v61 = vperm.slane %v2631_v46, %v4435_v36 }
 0x306   :  { %v2944_v27 = vsel %vm2801_vm8, %v2943_v51, %v2942_v13  ;;  %vm3064_vm7 = vcmask 1045509   ;;  %vm5274_vm8 = vmmov %vm5270_vm15 }
 0x307   :  { %v2946_v56 = vsel %vm2805_vm9, %v2945_v58, %v2944_v27  ;;  %v3045_v31 = vsel %vm2817_vm12, %v3044_v62, %v3043_v16  ;;  %v3050_v23 = vperm.slane %v2645_v63, %v4379_v22  ;;  %vm3066_vm9 = vcmask 1046534  }
 0x308   :  { %v2948_v9 = vsel %vm2809_vm10, %v2947_v33, %v2946_v56  ;;  %v3047_v35 = vsel %vm2821_vm13, %v3046_v26, %v3045_v31  ;;  %vm5275_vm10 = vmmov %vm5269_vm1  ;;  %v3024_v32 = vsel %vm2837_vm0, %v3023_v61, %v5035_v2 }
 0x309   :  { %v2950_v34 = vsel %vm2813_vm11, %v2949_v19, %v2948_v9  ;;  %v3049_v51 = vsel %vm5273_vm6, %v3048_v0, %v3047_v35  ;;  %vm3068_vm11 = vcmask 1047559  }
 0x30a   :  { %v2952_v4 = vsel %vm2817_vm12, %v2951_v54, %v2950_v34  ;;  %v2512_v42 = vpop.xlane.xlu2 %2511  ;;  %v3051_v18 = vsel %vm5275_vm10, %v3050_v23, %v3049_v51  ;;  %vm5276_vm12 = vmmov %vm5274_vm8 }
 0x30b   :  { %v2954_v3 = vsel %vm2821_vm13, %v2953_v24, %v2952_v4  ;;  %v2647_v52 = vadd.f32 %v3965_v48, %v2512_v42 }
 0x30c   :  { %v2956_v37 = vsel %vm5271_vm4, %v2955_v39, %v2954_v3  ;;  %v2510_v15 = vpop.xlane.xlu1 %2509 }
 0x30d   :  { %v2958_v47 = vsel %vm5272_vm5, %v2957_v25, %v2956_v37  ;;  %v2646_v58 = vadd.f32 %v3965_v48, %v2510_v15  ;;  %v3054_v28 = vperm.slane %v2647_v52, %v4435_v36 }
 0x30e   :  { %v2960_v44 = vsel %vm5274_vm8, %v2959_v59, %v2958_v47 }
 0x30f   :  { %v2962_v7 = vsel %vm2837_vm0, %v2961_v60, %v2960_v44  ;;  %v3052_v33 = vperm.slane %v2646_v58, %v4407_v57 }
 0x310   :  { %v3063_v22 = vsel %vm3062_vm3, %v2962_v7, %v5175_v29 }
 0x311   :  { %v3065_v48 = vsel %vm3064_vm7, %v4872_v43, %v3063_v22  ;;  %v3053_v19 = vsel %vm5276_vm12, %v3052_v33, %v3051_v18 }
 0x312   :  { %v3067_v41 = vsel %vm3066_vm9, %v3024_v32, %v3065_v48  ;;  %v3055_v30 = vsel %vm2837_vm0, %v3054_v28, %v3053_v19 }
 0x313   :  { %v3069_v5 = vsel %vm3068_vm11, %v3055_v30, %v3067_v41 }
 0x314   :  { %3071 = vst [vmem:[%s5256_s7] sm:$0xff] %v3069_v5 }

</bundles_post_ra>
